<compile_context>
chip_gen: v7x
topology: tpu7x:2x2x1
jax: 0.10.0
libtpu: 0.0.40
codegen_flags: <defaults>
</compile_context>

<pallas_src>
import functools
import math

import jax
import jax.numpy as jnp
from jax.experimental import pallas as pl
from jax.experimental.pallas import tpu as pltpu


def _round_up(x, m):
    return (x + m - 1) // m * m


def gcn_layer_kernel(a_ref, x_ref, w_ref, o_ref, acc_ref, *, apply_relu):
    """One GraphConv layer, one (row-tile i, reduction-tile k) grid step.

    a_ref : [tm, tk] bf16  pre-normalized adjacency tile
    x_ref : [tk, Dp] bf16  input features for the k source-node tile
    w_ref : [Dp, Dp] bf16  padded layer weight (resident across the grid)
    o_ref : [tm, Dp]       output tile (written at the last k step)
    acc   : [tm, Dp] f32   VMEM accumulator for the neighborhood aggregation
    """
    k = pl.program_id(1)

    @pl.when(k == 0)
    def _():
        acc_ref[...] = jnp.zeros_like(acc_ref)

    # Neighborhood aggregation on the MXU (bf16 in, f32 accumulate).
    acc_ref[...] += jnp.dot(a_ref[...], x_ref[...],
                            preferred_element_type=jnp.float32)

    @pl.when(k == pl.num_programs(1) - 1)
    def _():
        # Aggregation-first ordering: with feature dims padded to a common Dp the
        # N^2 term carries Dp either way, and this avoids recomputing X @ W per
        # row tile.
        agg = acc_ref[...].astype(w_ref.dtype)
        out = jnp.dot(agg, w_ref[...], preferred_element_type=jnp.float32)
        if apply_relu:
            out = jnp.maximum(out, 0.0)
        o_ref[...] = out.astype(o_ref.dtype)


def gcn_layer(a_hat, x, w, *, apply_relu, out_dtype, tm, tk):
    Np = a_hat.shape[0]
    Dp = w.shape[1]
    assert Np % tm == 0 and Np % tk == 0
    assert tm % 8 == 0 and tk % 128 == 0 and Dp % 128 == 0

    kern = functools.partial(gcn_layer_kernel, apply_relu=apply_relu)
    return pl.pallas_call(
        kern,
        out_shape=jax.ShapeDtypeStruct((Np, Dp), out_dtype),
        grid_spec=pltpu.PrefetchScalarGridSpec(
            num_scalar_prefetch=0,
            grid=(Np // tm, Np // tk),
            in_specs=[
                pl.BlockSpec((tm, tk), lambda i, k: (i, k)),   # A_hat tile
                pl.BlockSpec((tk, Dp), lambda i, k: (k, 0)),   # H tile (k rows)
                pl.BlockSpec((Dp, Dp), lambda i, k: (0, 0)),   # W, resident
            ],
            out_specs=pl.BlockSpec((tm, Dp), lambda i, k: (i, 0)),
            scratch_shapes=[pltpu.VMEM((tm, Dp), jnp.float32)],
        ),
        compiler_params=pltpu.CompilerParams(
            # Row tiles split across TensorCores (v7x megacore); reduction axis
            # is last and "arbitrary" so the VMEM accumulator is valid.
            dimension_semantics=("parallel", "arbitrary"),
        ),
    )(a_hat, x, w)


def gnn_forward(adj, features, weights, *, tm=256, tk=512,
                compute_dtype=jnp.bfloat16):
    """3-layer GCN: relu, relu, no activation (matches GNNModel.forward)."""
    N = adj.shape[0]
    D_in = features.shape[1]
    D_out = weights[-1].shape[1]

    # --- One-time preprocessing in f32 (XLA): fold both degree norms into A ---
    in_deg = jnp.clip(jnp.sum(adj, axis=1, keepdims=True), 1.0, None)    # [N,1]
    out_deg = jnp.clip(jnp.sum(adj, axis=0, keepdims=True), 1.0, None)   # [1,N]
    a_hat = jax.lax.rsqrt(in_deg) * adj * jax.lax.rsqrt(out_deg)         # [N,N]

    # --- Zero-pad to lane-dense / tileable shapes ---
    LANE = 128
    Np = _round_up(N, (tm * tk) // math.gcd(tm, tk))
    Dp = _round_up(max([features.shape[1]] + [w.shape[1] for w in weights]), LANE)

    a_hat = jnp.pad(a_hat, ((0, Np - N), (0, Np - N))).astype(compute_dtype)
    h = jnp.pad(features, ((0, Np - N), (0, Dp - D_in))).astype(compute_dtype)
    w_pad = [
        jnp.pad(w, ((0, Dp - w.shape[0]), (0, Dp - w.shape[1]))).astype(compute_dtype)
        for w in weights
    ]

    n_layers = len(weights)
    for li, w in enumerate(w_pad):
        last = li == n_layers - 1
        h = gcn_layer(
            a_hat, h, w,
            apply_relu=not last,
            out_dtype=jnp.float32 if last else compute_dtype,  # bf16 intermediates
            tm=tm, tk=tk,
        )
    return h[:N, :D_out]


def reference_forward(adj, features, weights):
    """Pure-JAX f32 reference for correctness checking."""
    in_deg = jnp.clip(jnp.sum(adj, axis=1, keepdims=True), 1.0, None)
    out_deg = jnp.clip(jnp.sum(adj, axis=0, keepdims=True).T, 1.0, None)
    dn = jax.lax.rsqrt(in_deg)
    ds = jax.lax.rsqrt(out_deg)
    h = features
    for li, w in enumerate(weights):
        h = dn * (adj @ (ds * h)) @ w
        if li < len(weights) - 1:
            h = jnp.maximum(h, 0.0)
    return h


if __name__ == "__main__":
    # Deliberately not a multiple of the tile sizes to exercise the padding path.
    N = 1000
    IN_DIM, H_DIM, OUT_DIM = 32, 64, 8

    key = jax.random.PRNGKey(0)
    k_adj, k_feat, k_w1, k_w2, k_w3 = jax.random.split(key, 5)

    # Deterministic random graph: dense 0/1 adjacency + self loops (no isolated nodes).
    adj = (jax.random.uniform(k_adj, (N, N)) < 0.05).astype(jnp.float32)
    adj = jnp.maximum(adj, jnp.eye(N, dtype=jnp.float32))

    features = jax.random.normal(k_feat, (N, IN_DIM), dtype=jnp.float32)

    # GraphConv weights: [in, out], bias=False.
    def init_w(k, fan_in, fan_out):
        scale = (2.0 / (fan_in + fan_out)) ** 0.5
        return scale * jax.random.normal(k, (fan_in, fan_out), dtype=jnp.float32)

    weights = [
        init_w(k_w1, IN_DIM, H_DIM),
        init_w(k_w2, H_DIM, H_DIM),
        init_w(k_w3, H_DIM, OUT_DIM),
    ]

    fwd = jax.jit(functools.partial(gnn_forward, tm=256, tk=512))
    out = jax.block_until_ready(fwd(adj, features, weights))

    ref = reference_forward(adj, features, weights)
    assert out.shape == (N, OUT_DIM)
    # bf16 adjacency/activations/weights => compare relative to the output scale.
    rel_err = float(jnp.max(jnp.abs(out - ref)) / (jnp.max(jnp.abs(ref)) + 1e-12))
    assert rel_err < 5e-2, f"mismatch vs reference: rel_err={rel_err}"

    print("KERNEL_OK")
</pallas_src>

<mosaic_0001>
module attributes {stable_mosaic.version = 11 : i64} {
  func.func @gcn_layer_kernel(%arg0: i32, %arg1: i32, %arg2: memref<256x512xbf16, #tpu.memory_space<vmem>>, %arg3: memref<512x128xbf16, #tpu.memory_space<vmem>>, %arg4: memref<128x128xbf16, #tpu.memory_space<vmem>>, %arg5: memref<256x128xbf16, #tpu.memory_space<vmem>>, %arg6: memref<256x128xf32, #tpu.memory_space<vmem>>) attributes {dimension_semantics = [#tpu.dimension_semantics<parallel>, #tpu.dimension_semantics<arbitrary>], iteration_bounds = array<i64: 4, 2>, scalar_prefetch = 0 : i64, scratch_operands = 1 : i64, tpu.core_type = #tpu.core_type<tc>, window_params = [{transform_indices = @transform_0, window_bounds = array<i64: 256, 512>}, {transform_indices = @transform_1, window_bounds = array<i64: 512, 128>}, {pipeline_mode = #tpu.pipeline_mode<synchronous>, transform_indices = @transform_2, window_bounds = array<i64: 128, 128>}, {transform_indices = @transform_3, window_bounds = array<i64: 256, 128>}]} {
    %c0_i32 = arith.constant 0 : i32
    %0 = arith.cmpi eq, %arg1, %c0_i32 : i32
    %1 = arith.extui %0 : i1 to i32
    %c0_i32_0 = arith.constant 0 : i32
    %2 = arith.cmpi ne, %1, %c0_i32_0 : i32
    scf.if %2 {
      %cst_9 = arith.constant 0.000000e+00 : f32
      %12 = vector.broadcast %cst_9 : f32 to vector<256x128xf32>
      %c0_10 = arith.constant 0 : index
      %c0_11 = arith.constant 0 : index
      %13 = vector.load %arg6[%c0_10, %c0_11] : memref<256x128xf32, #tpu.memory_space<vmem>>, vector<256x128xf32>
      tpu.vector_store %arg6[%c0_10, %c0_11], %12 {strides = array<i32>} : memref<256x128xf32, #tpu.memory_space<vmem>>, vector<256x128xf32>,
    } else {
    }
    %c0 = arith.constant 0 : index
    %c0_1 = arith.constant 0 : index
    %3 = vector.load %arg6[%c0, %c0_1] : memref<256x128xf32, #tpu.memory_space<vmem>>, vector<256x128xf32>
    %c0_2 = arith.constant 0 : index
    %c0_3 = arith.constant 0 : index
    %4 = vector.load %arg2[%c0_2, %c0_3] : memref<256x512xbf16, #tpu.memory_space<vmem>>, vector<256x512xbf16>
    %c0_4 = arith.constant 0 : index
    %c0_5 = arith.constant 0 : index
    %5 = vector.load %arg3[%c0_4, %c0_5] : memref<512x128xbf16, #tpu.memory_space<vmem>>, vector<512x128xbf16>
    %cst = arith.constant dense<0.000000e+00> : vector<256x128xf32>
    %6 = tpu.matmul %4, %5, %cst {dimension_numbers = #tpu.dot_dimension_numbers<[1], [0], [0], [1], [0, 0, 1, 1], [], []>} : vector<256x512xbf16>, vector<512x128xbf16>, vector<256x128xf32> -> vector<256x128xf32>
    %7 = arith.addf %3, %6 : vector<256x128xf32>
    %c0_6 = arith.constant 0 : index
    %c0_7 = arith.constant 0 : index
    %8 = vector.load %arg6[%c0_6, %c0_7] : memref<256x128xf32, #tpu.memory_space<vmem>>, vector<256x128xf32>
    tpu.vector_store %arg6[%c0_6, %c0_7], %7 {strides = array<i32>} : memref<256x128xf32, #tpu.memory_space<vmem>>, vector<256x128xf32>,
    %c1_i32 = arith.constant 1 : i32
    %9 = arith.cmpi eq, %arg1, %c1_i32 : i32
    %10 = arith.extui %9 : i1 to i32
    %c0_i32_8 = arith.constant 0 : i32
    %11 = arith.cmpi ne, %10, %c0_i32_8 : i32
    scf.if %11 {
      %c0_9 = arith.constant 0 : index
      %c0_10 = arith.constant 0 : index
      %12 = vector.load %arg6[%c0_9, %c0_10] : memref<256x128xf32, #tpu.memory_space<vmem>>, vector<256x128xf32>
      %13 = arith.truncf %12 : vector<256x128xf32> to vector<256x128xbf16>
      %c0_11 = arith.constant 0 : index
      %c0_12 = arith.constant 0 : index
      %14 = vector.load %arg4[%c0_11, %c0_12] : memref<128x128xbf16, #tpu.memory_space<vmem>>, vector<128x128xbf16>
      %cst_13 = arith.constant dense<0.000000e+00> : vector<256x128xf32>
      %15 = tpu.matmul %13, %14, %cst_13 {dimension_numbers = #tpu.dot_dimension_numbers<[1], [0], [0], [1], [0, 0, 1, 1], [], []>} : vector<256x128xbf16>, vector<128x128xbf16>, vector<256x128xf32> -> vector<256x128xf32>
      %cst_14 = arith.constant 0.000000e+00 : f32
      %16 = vector.broadcast %cst_14 : f32 to vector<256x128xf32>
      %17 = arith.maximumf %15, %16 : vector<256x128xf32>
      %18 = arith.truncf %17 : vector<256x128xf32> to vector<256x128xbf16>
      %c0_15 = arith.constant 0 : index
      %c0_16 = arith.constant 0 : index
      %19 = vector.load %arg5[%c0_15, %c0_16] : memref<256x128xbf16, #tpu.memory_space<vmem>>, vector<256x128xbf16>
      tpu.vector_store %arg5[%c0_15, %c0_16], %18 {strides = array<i32>} : memref<256x128xbf16, #tpu.memory_space<vmem>>, vector<256x128xbf16>,
    } else {
    }
    return
  }
  func.func @transform_0(%arg0: i32, %arg1: i32) -> (i32, i32) {
    %c0_i32 = arith.constant 0 : i32
    return %arg0, %arg1 : i32, i32
  }
  func.func @transform_1(%arg0: i32, %arg1: i32) -> (i32, i32) {
    %c0_i32 = arith.constant 0 : i32
    %c0_i32_0 = arith.constant 0 : i32
    return %arg1, %c0_i32 : i32, i32
  }
  func.func @transform_2(%arg0: i32, %arg1: i32) -> (i32, i32) {
    %c0_i32 = arith.constant 0 : i32
    %c0_i32_0 = arith.constant 0 : i32
    %c0_i32_1 = arith.constant 0 : i32
    return %c0_i32, %c0_i32_0 : i32, i32
  }
  func.func @transform_3(%arg0: i32, %arg1: i32) -> (i32, i32) {
    %c0_i32 = arith.constant 0 : i32
    %c0_i32_0 = arith.constant 0 : i32
    return %arg0, %c0_i32 : i32, i32
  }
}

module attributes {stable_mosaic.version = 11 : i64} {
  func.func @gcn_layer_kernel(%arg0: i32, %arg1: i32, %arg2: memref<256x512xbf16, #tpu.memory_space<vmem>>, %arg3: memref<512x128xbf16, #tpu.memory_space<vmem>>, %arg4: memref<128x128xbf16, #tpu.memory_space<vmem>>, %arg5: memref<256x128xf32, #tpu.memory_space<vmem>>, %arg6: memref<256x128xf32, #tpu.memory_space<vmem>>) attributes {dimension_semantics = [#tpu.dimension_semantics<parallel>, #tpu.dimension_semantics<arbitrary>], iteration_bounds = array<i64: 4, 2>, scalar_prefetch = 0 : i64, scratch_operands = 1 : i64, tpu.core_type = #tpu.core_type<tc>, window_params = [{transform_indices = @transform_0, window_bounds = array<i64: 256, 512>}, {transform_indices = @transform_1, window_bounds = array<i64: 512, 128>}, {pipeline_mode = #tpu.pipeline_mode<synchronous>, transform_indices = @transform_2, window_bounds = array<i64: 128, 128>}, {transform_indices = @transform_3, window_bounds = array<i64: 256, 128>}]} {
    %c0_i32 = arith.constant 0 : i32
    %0 = arith.cmpi eq, %arg1, %c0_i32 : i32
    %1 = arith.extui %0 : i1 to i32
    %c0_i32_0 = arith.constant 0 : i32
    %2 = arith.cmpi ne, %1, %c0_i32_0 : i32
    scf.if %2 {
      %cst_9 = arith.constant 0.000000e+00 : f32
      %12 = vector.broadcast %cst_9 : f32 to vector<256x128xf32>
      %c0_10 = arith.constant 0 : index
      %c0_11 = arith.constant 0 : index
      %13 = vector.load %arg6[%c0_10, %c0_11] : memref<256x128xf32, #tpu.memory_space<vmem>>, vector<256x128xf32>
      tpu.vector_store %arg6[%c0_10, %c0_11], %12 {strides = array<i32>} : memref<256x128xf32, #tpu.memory_space<vmem>>, vector<256x128xf32>,
    } else {
    }
    %c0 = arith.constant 0 : index
    %c0_1 = arith.constant 0 : index
    %3 = vector.load %arg6[%c0, %c0_1] : memref<256x128xf32, #tpu.memory_space<vmem>>, vector<256x128xf32>
    %c0_2 = arith.constant 0 : index
    %c0_3 = arith.constant 0 : index
    %4 = vector.load %arg2[%c0_2, %c0_3] : memref<256x512xbf16, #tpu.memory_space<vmem>>, vector<256x512xbf16>
    %c0_4 = arith.constant 0 : index
    %c0_5 = arith.constant 0 : index
    %5 = vector.load %arg3[%c0_4, %c0_5] : memref<512x128xbf16, #tpu.memory_space<vmem>>, vector<512x128xbf16>
    %cst = arith.constant dense<0.000000e+00> : vector<256x128xf32>
    %6 = tpu.matmul %4, %5, %cst {dimension_numbers = #tpu.dot_dimension_numbers<[1], [0], [0], [1], [0, 0, 1, 1], [], []>} : vector<256x512xbf16>, vector<512x128xbf16>, vector<256x128xf32> -> vector<256x128xf32>
    %7 = arith.addf %3, %6 : vector<256x128xf32>
    %c0_6 = arith.constant 0 : index
    %c0_7 = arith.constant 0 : index
    %8 = vector.load %arg6[%c0_6, %c0_7] : memref<256x128xf32, #tpu.memory_space<vmem>>, vector<256x128xf32>
    tpu.vector_store %arg6[%c0_6, %c0_7], %7 {strides = array<i32>} : memref<256x128xf32, #tpu.memory_space<vmem>>, vector<256x128xf32>,
    %c1_i32 = arith.constant 1 : i32
    %9 = arith.cmpi eq, %arg1, %c1_i32 : i32
    %10 = arith.extui %9 : i1 to i32
    %c0_i32_8 = arith.constant 0 : i32
    %11 = arith.cmpi ne, %10, %c0_i32_8 : i32
    scf.if %11 {
      %c0_9 = arith.constant 0 : index
      %c0_10 = arith.constant 0 : index
      %12 = vector.load %arg6[%c0_9, %c0_10] : memref<256x128xf32, #tpu.memory_space<vmem>>, vector<256x128xf32>
      %13 = arith.truncf %12 : vector<256x128xf32> to vector<256x128xbf16>
      %c0_11 = arith.constant 0 : index
      %c0_12 = arith.constant 0 : index
      %14 = vector.load %arg4[%c0_11, %c0_12] : memref<128x128xbf16, #tpu.memory_space<vmem>>, vector<128x128xbf16>
      %cst_13 = arith.constant dense<0.000000e+00> : vector<256x128xf32>
      %15 = tpu.matmul %13, %14, %cst_13 {dimension_numbers = #tpu.dot_dimension_numbers<[1], [0], [0], [1], [0, 0, 1, 1], [], []>} : vector<256x128xbf16>, vector<128x128xbf16>, vector<256x128xf32> -> vector<256x128xf32>
      %c0_14 = arith.constant 0 : index
      %c0_15 = arith.constant 0 : index
      %16 = vector.load %arg5[%c0_14, %c0_15] : memref<256x128xf32, #tpu.memory_space<vmem>>, vector<256x128xf32>
      tpu.vector_store %arg5[%c0_14, %c0_15], %15 {strides = array<i32>} : memref<256x128xf32, #tpu.memory_space<vmem>>, vector<256x128xf32>,
    } else {
    }
    return
  }
  func.func @transform_0(%arg0: i32, %arg1: i32) -> (i32, i32) {
    %c0_i32 = arith.constant 0 : i32
    return %arg0, %arg1 : i32, i32
  }
  func.func @transform_1(%arg0: i32, %arg1: i32) -> (i32, i32) {
    %c0_i32 = arith.constant 0 : i32
    %c0_i32_0 = arith.constant 0 : i32
    return %arg1, %c0_i32 : i32, i32
  }
  func.func @transform_2(%arg0: i32, %arg1: i32) -> (i32, i32) {
    %c0_i32 = arith.constant 0 : i32
    %c0_i32_0 = arith.constant 0 : i32
    %c0_i32_1 = arith.constant 0 : i32
    return %c0_i32, %c0_i32_0 : i32, i32
  }
  func.func @transform_3(%arg0: i32, %arg1: i32) -> (i32, i32) {
    %c0_i32 = arith.constant 0 : i32
    %c0_i32_0 = arith.constant 0 : i32
    return %arg0, %c0_i32 : i32, i32
  }
}

</mosaic_0001>

<bundles_post_ra>
// kernel: gnn_forward.3
= control target key start
LH: loop header
LB: loop body
LE: loop exit
PB: predicated region body
PF: predicated region fallthrough
CT: control target
= control target key end

     0   :  { %s2877_s12 = smov 0   ;;  %s2879_s13 = smov 0   ;;  %s3245_s0 = inlined_call_operand.vmem [shape: bf16[1024,1024], index: 0, kind: input, shape index: {}]   ;;  %s3246_s1 = inlined_call_operand.vmem [shape: bf16[1024,128], index: 1, kind: input, shape index: {}]   ;;  %s3247_s2 = inlined_call_operand.vmem [shape: bf16[128,128], index: 2, kind: input, shape index: {}]   ;;  %s3248_s3 = inlined_call_operand.vmem [shape: bf16[1024,128], index: 3, kind: output, shape index: {}]  }
   0x1   :  { %s2881_s14 = smov 0   ;;  %s2883_s15 = smov 0  }
   0x2   :  { %s2885_s16 = smov 0   ;;  %s2887_s17 = smov 0  }
   0x3   :  { %s2889_s18 = smov 0  }
   0x4 LB: > { %s22_s19 = sadd.s32 1, %s2846_s16  ;;  %s25_s20 = sadd.s32 1, %s2850_s17  ;;  %s2854_s18 = sphi %s2889_s18, %s13_s18   ;;  %s2850_s17 = sphi %s2887_s17, %s3254_s17   ;;  %s2846_s16 = sphi %s2885_s16, %s3253_s16   ;;  %s2842_s15 = sphi %s2883_s15, %s3252_s15   ;;  %s2838_s14 = sphi %s2881_s14, %s3251_s14   ;;  %s2834_s13 = sphi %s2879_s13, %s3250_s13   ;;  %s2830_s12 = sphi %s2877_s12, %s3249_s12  }
   0x5   : > { %p23_p0 = scmp.ge.s32.totalorder %s22_s19, 2  ;;  %p41_p1 = scmp.ne.s32.totalorder %s2834_s13, %s2830_s12 }
   0x6   : > { %p42_p2 = scmp.eq.s32.totalorder %s2854_s18, 0  ;;  %s34_s24 = sadd.s32 1, %s2834_s13 }
   0x7   : > { %s3256_s19 = smov (%p23_p0, %s22_s19), 0  ;;  %s3258_s20 = smov (!%p23_p0, %s25_s20), %s2850_s17 }
   0x8   : > { %p43_p3 = por %p42_p2, %p41_p1  ;;  %p27_p4 = scmp.ge.s32.totalorder %s3258_s20, 4 }
   0x9   : > { %s30_s21 = ssub.s32 %s2846_s16, %s3256_s19  ;;  %p2015_p6 = scmp.ge.s32.totalorder %s2854_s18, 8 }
   0xa   : > { %s3260_s20 = smov (%p27_p4, %s3258_s20), 0 }
   0xb   : > { %s29_s22 = ssub.s32 %s2850_s17, %s3260_s20  ;;  %143 = sbr.rel (%p2015_p6) target bundleno = 57 (0x39), region = 20 }
   0xc   : > { %s31_s23 = sor.u32 %s30_s21, %s29_s22 }
   0xd   : > { %p32_p5 = scmp.eq.s32.totalorder %s31_s23, 0 }
   0xf   : > { %s2928_s25 = scalar_select %p32_p5, %s2834_s13, %s34_s24  }
  0x12   : > { %146 = sbr.rel (!%p43_p3) target bundleno = 57 (0x39), region = 24  ;;  %s148_s26 = sand.u32 (%p43_p3), 1, %s2834_s13  }
  0x13   : > { %s2018_s27 = sshll.u32 (%p43_p3), %s2846_s16, 2  ;;  %s2016_s28 = sshll.u32 (%p43_p3), %s148_s26, 9 }
  0x14   : > { %s2167_s29 = sshll.u32 (%p43_p3), %s2850_s17, 8  ;;  %s2942_s8 = scalar_lea.vmem (%p43_p3), [#allocation3], %s2016_s28 }
  0x15   : > { %s154_s30 = sadd.s32 (%p43_p3), %s2167_s29, %s2018_s27 }
  0x16   : > { %s2020_s4 = sshll.u32 (%p43_p3), %s154_s30, 2 }
  0x17   : > { %s2937_s7 = scalar_lea.vmem (%p43_p3), %s3245_s0, %s2020_s4 }
  0x18   : > { %v169_v0 = vld [vmem:[%s2937_s7] sm:$0xff] (%p43_p3)  ;;  %v171_v1 = vld [vmem:[%s2937_s7 + $0x8] sm:$0xff] (%p43_p3) }
  0x19   : > { %v173_v2 = vld [vmem:[%s2937_s7 + $0x20] sm:$0xff]  ;;  %170 = vst [vmem:[%s2942_s8] sm:$0xff] %v169_v0  ;;  %172 = vst [vmem:[%s2942_s8 + $0x8] sm:$0xff] %v171_v1  ;;  %v175_v3 = vld [vmem:[%s2937_s7 + $0x28] sm:$0xff] }
  0x1a   : > { %174 = vst [vmem:[%s2942_s8 + $0x10] sm:$0xff] %v173_v2  ;;  %v177_v4 = vld [vmem:[%s2937_s7 + $0x40] sm:$0xff]  ;;  %v179_v5 = vld [vmem:[%s2937_s7 + $0x48] sm:$0xff]  ;;  %176 = vst [vmem:[%s2942_s8 + $0x18] sm:$0xff] %v175_v3 }
  0x1b   : > { %178 = vst [vmem:[%s2942_s8 + $0x20] sm:$0xff] %v177_v4  ;;  %180 = vst [vmem:[%s2942_s8 + $0x28] sm:$0xff] %v179_v5  ;;  %v181_v6 = vld [vmem:[%s2937_s7 + $0x60] sm:$0xff]  ;;  %v183_v7 = vld [vmem:[%s2937_s7 + $0x68] sm:$0xff] }
  0x1c   : > { %v185_v8 = vld [vmem:[%s2937_s7 + $0x80] sm:$0xff]  ;;  %182 = vst [vmem:[%s2942_s8 + $0x30] sm:$0xff] %v181_v6  ;;  %184 = vst [vmem:[%s2942_s8 + $0x38] sm:$0xff] %v183_v7  ;;  %v187_v9 = vld [vmem:[%s2937_s7 + $0x88] sm:$0xff] }
  0x1d   : > { %186 = vst [vmem:[%s2942_s8 + $0x40] sm:$0xff] %v185_v8  ;;  %v189_v10 = vld [vmem:[%s2937_s7 + $0xa0] sm:$0xff]  ;;  %v191_v11 = vld [vmem:[%s2937_s7 + $0xa8] sm:$0xff]  ;;  %188 = vst [vmem:[%s2942_s8 + $0x48] sm:$0xff] %v187_v9 }
  0x1e   : > { %190 = vst [vmem:[%s2942_s8 + $0x50] sm:$0xff] %v189_v10  ;;  %192 = vst [vmem:[%s2942_s8 + $0x58] sm:$0xff] %v191_v11  ;;  %v193_v12 = vld [vmem:[%s2937_s7 + $0xc0] sm:$0xff]  ;;  %v195_v13 = vld [vmem:[%s2937_s7 + $0xc8] sm:$0xff] }
  0x1f   : > { %v197_v14 = vld [vmem:[%s2937_s7 + $0xe0] sm:$0xff]  ;;  %194 = vst [vmem:[%s2942_s8 + $0x60] sm:$0xff] %v193_v12  ;;  %196 = vst [vmem:[%s2942_s8 + $0x68] sm:$0xff] %v195_v13  ;;  %v199_v15 = vld [vmem:[%s2937_s7 + $0xe8] sm:$0xff] }
  0x20   : > { %198 = vst [vmem:[%s2942_s8 + $0x70] sm:$0xff] %v197_v14  ;;  %v201_v16 = vld [vmem:[%s2937_s7 + $0x100] sm:$0xff]  ;;  %v203_v17 = vld [vmem:[%s2937_s7 + $0x108] sm:$0xff]  ;;  %200 = vst [vmem:[%s2942_s8 + $0x78] sm:$0xff] %v199_v15 }
  0x21   : > { %202 = vst [vmem:[%s2942_s8 + $0x80] sm:$0xff] %v201_v16  ;;  %204 = vst [vmem:[%s2942_s8 + $0x88] sm:$0xff] %v203_v17  ;;  %v205_v18 = vld [vmem:[%s2937_s7 + $0x120] sm:$0xff]  ;;  %v207_v19 = vld [vmem:[%s2937_s7 + $0x128] sm:$0xff] }
  0x22   : > { %v209_v20 = vld [vmem:[%s2937_s7 + $0x140] sm:$0xff]  ;;  %206 = vst [vmem:[%s2942_s8 + $0x90] sm:$0xff] %v205_v18  ;;  %208 = vst [vmem:[%s2942_s8 + $0x98] sm:$0xff] %v207_v19  ;;  %v211_v21 = vld [vmem:[%s2937_s7 + $0x148] sm:$0xff] }
  0x23   : > { %210 = vst [vmem:[%s2942_s8 + $0xa0] sm:$0xff] %v209_v20  ;;  %v213_v22 = vld [vmem:[%s2937_s7 + $0x160] sm:$0xff]  ;;  %v215_v23 = vld [vmem:[%s2937_s7 + $0x168] sm:$0xff]  ;;  %212 = vst [vmem:[%s2942_s8 + $0xa8] sm:$0xff] %v211_v21 }
  0x24   : > { %214 = vst [vmem:[%s2942_s8 + $0xb0] sm:$0xff] %v213_v22  ;;  %216 = vst [vmem:[%s2942_s8 + $0xb8] sm:$0xff] %v215_v23  ;;  %v217_v24 = vld [vmem:[%s2937_s7 + $0x180] sm:$0xff]  ;;  %v219_v25 = vld [vmem:[%s2937_s7 + $0x188] sm:$0xff] }
  0x25   : > { %v221_v26 = vld [vmem:[%s2937_s7 + $0x1a0] sm:$0xff]  ;;  %218 = vst [vmem:[%s2942_s8 + $0xc0] sm:$0xff] %v217_v24  ;;  %220 = vst [vmem:[%s2942_s8 + $0xc8] sm:$0xff] %v219_v25  ;;  %v223_v27 = vld [vmem:[%s2937_s7 + $0x1a8] sm:$0xff] }
  0x26   : > { %222 = vst [vmem:[%s2942_s8 + $0xd0] sm:$0xff] %v221_v26  ;;  %v225_v28 = vld [vmem:[%s2937_s7 + $0x1c0] sm:$0xff]  ;;  %v227_v29 = vld [vmem:[%s2937_s7 + $0x1c8] sm:$0xff]  ;;  %224 = vst [vmem:[%s2942_s8 + $0xd8] sm:$0xff] %v223_v27 }
  0x27   : > { %226 = vst [vmem:[%s2942_s8 + $0xe0] sm:$0xff] %v225_v28  ;;  %228 = vst [vmem:[%s2942_s8 + $0xe8] sm:$0xff] %v227_v29  ;;  %v229_v30 = vld [vmem:[%s2937_s7 + $0x1e0] sm:$0xff]  ;;  %v231_v31 = vld [vmem:[%s2937_s7 + $0x1e8] sm:$0xff] }
  0x28   : > { %v233_v32 = vld [vmem:[%s2937_s7 + $0x200] sm:$0xff]  ;;  %230 = vst [vmem:[%s2942_s8 + $0xf0] sm:$0xff] %v229_v30  ;;  %232 = vst [vmem:[%s2942_s8 + $0xf8] sm:$0xff] %v231_v31  ;;  %v235_v33 = vld [vmem:[%s2937_s7 + $0x208] sm:$0xff] }
  0x29   : > { %234 = vst [vmem:[%s2942_s8 + $0x100] sm:$0xff] %v233_v32  ;;  %v237_v34 = vld [vmem:[%s2937_s7 + $0x220] sm:$0xff]  ;;  %v239_v35 = vld [vmem:[%s2937_s7 + $0x228] sm:$0xff]  ;;  %236 = vst [vmem:[%s2942_s8 + $0x108] sm:$0xff] %v235_v33 }
  0x2a   : > { %238 = vst [vmem:[%s2942_s8 + $0x110] sm:$0xff] %v237_v34  ;;  %240 = vst [vmem:[%s2942_s8 + $0x118] sm:$0xff] %v239_v35  ;;  %v241_v36 = vld [vmem:[%s2937_s7 + $0x240] sm:$0xff]  ;;  %v243_v37 = vld [vmem:[%s2937_s7 + $0x248] sm:$0xff] }
  0x2b   : > { %v245_v38 = vld [vmem:[%s2937_s7 + $0x260] sm:$0xff]  ;;  %242 = vst [vmem:[%s2942_s8 + $0x120] sm:$0xff] %v241_v36  ;;  %244 = vst [vmem:[%s2942_s8 + $0x128] sm:$0xff] %v243_v37  ;;  %v247_v39 = vld [vmem:[%s2937_s7 + $0x268] sm:$0xff] }
  0x2c   : > { %246 = vst [vmem:[%s2942_s8 + $0x130] sm:$0xff] %v245_v38  ;;  %v249_v40 = vld [vmem:[%s2937_s7 + $0x280] sm:$0xff]  ;;  %v251_v41 = vld [vmem:[%s2937_s7 + $0x288] sm:$0xff]  ;;  %248 = vst [vmem:[%s2942_s8 + $0x138] sm:$0xff] %v247_v39 }
  0x2d   : > { %250 = vst [vmem:[%s2942_s8 + $0x140] sm:$0xff] %v249_v40  ;;  %252 = vst [vmem:[%s2942_s8 + $0x148] sm:$0xff] %v251_v41  ;;  %v253_v42 = vld [vmem:[%s2937_s7 + $0x2a0] sm:$0xff]  ;;  %v255_v43 = vld [vmem:[%s2937_s7 + $0x2a8] sm:$0xff] }
  0x2e   : > { %v257_v44 = vld [vmem:[%s2937_s7 + $0x2c0] sm:$0xff]  ;;  %254 = vst [vmem:[%s2942_s8 + $0x150] sm:$0xff] %v253_v42  ;;  %256 = vst [vmem:[%s2942_s8 + $0x158] sm:$0xff] %v255_v43  ;;  %v259_v45 = vld [vmem:[%s2937_s7 + $0x2c8] sm:$0xff] }
  0x2f   : > { %258 = vst [vmem:[%s2942_s8 + $0x160] sm:$0xff] %v257_v44  ;;  %v261_v46 = vld [vmem:[%s2937_s7 + $0x2e0] sm:$0xff]  ;;  %v263_v47 = vld [vmem:[%s2937_s7 + $0x2e8] sm:$0xff]  ;;  %260 = vst [vmem:[%s2942_s8 + $0x168] sm:$0xff] %v259_v45 }
  0x30   : > { %262 = vst [vmem:[%s2942_s8 + $0x170] sm:$0xff] %v261_v46  ;;  %264 = vst [vmem:[%s2942_s8 + $0x178] sm:$0xff] %v263_v47  ;;  %v265_v48 = vld [vmem:[%s2937_s7 + $0x300] sm:$0xff]  ;;  %v267_v49 = vld [vmem:[%s2937_s7 + $0x308] sm:$0xff] }
  0x31   : > { %v269_v50 = vld [vmem:[%s2937_s7 + $0x320] sm:$0xff]  ;;  %266 = vst [vmem:[%s2942_s8 + $0x180] sm:$0xff] %v265_v48  ;;  %268 = vst [vmem:[%s2942_s8 + $0x188] sm:$0xff] %v267_v49  ;;  %v271_v51 = vld [vmem:[%s2937_s7 + $0x328] sm:$0xff] }
  0x32   : > { %270 = vst [vmem:[%s2942_s8 + $0x190] sm:$0xff] %v269_v50  ;;  %v273_v52 = vld [vmem:[%s2937_s7 + $0x340] sm:$0xff]  ;;  %v275_v53 = vld [vmem:[%s2937_s7 + $0x348] sm:$0xff]  ;;  %272 = vst [vmem:[%s2942_s8 + $0x198] sm:$0xff] %v271_v51 }
  0x33   : > { %274 = vst [vmem:[%s2942_s8 + $0x1a0] sm:$0xff] %v273_v52  ;;  %276 = vst [vmem:[%s2942_s8 + $0x1a8] sm:$0xff] %v275_v53  ;;  %v277_v54 = vld [vmem:[%s2937_s7 + $0x360] sm:$0xff]  ;;  %v279_v55 = vld [vmem:[%s2937_s7 + $0x368] sm:$0xff] }
  0x34   : > { %v281_v56 = vld [vmem:[%s2937_s7 + $0x380] sm:$0xff]  ;;  %278 = vst [vmem:[%s2942_s8 + $0x1b0] sm:$0xff] %v277_v54  ;;  %280 = vst [vmem:[%s2942_s8 + $0x1b8] sm:$0xff] %v279_v55  ;;  %v283_v57 = vld [vmem:[%s2937_s7 + $0x388] sm:$0xff] }
  0x35   : > { %282 = vst [vmem:[%s2942_s8 + $0x1c0] sm:$0xff] %v281_v56  ;;  %v285_v58 = vld [vmem:[%s2937_s7 + $0x3a0] sm:$0xff]  ;;  %v287_v59 = vld [vmem:[%s2937_s7 + $0x3a8] sm:$0xff]  ;;  %284 = vst [vmem:[%s2942_s8 + $0x1c8] sm:$0xff] %v283_v57 }
  0x36   : > { %286 = vst [vmem:[%s2942_s8 + $0x1d0] sm:$0xff] %v285_v58  ;;  %288 = vst [vmem:[%s2942_s8 + $0x1d8] sm:$0xff] %v287_v59  ;;  %v289_v60 = vld [vmem:[%s2937_s7 + $0x3c0] sm:$0xff]  ;;  %v291_v61 = vld [vmem:[%s2937_s7 + $0x3c8] sm:$0xff] }
  0x37   : > { %v293_v62 = vld [vmem:[%s2937_s7 + $0x3e0] sm:$0xff]  ;;  %290 = vst [vmem:[%s2942_s8 + $0x1e0] sm:$0xff] %v289_v60  ;;  %292 = vst [vmem:[%s2942_s8 + $0x1e8] sm:$0xff] %v291_v61  ;;  %v295_v63 = vld [vmem:[%s2937_s7 + $0x3e8] sm:$0xff] }
  0x38   : > { %294 = vst [vmem:[%s2942_s8 + $0x1f0] sm:$0xff] %v293_v62  ;;  %296 = vst [vmem:[%s2942_s8 + $0x1f8] sm:$0xff] %v295_v63 }
  0x39 PF: > { %p2021_p7 = scmp.ge.s32.totalorder %s2854_s18, 1  ;;  %p310_p8 = scmp.lt.s32.totalorder %s2854_s18, 9 }
  0x3b   : > { %p311_p9 = pnand %p2021_p7, %p310_p8 }
  0x3c   : > { %s317_s9 = sand.u32 (!%p311_p9), 1, %s2830_s12   ;;  %s2023_s10 = sshll.u32 (!%p311_p9), %s2838_s14, 6 }
  0x3d   : > { %314 = sbr.rel (%p311_p9) target bundleno = 708 (0x2c4), region = 51  ;;  %s2022_s11 = sshll.u32 (!%p311_p9), %s317_s9, 9 }
  0x3e   : > { %p348_p10 = scmp.lt.s32.totalorder (!%p311_p9), %s2023_s10, 127  ;;  %s2025_s21 = sshll.u32 (!%p311_p9), %s2842_s15, 5 }
  0x3f   : > { %p354_p11 = scmp.lt.s32.totalorder (!%p311_p9), %s2025_s21, 127  ;;  %s3084_s12 = scalar_lea.vmem (!%p311_p9), [#allocation3], %s2022_s11 }
  0x40   : > { %p2027_p12 = scmp.ne.s32.totalorder (!%p311_p9), %s2838_s14, 0 }
  0x44   : > { %s3262_s10 = smov (!%p348_p10, %s2023_s10), 127  ;;  %s3264_s21 = smov (!%p354_p11, %s2025_s21), 127 }
  0x45   : > { %s2024_s22 = sshll.u32 %s3262_s10, 2  ;;  %s2026_s27 = sshll.u32 %s3264_s21, 2  ;;  %v2856_v0 = vmov (!%p2027_p12), 0.0  }
  0x46   : > { %s3077_s26 = scalar_lea.vmem %s3246_s1, %s2024_s22  ;;  %s3082_s30 = scalar_lea.vmem %s3248_s3, %s2026_s27  ;;  %364 = vst [vmem:[#allocation2] sm:$0xff] (!%p2027_p12), %v2856_v0  ;;  %365 = vst [vmem:[#allocation2 + $0x8] sm:$0xff] (!%p2027_p12), %v2856_v0 }
  0x47   : > { %363 = sbr.rel (%p2027_p12) target bundleno = 86 (0x56), region = 59  ;;  %366 = vst [vmem:[#allocation2 + $0x10] sm:$0xff] (!%p2027_p12), %v2856_v0  ;;  %367 = vst [vmem:[#allocation2 + $0x18] sm:$0xff] (!%p2027_p12), %v2856_v0 }
  0x48   : > { %368 = vst [vmem:[#allocation2 + $0x20] sm:$0xff] (!%p2027_p12), %v2856_v0  ;;  %369 = vst [vmem:[#allocation2 + $0x28] sm:$0xff] (!%p2027_p12), %v2856_v0 }
  0x49   : > { %370 = vst [vmem:[#allocation2 + $0x30] sm:$0xff] (!%p2027_p12), %v2856_v0  ;;  %371 = vst [vmem:[#allocation2 + $0x38] sm:$0xff] (!%p2027_p12), %v2856_v0 }
  0x4a   : > { %372 = vst [vmem:[#allocation2 + $0x40] sm:$0xff] (!%p2027_p12), %v2856_v0  ;;  %373 = vst [vmem:[#allocation2 + $0x48] sm:$0xff] (!%p2027_p12), %v2856_v0 }
  0x4b   : > { %374 = vst [vmem:[#allocation2 + $0x50] sm:$0xff] (!%p2027_p12), %v2856_v0  ;;  %375 = vst [vmem:[#allocation2 + $0x58] sm:$0xff] (!%p2027_p12), %v2856_v0 }
  0x4c   : > { %376 = vst [vmem:[#allocation2 + $0x60] sm:$0xff] (!%p2027_p12), %v2856_v0  ;;  %377 = vst [vmem:[#allocation2 + $0x68] sm:$0xff] (!%p2027_p12), %v2856_v0 }
  0x4d   : > { %378 = vst [vmem:[#allocation2 + $0x70] sm:$0xff] (!%p2027_p12), %v2856_v0  ;;  %379 = vst [vmem:[#allocation2 + $0x78] sm:$0xff] (!%p2027_p12), %v2856_v0 }
  0x4e   : > { %380 = vst [vmem:[#allocation2 + $0x80] sm:$0xff] %v2856_v0  ;;  %381 = vst [vmem:[#allocation2 + $0x88] sm:$0xff] %v2856_v0 }
  0x4f   : > { %382 = vst [vmem:[#allocation2 + $0x90] sm:$0xff] %v2856_v0  ;;  %383 = vst [vmem:[#allocation2 + $0x98] sm:$0xff] %v2856_v0 }
  0x50   : > { %384 = vst [vmem:[#allocation2 + $0xa0] sm:$0xff] %v2856_v0  ;;  %385 = vst [vmem:[#allocation2 + $0xa8] sm:$0xff] %v2856_v0 }
  0x51   : > { %386 = vst [vmem:[#allocation2 + $0xb0] sm:$0xff] %v2856_v0  ;;  %387 = vst [vmem:[#allocation2 + $0xb8] sm:$0xff] %v2856_v0 }
  0x52   : > { %388 = vst [vmem:[#allocation2 + $0xc0] sm:$0xff] %v2856_v0  ;;  %389 = vst [vmem:[#allocation2 + $0xc8] sm:$0xff] %v2856_v0 }
  0x53   : > { %390 = vst [vmem:[#allocation2 + $0xd0] sm:$0xff] %v2856_v0  ;;  %391 = vst [vmem:[#allocation2 + $0xd8] sm:$0xff] %v2856_v0 }
  0x54   : > { %392 = vst [vmem:[#allocation2 + $0xe0] sm:$0xff] %v2856_v0  ;;  %393 = vst [vmem:[#allocation2 + $0xe8] sm:$0xff] %v2856_v0 }
  0x55   : > { %394 = vst [vmem:[#allocation2 + $0xf0] sm:$0xff] %v2856_v0  ;;  %395 = vst [vmem:[#allocation2 + $0xf8] sm:$0xff] %v2856_v0 }
  0x56 PF: > { %v2664_v1 = vld [vmem:[%s3077_s26 + $0x40] sm:$0xff]   ;;  %v2668_v5 = vld [vmem:[%s3077_s26 + $0x48] sm:$0xff]   ;;  %v2672_v9 = vld [vmem:[%s3077_s26 + $0x50] sm:$0xff]   ;;  %p2124_p13 = scmp.ne.s32.totalorder %s2838_s14, 1 }
  0x57   : > { %v2665_v2 = vld [vmem:[%s3077_s26 + $0xc0] sm:$0xff]   ;;  %2295 = vmatprep.subr.bf16.mxu0 %v2664_v1  ;;  %v2669_v6 = vld [vmem:[%s3077_s26 + $0xc8] sm:$0xff]   ;;  %v2673_v10 = vld [vmem:[%s3077_s26 + $0xd0] sm:$0xff]  }
  0x58   : > { %v2666_v3 = vld [vmem:[%s3077_s26] sm:$0xff]   ;;  %2407 = vmatprep.subr.bf16.mxu1 %v2665_v2  ;;  %v2670_v7 = vld [vmem:[%s3077_s26 + $0x8] sm:$0xff]   ;;  %v2674_v11 = vld [vmem:[%s3077_s26 + $0x10] sm:$0xff]  }
  0x59   : > { %v2667_v4 = vld [vmem:[%s3077_s26 + $0x80] sm:$0xff]   ;;  %2296 = vmatpush3.bf16.msra.mxu0 %v2666_v3  ;;  %v2671_v8 = vld [vmem:[%s3077_s26 + $0x88] sm:$0xff]   ;;  %v2675_v12 = vld [vmem:[%s3077_s26 + $0x90] sm:$0xff]  }
  0x5a   : > { %2408 = vmatpush3.bf16.msra.mxu1 %v2667_v4  ;;  %2297 = vmatprep.subr.bf16.mxu0 %v2668_v5  ;;  %v2676_v13 = vld [vmem:[%s3077_s26 + $0x58] sm:$0xff]   ;;  %v2680_v17 = vld [vmem:[%s3077_s26 + $0x60] sm:$0xff]   ;;  %v2684_v21 = vld [vmem:[%s3077_s26 + $0x68] sm:$0xff]  }
  0x5b   : > { %2409 = vmatprep.subr.bf16.mxu1 %v2669_v6  ;;  %v2677_v14 = vld [vmem:[%s3077_s26 + $0xd8] sm:$0xff]   ;;  %v2681_v18 = vld [vmem:[%s3077_s26 + $0xe0] sm:$0xff]   ;;  %v2685_v22 = vld [vmem:[%s3077_s26 + $0xe8] sm:$0xff]  }
  0x5c   : > { %v2678_v15 = vld [vmem:[%s3077_s26 + $0x18] sm:$0xff]   ;;  %v2682_v19 = vld [vmem:[%s3077_s26 + $0x20] sm:$0xff]   ;;  %v2686_v23 = vld [vmem:[%s3077_s26 + $0x28] sm:$0xff]  }
  0x5d   : > { %2298 = vmatpush3.bf16.msra.mxu0 %v2670_v7  ;;  %v2679_v16 = vld [vmem:[%s3077_s26 + $0x98] sm:$0xff]   ;;  %v2683_v20 = vld [vmem:[%s3077_s26 + $0xa0] sm:$0xff]   ;;  %v2687_v24 = vld [vmem:[%s3077_s26 + $0xa8] sm:$0xff]  }
  0x5e   : > { %2410 = vmatpush3.bf16.msra.mxu1 %v2671_v8  ;;  %2299 = vmatprep.subr.bf16.mxu0 %v2672_v9  ;;  %v2688_v25 = vld [vmem:[%s3077_s26 + $0x70] sm:$0xff]   ;;  %v2692_v29 = vld [vmem:[%s3077_s26 + $0x78] sm:$0xff]  }
  0x5f   : > { %2411 = vmatprep.subr.bf16.mxu1 %v2673_v10  ;;  %v2689_v26 = vld [vmem:[%s3077_s26 + $0xf0] sm:$0xff]   ;;  %v2693_v30 = vld [vmem:[%s3077_s26 + $0xf8] sm:$0xff]  }
  0x60   : > { %v2690_v27 = vld [vmem:[%s3077_s26 + $0x30] sm:$0xff]   ;;  %v2694_v31 = vld [vmem:[%s3077_s26 + $0x38] sm:$0xff]  }
  0x61   : > { %2300 = vmatpush3.bf16.msra.mxu0 %v2674_v11  ;;  %v2691_v28 = vld [vmem:[%s3077_s26 + $0xb0] sm:$0xff]   ;;  %v2695_v32 = vld [vmem:[%s3077_s26 + $0xb8] sm:$0xff]  }
  0x62   : > { %2412 = vmatpush3.bf16.msra.mxu1 %v2675_v12  ;;  %2301 = vmatprep.subr.bf16.mxu0 %v2676_v13  ;;  %v2696_v33 = vld [vmem:[%s3084_s12] ss:$16 sps:$4 sm:$0xff]   ;;  %v2698_v34 = vld [vmem:[%s3084_s12 + $0x4] ss:$16 sps:$4 sm:$0xff]   ;;  %v2699_v35 = vld [vmem:[%s3084_s12 + $0x8] ss:$16 sps:$4 sm:$0xff]  }
  0x63   : > { %2413 = vmatprep.subr.bf16.mxu1 %v2677_v14  ;;  %v2701_v36 = vld [vmem:[%s3084_s12 + $0xc] ss:$16 sps:$4 sm:$0xff]   ;;  %1100 = vmatprep.mubr.bf16.mxu0 %v2698_v34  ;;  %v2702_v37 = vld [vmem:[%s3084_s12 + $0x24] ss:$16 sps:$4 sm:$0xff]   ;;  %v2706_v39 = vld [vmem:[%s3084_s12 + $0x20] ss:$16 sps:$4 sm:$0xff]  }
  0x64   : > { %1261 = vmatprep.mubr.bf16.mxu1 %v2701_v36  ;;  %v2704_v38 = vld [vmem:[%s3084_s12 + $0x2c] ss:$16 sps:$4 sm:$0xff]   ;;  %v2707_v40 = vld [vmem:[%s3084_s12 + $0x28] ss:$16 sps:$4 sm:$0xff]   ;;  %v2708_v41 = vld [vmem:[%s3084_s12 + $0x44] ss:$16 sps:$4 sm:$0xff]  }
  0x65   : > { %2302 = vmatpush3.bf16.msra.mxu0 %v2678_v15  ;;  %v2710_v42 = vld [vmem:[%s3084_s12 + $0x4c] ss:$16 sps:$4 sm:$0xff]   ;;  %v2712_v43 = vld [vmem:[%s3084_s12 + $0x40] ss:$16 sps:$4 sm:$0xff]   ;;  %v2713_v44 = vld [vmem:[%s3084_s12 + $0x48] ss:$16 sps:$4 sm:$0xff]  }
  0x66   : > { %2414 = vmatpush3.bf16.msra.mxu1 %v2679_v16  ;;  %2303 = vmatprep.subr.bf16.mxu0 %v2680_v17  ;;  %v2714_v45 = vld [vmem:[%s3084_s12 + $0x64] ss:$16 sps:$4 sm:$0xff]   ;;  %v2716_v46 = vld [vmem:[%s3084_s12 + $0x6c] ss:$16 sps:$4 sm:$0xff]   ;;  %v2718_v47 = vld [vmem:[%s3084_s12 + $0x60] ss:$16 sps:$4 sm:$0xff]  }
  0x67   : > { %2415 = vmatprep.subr.bf16.mxu1 %v2681_v18  ;;  %v2719_v48 = vld [vmem:[%s3084_s12 + $0x68] ss:$16 sps:$4 sm:$0xff]   ;;  %v2720_v49 = vld [vmem:[%s3084_s12 + $0x84] ss:$16 sps:$4 sm:$0xff]   ;;  %v2722_v50 = vld [vmem:[%s3084_s12 + $0x8c] ss:$16 sps:$4 sm:$0xff]  }
  0x68   : > { %v2724_v51 = vld [vmem:[%s3084_s12 + $0x80] ss:$16 sps:$4 sm:$0xff]   ;;  %v2725_v52 = vld [vmem:[%s3084_s12 + $0x88] ss:$16 sps:$4 sm:$0xff]   ;;  %v2726_v53 = vld [vmem:[%s3084_s12 + $0xa4] ss:$16 sps:$4 sm:$0xff]  }
  0x69   : > { %2304 = vmatpush3.bf16.msra.mxu0 %v2682_v19  ;;  %v2728_v54 = vld [vmem:[%s3084_s12 + $0xac] ss:$16 sps:$4 sm:$0xff]   ;;  %v2730_v55 = vld [vmem:[%s3084_s12 + $0xa0] ss:$16 sps:$4 sm:$0xff]   ;;  %v2731_v56 = vld [vmem:[%s3084_s12 + $0xa8] ss:$16 sps:$4 sm:$0xff]  }
  0x6a   : > { %2416 = vmatpush3.bf16.msra.mxu1 %v2683_v20  ;;  %2305 = vmatprep.subr.bf16.mxu0 %v2684_v21  ;;  %v2732_v57 = vld [vmem:[%s3084_s12 + $0xc4] ss:$16 sps:$4 sm:$0xff]   ;;  %v2734_v58 = vld [vmem:[%s3084_s12 + $0xcc] ss:$16 sps:$4 sm:$0xff]   ;;  %v2736_v59 = vld [vmem:[%s3084_s12 + $0xc0] ss:$16 sps:$4 sm:$0xff]  }
  0x6b   : > { %2417 = vmatprep.subr.bf16.mxu1 %v2685_v22  ;;  %v2737_v60 = vld [vmem:[%s3084_s12 + $0xc8] ss:$16 sps:$4 sm:$0xff]   ;;  %v2738_v61 = vld [vmem:[%s3084_s12 + $0xe4] ss:$16 sps:$4 sm:$0xff]   ;;  %v2740_v62 = vld [vmem:[%s3084_s12 + $0xec] ss:$16 sps:$4 sm:$0xff]  }
  0x6c   : > { %v2742_v63 = vld [vmem:[%s3084_s12 + $0xe0] ss:$16 sps:$4 sm:$0xff]   ;;  %v2743_v0 = vld [vmem:[%s3084_s12 + $0xe8] ss:$16 sps:$4 sm:$0xff]   ;;  %v2744_v1 = vld [vmem:[%s3084_s12 + $0x104] ss:$16 sps:$4 sm:$0xff]  }
  0x6d   : > { %2306 = vmatpush3.bf16.msra.mxu0 %v2686_v23  ;;  %v2746_v2 = vld [vmem:[%s3084_s12 + $0x10c] ss:$16 sps:$4 sm:$0xff]   ;;  %v2748_v3 = vld [vmem:[%s3084_s12 + $0x100] ss:$16 sps:$4 sm:$0xff]   ;;  %v2749_v4 = vld [vmem:[%s3084_s12 + $0x108] ss:$16 sps:$4 sm:$0xff]  }
  0x6e   : > { %2418 = vmatpush3.bf16.msra.mxu1 %v2687_v24  ;;  %2307 = vmatprep.subr.bf16.mxu0 %v2688_v25  ;;  %v2750_v5 = vld [vmem:[%s3084_s12 + $0x124] ss:$16 sps:$4 sm:$0xff]   ;;  %v2752_v6 = vld [vmem:[%s3084_s12 + $0x12c] ss:$16 sps:$4 sm:$0xff]   ;;  %v2754_v7 = vld [vmem:[%s3084_s12 + $0x120] ss:$16 sps:$4 sm:$0xff]  }
  0x6f   : > { %2419 = vmatprep.subr.bf16.mxu1 %v2689_v26  ;;  %v2755_v8 = vld [vmem:[%s3084_s12 + $0x128] ss:$16 sps:$4 sm:$0xff]   ;;  %v2756_v9 = vld [vmem:[%s3084_s12 + $0x144] ss:$16 sps:$4 sm:$0xff]   ;;  %v2758_v10 = vld [vmem:[%s3084_s12 + $0x14c] ss:$16 sps:$4 sm:$0xff]  }
  0x70   : > { %v2760_v11 = vld [vmem:[%s3084_s12 + $0x140] ss:$16 sps:$4 sm:$0xff]   ;;  %v2761_v12 = vld [vmem:[%s3084_s12 + $0x148] ss:$16 sps:$4 sm:$0xff]   ;;  %v2762_v13 = vld [vmem:[%s3084_s12 + $0x164] ss:$16 sps:$4 sm:$0xff]  }
  0x71   : > { %2308 = vmatpush3.bf16.msra.mxu0 %v2690_v27  ;;  %v2764_v14 = vld [vmem:[%s3084_s12 + $0x16c] ss:$16 sps:$4 sm:$0xff]   ;;  %v2766_v15 = vld [vmem:[%s3084_s12 + $0x160] ss:$16 sps:$4 sm:$0xff]   ;;  %v2767_v16 = vld [vmem:[%s3084_s12 + $0x168] ss:$16 sps:$4 sm:$0xff]  }
  0x72   : > { %2420 = vmatpush3.bf16.msra.mxu1 %v2691_v28  ;;  %2309 = vmatprep.subr.bf16.mxu0 %v2692_v29  ;;  %v2768_v17 = vld [vmem:[%s3084_s12 + $0x184] ss:$16 sps:$4 sm:$0xff]   ;;  %v2770_v18 = vld [vmem:[%s3084_s12 + $0x18c] ss:$16 sps:$4 sm:$0xff]   ;;  %v2772_v19 = vld [vmem:[%s3084_s12 + $0x180] ss:$16 sps:$4 sm:$0xff]  }
  0x73   : > { %2421 = vmatprep.subr.bf16.mxu1 %v2693_v30  ;;  %v2773_v20 = vld [vmem:[%s3084_s12 + $0x188] ss:$16 sps:$4 sm:$0xff]   ;;  %v2774_v21 = vld [vmem:[%s3084_s12 + $0x1a4] ss:$16 sps:$4 sm:$0xff]   ;;  %v2776_v22 = vld [vmem:[%s3084_s12 + $0x1ac] ss:$16 sps:$4 sm:$0xff]  }
  0x74   : > { %v2778_v23 = vld [vmem:[%s3084_s12 + $0x1a0] ss:$16 sps:$4 sm:$0xff]   ;;  %v2779_v24 = vld [vmem:[%s3084_s12 + $0x1a8] ss:$16 sps:$4 sm:$0xff]   ;;  %v2780_v25 = vld [vmem:[%s3084_s12 + $0x1c4] ss:$16 sps:$4 sm:$0xff]  }
  0x75   : > { %2310 = vmatpush3.bf16.msra.mxu0 %v2694_v31  ;;  %v2782_v26 = vld [vmem:[%s3084_s12 + $0x1cc] ss:$16 sps:$4 sm:$0xff]   ;;  %v2784_v27 = vld [vmem:[%s3084_s12 + $0x1c0] ss:$16 sps:$4 sm:$0xff]   ;;  %v2785_v28 = vld [vmem:[%s3084_s12 + $0x1c8] ss:$16 sps:$4 sm:$0xff]  }
  0x76   : > { %2422 = vmatpush3.bf16.msra.mxu1 %v2695_v32  ;;  %v2786_v29 = vld [vmem:[%s3084_s12 + $0x1e4] ss:$16 sps:$4 sm:$0xff]   ;;  %v2788_v30 = vld [vmem:[%s3084_s12 + $0x1ec] ss:$16 sps:$4 sm:$0xff]   ;;  %v2790_v31 = vld [vmem:[%s3084_s12 + $0x1e0] ss:$16 sps:$4 sm:$0xff]  }
  0x77   : > { %v2791_v32 = vld [vmem:[%s3084_s12 + $0x1e8] ss:$16 sps:$4 sm:$0xff]  }
  0x78   : > { %1101 = vmatmul.mubr.bf16.vlgmr.msra.gmra.mrb[0].mxu0 %v2696_v33 }
  0x79   : > { %1262 = vmatmul.mubr.bf16.vlgmr.msra.gmra.mrb[0].mxu1 %v2699_v35  ;;  %1108 = vmatprep.mubr.bf16.mxu0 %v2702_v37 }
  0x7a   : > { %1269 = vmatprep.mubr.bf16.mxu1 %v2704_v38 }
  0x80   : > { %1109 = vmatmul.mubr.bf16.gmra.mrb[4].mxu0 %v2706_v39 }
  0x81   : > { %1270 = vmatmul.mubr.bf16.gmra.mrb[4].mxu1 %v2707_v40  ;;  %1116 = vmatprep.mubr.bf16.mxu0 %v2708_v41 }
  0x82   : > { %1277 = vmatprep.mubr.bf16.mxu1 %v2710_v42  ;;  %v396_v42 = vld [vmem:[#allocation2] sm:$0xff] }
  0x88   : > { %1117 = vmatmul.mubr.bf16.gmra.mrb[8].mxu0 %v2712_v43 }
  0x89   : > { %1278 = vmatmul.mubr.bf16.gmra.mrb[8].mxu1 %v2713_v44  ;;  %1124 = vmatprep.mubr.bf16.mxu0 %v2714_v45 }
  0x8a   : > { %1285 = vmatprep.mubr.bf16.mxu1 %v2716_v46 }
  0x90   : > { %1125 = vmatmul.mubr.bf16.gmra.mrb[12].mxu0 %v2718_v47  ;;  %v397_v47 = vld [vmem:[#allocation2 + $0x8] sm:$0xff] }
  0x91   : > { %1286 = vmatmul.mubr.bf16.gmra.mrb[12].mxu1 %v2719_v48  ;;  %1132 = vmatprep.mubr.bf16.mxu0 %v2720_v49 }
  0x92   : > { %1293 = vmatprep.mubr.bf16.mxu1 %v2722_v50 }
  0x98   : > { %1133 = vmatmul.mubr.bf16.gmra.mrb[16].mxu0 %v2724_v51 }
  0x99   : > { %1294 = vmatmul.mubr.bf16.gmra.mrb[16].mxu1 %v2725_v52  ;;  %1140 = vmatprep.mubr.bf16.mxu0 %v2726_v53 }
  0x9a   : > { %1301 = vmatprep.mubr.bf16.mxu1 %v2728_v54 }
  0xa0   : > { %1141 = vmatmul.mubr.bf16.gmra.mrb[20].mxu0 %v2730_v55 }
  0xa1   : > { %1302 = vmatmul.mubr.bf16.gmra.mrb[20].mxu1 %v2731_v56  ;;  %1148 = vmatprep.mubr.bf16.mxu0 %v2732_v57 }
  0xa2   : > { %1309 = vmatprep.mubr.bf16.mxu1 %v2734_v58 }
  0xa8   : > { %1149 = vmatmul.mubr.bf16.gmra.mrb[24].mxu0 %v2736_v59 }
  0xa9   : > { %1310 = vmatmul.mubr.bf16.gmra.mrb[24].mxu1 %v2737_v60  ;;  %1156 = vmatprep.mubr.bf16.mxu0 %v2738_v61  ;;  %v398_v60 = vld [vmem:[#allocation2 + $0x10] sm:$0xff] }
  0xaa   : > { %1317 = vmatprep.mubr.bf16.mxu1 %v2740_v62 }
  0xb0   : > { %1157 = vmatmul.mubr.bf16.gmra.mrb[28].mxu0 %v2742_v63 }
  0xb1   : > { %1318 = vmatmul.mubr.bf16.gmra.mrb[28].mxu1 %v2743_v0  ;;  %1164 = vmatprep.mubr.bf16.mxu0 %v2744_v1  ;;  %v399_v1 = vld [vmem:[#allocation2 + $0x18] sm:$0xff] }
  0xb2   : > { %1325 = vmatprep.mubr.bf16.mxu1 %v2746_v2 }
  0xb8   : > { %1165 = vmatmul.mubr.bf16.gmra.mrb[32].mxu0 %v2748_v3 }
  0xb9   : > { %1326 = vmatmul.mubr.bf16.gmra.mrb[32].mxu1 %v2749_v4  ;;  %1172 = vmatprep.mubr.bf16.mxu0 %v2750_v5 }
  0xba   : > { %1333 = vmatprep.mubr.bf16.mxu1 %v2752_v6 }
  0xc0   : > { %1173 = vmatmul.mubr.bf16.gmra.mrb[36].mxu0 %v2754_v7 }
  0xc1   : > { %1334 = vmatmul.mubr.bf16.gmra.mrb[36].mxu1 %v2755_v8  ;;  %1180 = vmatprep.mubr.bf16.mxu0 %v2756_v9 }
  0xc2   : > { %1341 = vmatprep.mubr.bf16.mxu1 %v2758_v10 }
  0xc8   : > { %1181 = vmatmul.mubr.bf16.gmra.mrb[40].mxu0 %v2760_v11 }
  0xc9   : > { %1342 = vmatmul.mubr.bf16.gmra.mrb[40].mxu1 %v2761_v12  ;;  %1188 = vmatprep.mubr.bf16.mxu0 %v2762_v13 }
  0xca   : > { %1349 = vmatprep.mubr.bf16.mxu1 %v2764_v14  ;;  %v400_v14 = vld [vmem:[#allocation2 + $0x20] sm:$0xff] }
  0xd0   : > { %1189 = vmatmul.mubr.bf16.gmra.mrb[44].mxu0 %v2766_v15 }
  0xd1   : > { %1350 = vmatmul.mubr.bf16.gmra.mrb[44].mxu1 %v2767_v16  ;;  %1196 = vmatprep.mubr.bf16.mxu0 %v2768_v17 }
  0xd2   : > { %1357 = vmatprep.mubr.bf16.mxu1 %v2770_v18 }
  0xd8   : > { %1197 = vmatmul.mubr.bf16.gmra.mrb[48].mxu0 %v2772_v19  ;;  %v401_v19 = vld [vmem:[#allocation2 + $0x28] sm:$0xff] }
  0xd9   : > { %1358 = vmatmul.mubr.bf16.gmra.mrb[48].mxu1 %v2773_v20  ;;  %1204 = vmatprep.mubr.bf16.mxu0 %v2774_v21 }
  0xda   : > { %1365 = vmatprep.mubr.bf16.mxu1 %v2776_v22 }
  0xe0   : > { %1205 = vmatmul.mubr.bf16.gmra.mrb[52].mxu0 %v2778_v23 }
  0xe1   : > { %1366 = vmatmul.mubr.bf16.gmra.mrb[52].mxu1 %v2779_v24  ;;  %1212 = vmatprep.mubr.bf16.mxu0 %v2780_v25 }
  0xe2   : > { %1373 = vmatprep.mubr.bf16.mxu1 %v2782_v26 }
  0xe8   : > { %1213 = vmatmul.mubr.bf16.gmra.mrb[56].mxu0 %v2784_v27 }
  0xe9   : > { %1374 = vmatmul.mubr.bf16.gmra.mrb[56].mxu1 %v2785_v28  ;;  %1220 = vmatprep.mubr.bf16.mxu0 %v2786_v29 }
  0xea   : > { %1381 = vmatprep.mubr.bf16.mxu1 %v2788_v30 }
  0xf0   : > { %1221 = vmatmul.mubr.bf16.gmra.mrb[60].mxu0 %v2790_v31 }
  0xf1   : > { %1382 = vmatmul.mubr.bf16.gmra.mrb[60].mxu1 %v2791_v32  ;;  %v402_v32 = vld [vmem:[#allocation2 + $0x30] sm:$0xff] }
 0x14b   : > { %v2311_v33 = vpop.f32.mrb[0].mxu0 }
 0x14c   : > { %v2423_v34 = vpop.f32.mrb[0].mxu1  ;;  %v2312_v35 = vpop.f32.mrb[1].mxu0 }
 0x14d   : > { %v2313_v36 = vadd.f32 %v2312_v35, %v2311_v33  ;;  %v2424_v37 = vpop.f32.mrb[1].mxu1  ;;  %v2314_v38 = vpop.f32.mrb[2].mxu0 }
 0x14e   : > { %v2425_v39 = vadd.f32 %v2424_v37, %v2423_v34  ;;  %v2426_v40 = vpop.f32.mrb[2].mxu1  ;;  %v2315_v41 = vpop.f32.mrb[3].mxu0  ;;  %v403_v37 = vld [vmem:[#allocation2 + $0x38] sm:$0xff] }
 0x14f   : > { %v2316_v43 = vadd.f32 %v2315_v41, %v2314_v38  ;;  %v2427_v44 = vpop.f32.mrb[3].mxu1 }
 0x150   : > { %v1264_v45 = vadd.f32 %v2425_v39, %v2313_v36  ;;  %v2428_v46 = vadd.f32 %v2427_v44, %v2426_v40 }
 0x152   : > { %v1390_v48 = vadd.f32 %v1264_v45, %v396_v42  ;;  %v1267_v49 = vadd.f32 %v2428_v46, %v2316_v43 }
 0x153   : > { %v2317_v50 = vpop.f32.mrb[4].mxu0 }
 0x154   : > { %1422 = vst [vmem:[#allocation2] sm:$0xff] %v1390_v48  ;;  %v1391_v51 = vadd.f32 %v1267_v49, %v397_v47  ;;  %v2429_v52 = vpop.f32.mrb[4].mxu1  ;;  %v2318_v53 = vpop.f32.mrb[5].mxu0 }
 0x155   : > { %v2319_v54 = vadd.f32 %v2318_v53, %v2317_v50  ;;  %v2430_v55 = vpop.f32.mrb[5].mxu1  ;;  %v2320_v56 = vpop.f32.mrb[6].mxu0  ;;  %v404_v50 = vld [vmem:[#allocation2 + $0x40] sm:$0xff] }
 0x156   : > { %1423 = vst [vmem:[#allocation2 + $0x8] sm:$0xff] %v1391_v51  ;;  %v2431_v57 = vadd.f32 %v2430_v55, %v2429_v52  ;;  %v2432_v58 = vpop.f32.mrb[6].mxu1  ;;  %v2321_v59 = vpop.f32.mrb[7].mxu0  ;;  %v405_v55 = vld [vmem:[#allocation2 + $0x48] sm:$0xff] }
 0x157   : > { %v2322_v61 = vadd.f32 %v2321_v59, %v2320_v56  ;;  %v2433_v62 = vpop.f32.mrb[7].mxu1 }
 0x158   : > { %v1272_v63 = vadd.f32 %v2431_v57, %v2319_v54  ;;  %v2434_v0 = vadd.f32 %v2433_v62, %v2432_v58 }
 0x15a   : > { %v1392_v2 = vadd.f32 %v1272_v63, %v398_v60  ;;  %v1275_v3 = vadd.f32 %v2434_v0, %v2322_v61 }
 0x15b   : > { %v2323_v4 = vpop.f32.mrb[8].mxu0 }
 0x15c   : > { %1424 = vst [vmem:[#allocation2 + $0x10] sm:$0xff] %v1392_v2  ;;  %v1393_v5 = vadd.f32 %v1275_v3, %v399_v1  ;;  %v2435_v6 = vpop.f32.mrb[8].mxu1  ;;  %v2324_v7 = vpop.f32.mrb[9].mxu0 }
 0x15d   : > { %v2325_v8 = vadd.f32 %v2324_v7, %v2323_v4  ;;  %v2436_v9 = vpop.f32.mrb[9].mxu1  ;;  %v2326_v10 = vpop.f32.mrb[10].mxu0  ;;  %v406_v4 = vld [vmem:[#allocation2 + $0x50] sm:$0xff] }
 0x15e   : > { %1425 = vst [vmem:[#allocation2 + $0x18] sm:$0xff] %v1393_v5  ;;  %v2437_v11 = vadd.f32 %v2436_v9, %v2435_v6  ;;  %v2438_v12 = vpop.f32.mrb[10].mxu1  ;;  %v2327_v13 = vpop.f32.mrb[11].mxu0  ;;  %v407_v9 = vld [vmem:[#allocation2 + $0x58] sm:$0xff] }
 0x15f   : > { %v2328_v15 = vadd.f32 %v2327_v13, %v2326_v10  ;;  %v2439_v16 = vpop.f32.mrb[11].mxu1 }
 0x160   : > { %v1280_v17 = vadd.f32 %v2437_v11, %v2325_v8  ;;  %v2440_v18 = vadd.f32 %v2439_v16, %v2438_v12 }
 0x162   : > { %v1394_v20 = vadd.f32 %v1280_v17, %v400_v14  ;;  %v1283_v21 = vadd.f32 %v2440_v18, %v2328_v15 }
 0x163   : > { %v2329_v22 = vpop.f32.mrb[12].mxu0 }
 0x164   : > { %1426 = vst [vmem:[#allocation2 + $0x20] sm:$0xff] %v1394_v20  ;;  %v1395_v23 = vadd.f32 %v1283_v21, %v401_v19  ;;  %v2441_v24 = vpop.f32.mrb[12].mxu1  ;;  %v2330_v25 = vpop.f32.mrb[13].mxu0 }
 0x165   : > { %v2331_v26 = vadd.f32 %v2330_v25, %v2329_v22  ;;  %v2442_v27 = vpop.f32.mrb[13].mxu1  ;;  %v2332_v28 = vpop.f32.mrb[14].mxu0  ;;  %v408_v22 = vld [vmem:[#allocation2 + $0x60] sm:$0xff] }
 0x166   : > { %1427 = vst [vmem:[#allocation2 + $0x28] sm:$0xff] %v1395_v23  ;;  %v2443_v29 = vadd.f32 %v2442_v27, %v2441_v24  ;;  %v2444_v30 = vpop.f32.mrb[14].mxu1  ;;  %v2333_v31 = vpop.f32.mrb[15].mxu0  ;;  %v409_v27 = vld [vmem:[#allocation2 + $0x68] sm:$0xff] }
 0x167   : > { %v2334_v33 = vadd.f32 %v2333_v31, %v2332_v28  ;;  %v2445_v34 = vpop.f32.mrb[15].mxu1 }
 0x168   : > { %v1288_v35 = vadd.f32 %v2443_v29, %v2331_v26  ;;  %v2446_v36 = vadd.f32 %v2445_v34, %v2444_v30 }
 0x16a   : > { %v1396_v38 = vadd.f32 %v1288_v35, %v402_v32  ;;  %v1291_v39 = vadd.f32 %v2446_v36, %v2334_v33 }
 0x16b   : > { %v2335_v40 = vpop.f32.mrb[16].mxu0 }
 0x16c   : > { %1428 = vst [vmem:[#allocation2 + $0x30] sm:$0xff] %v1396_v38  ;;  %v1397_v41 = vadd.f32 %v1291_v39, %v403_v37  ;;  %v2447_v42 = vpop.f32.mrb[16].mxu1  ;;  %v2336_v43 = vpop.f32.mrb[17].mxu0 }
 0x16d   : > { %v2337_v44 = vadd.f32 %v2336_v43, %v2335_v40  ;;  %v2448_v45 = vpop.f32.mrb[17].mxu1  ;;  %v2338_v46 = vpop.f32.mrb[18].mxu0  ;;  %v410_v40 = vld [vmem:[#allocation2 + $0x70] sm:$0xff] }
 0x16e   : > { %1429 = vst [vmem:[#allocation2 + $0x38] sm:$0xff] %v1397_v41  ;;  %v2449_v47 = vadd.f32 %v2448_v45, %v2447_v42  ;;  %v2450_v48 = vpop.f32.mrb[18].mxu1  ;;  %v2339_v49 = vpop.f32.mrb[19].mxu0  ;;  %v411_v45 = vld [vmem:[#allocation2 + $0x78] sm:$0xff] }
 0x16f   : > { %v2340_v51 = vadd.f32 %v2339_v49, %v2338_v46  ;;  %v2451_v52 = vpop.f32.mrb[19].mxu1 }
 0x170   : > { %v1296_v53 = vadd.f32 %v2449_v47, %v2337_v44  ;;  %v2452_v54 = vadd.f32 %v2451_v52, %v2450_v48 }
 0x172   : > { %v1398_v56 = vadd.f32 %v1296_v53, %v404_v50  ;;  %v1299_v57 = vadd.f32 %v2452_v54, %v2340_v51 }
 0x173   : > { %v2341_v58 = vpop.f32.mrb[20].mxu0 }
 0x174   : > { %1430 = vst [vmem:[#allocation2 + $0x40] sm:$0xff] %v1398_v56  ;;  %v1399_v59 = vadd.f32 %v1299_v57, %v405_v55  ;;  %v2453_v60 = vpop.f32.mrb[20].mxu1  ;;  %v2342_v61 = vpop.f32.mrb[21].mxu0 }
 0x175   : > { %v2343_v62 = vadd.f32 %v2342_v61, %v2341_v58  ;;  %v2454_v63 = vpop.f32.mrb[21].mxu1  ;;  %v2344_v0 = vpop.f32.mrb[22].mxu0  ;;  %v412_v58 = vld [vmem:[#allocation2 + $0x80] sm:$0xff] }
 0x176   : > { %1431 = vst [vmem:[#allocation2 + $0x48] sm:$0xff] %v1399_v59  ;;  %v2455_v1 = vadd.f32 %v2454_v63, %v2453_v60  ;;  %v2456_v2 = vpop.f32.mrb[22].mxu1  ;;  %v2345_v3 = vpop.f32.mrb[23].mxu0  ;;  %v413_v63 = vld [vmem:[#allocation2 + $0x88] sm:$0xff] }
 0x177   : > { %v2346_v5 = vadd.f32 %v2345_v3, %v2344_v0  ;;  %v2457_v6 = vpop.f32.mrb[23].mxu1 }
 0x178   : > { %v1304_v7 = vadd.f32 %v2455_v1, %v2343_v62  ;;  %v2458_v8 = vadd.f32 %v2457_v6, %v2456_v2 }
 0x17a   : > { %v1400_v10 = vadd.f32 %v1304_v7, %v406_v4  ;;  %v1307_v11 = vadd.f32 %v2458_v8, %v2346_v5 }
 0x17b   : > { %v2347_v12 = vpop.f32.mrb[24].mxu0 }
 0x17c   : > { %1432 = vst [vmem:[#allocation2 + $0x50] sm:$0xff] %v1400_v10  ;;  %v1401_v13 = vadd.f32 %v1307_v11, %v407_v9  ;;  %v2459_v14 = vpop.f32.mrb[24].mxu1  ;;  %v2348_v15 = vpop.f32.mrb[25].mxu0 }
 0x17d   : > { %v2349_v16 = vadd.f32 %v2348_v15, %v2347_v12  ;;  %v2460_v17 = vpop.f32.mrb[25].mxu1  ;;  %v2350_v18 = vpop.f32.mrb[26].mxu0  ;;  %v414_v12 = vld [vmem:[#allocation2 + $0x90] sm:$0xff] }
 0x17e   : > { %1433 = vst [vmem:[#allocation2 + $0x58] sm:$0xff] %v1401_v13  ;;  %v2461_v19 = vadd.f32 %v2460_v17, %v2459_v14  ;;  %v2462_v20 = vpop.f32.mrb[26].mxu1  ;;  %v2351_v21 = vpop.f32.mrb[27].mxu0  ;;  %v415_v17 = vld [vmem:[#allocation2 + $0x98] sm:$0xff] }
 0x17f   : > { %v2352_v23 = vadd.f32 %v2351_v21, %v2350_v18  ;;  %v2463_v24 = vpop.f32.mrb[27].mxu1 }
 0x180   : > { %v1312_v25 = vadd.f32 %v2461_v19, %v2349_v16  ;;  %v2464_v26 = vadd.f32 %v2463_v24, %v2462_v20 }
 0x182   : > { %v1402_v28 = vadd.f32 %v1312_v25, %v408_v22  ;;  %v1315_v29 = vadd.f32 %v2464_v26, %v2352_v23 }
 0x183   : > { %v2353_v30 = vpop.f32.mrb[28].mxu0 }
 0x184   : > { %1434 = vst [vmem:[#allocation2 + $0x60] sm:$0xff] %v1402_v28  ;;  %v1403_v31 = vadd.f32 %v1315_v29, %v409_v27  ;;  %v2465_v32 = vpop.f32.mrb[28].mxu1  ;;  %v2354_v33 = vpop.f32.mrb[29].mxu0 }
 0x185   : > { %v2355_v34 = vadd.f32 %v2354_v33, %v2353_v30  ;;  %v2466_v35 = vpop.f32.mrb[29].mxu1  ;;  %v2356_v36 = vpop.f32.mrb[30].mxu0  ;;  %v416_v30 = vld [vmem:[#allocation2 + $0xa0] sm:$0xff] }
 0x186   : > { %1435 = vst [vmem:[#allocation2 + $0x68] sm:$0xff] %v1403_v31  ;;  %v2467_v37 = vadd.f32 %v2466_v35, %v2465_v32  ;;  %v2468_v38 = vpop.f32.mrb[30].mxu1  ;;  %v2357_v39 = vpop.f32.mrb[31].mxu0  ;;  %v417_v35 = vld [vmem:[#allocation2 + $0xa8] sm:$0xff] }
 0x187   : > { %v2358_v41 = vadd.f32 %v2357_v39, %v2356_v36  ;;  %v2469_v42 = vpop.f32.mrb[31].mxu1 }
 0x188   : > { %v1320_v43 = vadd.f32 %v2467_v37, %v2355_v34  ;;  %v2470_v44 = vadd.f32 %v2469_v42, %v2468_v38 }
 0x18a   : > { %v1404_v46 = vadd.f32 %v1320_v43, %v410_v40  ;;  %v1323_v47 = vadd.f32 %v2470_v44, %v2358_v41 }
 0x18b   : > { %v2359_v48 = vpop.f32.mrb[32].mxu0 }
 0x18c   : > { %1436 = vst [vmem:[#allocation2 + $0x70] sm:$0xff] %v1404_v46  ;;  %v1405_v49 = vadd.f32 %v1323_v47, %v411_v45  ;;  %v2471_v50 = vpop.f32.mrb[32].mxu1  ;;  %v2360_v51 = vpop.f32.mrb[33].mxu0 }
 0x18d   : > { %v2361_v52 = vadd.f32 %v2360_v51, %v2359_v48  ;;  %v2472_v53 = vpop.f32.mrb[33].mxu1  ;;  %v2362_v54 = vpop.f32.mrb[34].mxu0  ;;  %v418_v48 = vld [vmem:[#allocation2 + $0xb0] sm:$0xff] }
 0x18e   : > { %1437 = vst [vmem:[#allocation2 + $0x78] sm:$0xff] %v1405_v49  ;;  %v2473_v55 = vadd.f32 %v2472_v53, %v2471_v50  ;;  %v2474_v56 = vpop.f32.mrb[34].mxu1  ;;  %v2363_v57 = vpop.f32.mrb[35].mxu0  ;;  %v419_v53 = vld [vmem:[#allocation2 + $0xb8] sm:$0xff] }
 0x18f   : > { %v2364_v59 = vadd.f32 %v2363_v57, %v2362_v54  ;;  %v2475_v60 = vpop.f32.mrb[35].mxu1 }
 0x190   : > { %v1328_v61 = vadd.f32 %v2473_v55, %v2361_v52  ;;  %v2476_v62 = vadd.f32 %v2475_v60, %v2474_v56 }
 0x192   : > { %v1406_v0 = vadd.f32 %v1328_v61, %v412_v58  ;;  %v1331_v1 = vadd.f32 %v2476_v62, %v2364_v59 }
 0x193   : > { %v2365_v2 = vpop.f32.mrb[36].mxu0 }
 0x194   : > { %1438 = vst [vmem:[#allocation2 + $0x80] sm:$0xff] %v1406_v0  ;;  %v1407_v3 = vadd.f32 %v1331_v1, %v413_v63  ;;  %v2477_v4 = vpop.f32.mrb[36].mxu1  ;;  %v2366_v5 = vpop.f32.mrb[37].mxu0 }
 0x195   : > { %v2367_v6 = vadd.f32 %v2366_v5, %v2365_v2  ;;  %v2478_v7 = vpop.f32.mrb[37].mxu1  ;;  %v2368_v8 = vpop.f32.mrb[38].mxu0  ;;  %v420_v2 = vld [vmem:[#allocation2 + $0xc0] sm:$0xff] }
 0x196   : > { %1439 = vst [vmem:[#allocation2 + $0x88] sm:$0xff] %v1407_v3  ;;  %v2479_v9 = vadd.f32 %v2478_v7, %v2477_v4  ;;  %v2480_v10 = vpop.f32.mrb[38].mxu1  ;;  %v2369_v11 = vpop.f32.mrb[39].mxu0  ;;  %v421_v7 = vld [vmem:[#allocation2 + $0xc8] sm:$0xff] }
 0x197   : > { %v2370_v13 = vadd.f32 %v2369_v11, %v2368_v8  ;;  %v2481_v14 = vpop.f32.mrb[39].mxu1 }
 0x198   : > { %v1336_v15 = vadd.f32 %v2479_v9, %v2367_v6  ;;  %v2482_v16 = vadd.f32 %v2481_v14, %v2480_v10 }
 0x19a   : > { %v1408_v18 = vadd.f32 %v1336_v15, %v414_v12  ;;  %v1339_v19 = vadd.f32 %v2482_v16, %v2370_v13 }
 0x19b   : > { %v2371_v20 = vpop.f32.mrb[40].mxu0 }
 0x19c   : > { %1440 = vst [vmem:[#allocation2 + $0x90] sm:$0xff] %v1408_v18  ;;  %v1409_v21 = vadd.f32 %v1339_v19, %v415_v17  ;;  %v2483_v22 = vpop.f32.mrb[40].mxu1  ;;  %v2372_v23 = vpop.f32.mrb[41].mxu0 }
 0x19d   : > { %v2373_v24 = vadd.f32 %v2372_v23, %v2371_v20  ;;  %v2484_v25 = vpop.f32.mrb[41].mxu1  ;;  %v2374_v26 = vpop.f32.mrb[42].mxu0  ;;  %v422_v20 = vld [vmem:[#allocation2 + $0xd0] sm:$0xff] }
 0x19e   : > { %1441 = vst [vmem:[#allocation2 + $0x98] sm:$0xff] %v1409_v21  ;;  %v2485_v27 = vadd.f32 %v2484_v25, %v2483_v22  ;;  %v2486_v28 = vpop.f32.mrb[42].mxu1  ;;  %v2375_v29 = vpop.f32.mrb[43].mxu0  ;;  %v423_v25 = vld [vmem:[#allocation2 + $0xd8] sm:$0xff] }
 0x19f   : > { %v2376_v31 = vadd.f32 %v2375_v29, %v2374_v26  ;;  %v2487_v32 = vpop.f32.mrb[43].mxu1 }
 0x1a0   : > { %v1344_v33 = vadd.f32 %v2485_v27, %v2373_v24  ;;  %v2488_v34 = vadd.f32 %v2487_v32, %v2486_v28 }
 0x1a2   : > { %v1410_v36 = vadd.f32 %v1344_v33, %v416_v30  ;;  %v1347_v37 = vadd.f32 %v2488_v34, %v2376_v31 }
 0x1a3   : > { %v2377_v38 = vpop.f32.mrb[44].mxu0 }
 0x1a4   : > { %1442 = vst [vmem:[#allocation2 + $0xa0] sm:$0xff] %v1410_v36  ;;  %v1411_v39 = vadd.f32 %v1347_v37, %v417_v35  ;;  %v2489_v40 = vpop.f32.mrb[44].mxu1  ;;  %v2378_v41 = vpop.f32.mrb[45].mxu0 }
 0x1a5   : > { %v2379_v42 = vadd.f32 %v2378_v41, %v2377_v38  ;;  %v2490_v43 = vpop.f32.mrb[45].mxu1  ;;  %v2380_v44 = vpop.f32.mrb[46].mxu0  ;;  %v424_v38 = vld [vmem:[#allocation2 + $0xe0] sm:$0xff] }
 0x1a6   : > { %1443 = vst [vmem:[#allocation2 + $0xa8] sm:$0xff] %v1411_v39  ;;  %v2491_v45 = vadd.f32 %v2490_v43, %v2489_v40  ;;  %v2492_v46 = vpop.f32.mrb[46].mxu1  ;;  %v2381_v47 = vpop.f32.mrb[47].mxu0  ;;  %v425_v43 = vld [vmem:[#allocation2 + $0xe8] sm:$0xff] }
 0x1a7   : > { %v2382_v49 = vadd.f32 %v2381_v47, %v2380_v44  ;;  %v2493_v50 = vpop.f32.mrb[47].mxu1 }
 0x1a8   : > { %v1352_v51 = vadd.f32 %v2491_v45, %v2379_v42  ;;  %v2494_v52 = vadd.f32 %v2493_v50, %v2492_v46 }
 0x1aa   : > { %v1412_v54 = vadd.f32 %v1352_v51, %v418_v48  ;;  %v1355_v55 = vadd.f32 %v2494_v52, %v2382_v49 }
 0x1ab   : > { %v2383_v56 = vpop.f32.mrb[48].mxu0 }
 0x1ac   : > { %1444 = vst [vmem:[#allocation2 + $0xb0] sm:$0xff] %v1412_v54  ;;  %v1413_v57 = vadd.f32 %v1355_v55, %v419_v53  ;;  %v2495_v58 = vpop.f32.mrb[48].mxu1  ;;  %v2384_v59 = vpop.f32.mrb[49].mxu0 }
 0x1ad   : > { %v2385_v60 = vadd.f32 %v2384_v59, %v2383_v56  ;;  %v2496_v61 = vpop.f32.mrb[49].mxu1  ;;  %v2386_v62 = vpop.f32.mrb[50].mxu0  ;;  %v426_v56 = vld [vmem:[#allocation2 + $0xf0] sm:$0xff] }
 0x1ae   : > { %1445 = vst [vmem:[#allocation2 + $0xb8] sm:$0xff] %v1413_v57  ;;  %v2497_v63 = vadd.f32 %v2496_v61, %v2495_v58  ;;  %v2498_v0 = vpop.f32.mrb[50].mxu1  ;;  %v2387_v1 = vpop.f32.mrb[51].mxu0  ;;  %v427_v61 = vld [vmem:[#allocation2 + $0xf8] sm:$0xff] }
 0x1af   : > { %v2388_v3 = vadd.f32 %v2387_v1, %v2386_v62  ;;  %v2499_v4 = vpop.f32.mrb[51].mxu1  ;;  %v2792_v1 = vld [vmem:[%s3247_s2] sm:$0xff] (!%p2124_p13)  }
 0x1b0   : > { %v1360_v5 = vadd.f32 %v2497_v63, %v2385_v60  ;;  %v2500_v6 = vadd.f32 %v2499_v4, %v2498_v0  ;;  %2543 = vmatprep.subr.bf16.mxu0 (!%p2124_p13), %v2792_v1  ;;  %2591 = vmatprep.subr.bf16.mxu1 (!%p2124_p13), %v2792_v1  ;;  %v2795_v4 = vld [vmem:[%s3247_s2 + $0x18] sm:$0xff] (!%p2124_p13)  }
 0x1b1   : > { %2544 = vmatpush3.bf16.msra.mxu0 (!%p2124_p13), %v2792_v1  ;;  %2599 = vmatpush3.bf16.msra.mxu1 (!%p2124_p13), %v2792_v1 }
 0x1b2   : > { %v1414_v8 = vadd.f32 %v1360_v5, %v420_v2  ;;  %v1363_v9 = vadd.f32 %v2500_v6, %v2388_v3  ;;  %v2793_v2 = vld [vmem:[%s3247_s2 + $0x8] sm:$0xff] (!%p2124_p13)   ;;  %v2794_v3 = vld [vmem:[%s3247_s2 + $0x10] sm:$0xff] (!%p2124_p13)   ;;  %v1458_v5 = vld [vmem:[#allocation2] sm:$0xff] (!%p2124_p13) }
 0x1b3   : > { %v2389_v10 = vpop.f32.mrb[52].mxu0  ;;  %2545 = vmatprep.subr.bf16.mxu0 (!%p2124_p13), %v2793_v2  ;;  %2592 = vmatprep.subr.bf16.mxu1 (!%p2124_p13), %v2793_v2  ;;  %v1459_v6 = vld [vmem:[#allocation2 + $0x8] sm:$0xff] (!%p2124_p13) }
 0x1b4   : > { %1446 = vst [vmem:[#allocation2 + $0xc0] sm:$0xff] %v1414_v8  ;;  %v1415_v11 = vadd.f32 %v1363_v9, %v421_v7  ;;  %v2501_v12 = vpop.f32.mrb[52].mxu1  ;;  %v2390_v13 = vpop.f32.mrb[53].mxu0  ;;  %v1474_v7 = vld [vmem:[#allocation2 + $0x80] sm:$0xff] (!%p2124_p13)  ;;  %v1490_v8 = vpack.c.bf16 (!%p2124_p13), %v1459_v6, %v1458_v5  ;;  %v1475_v9 = vld [vmem:[#allocation2 + $0x88] sm:$0xff] (!%p2124_p13) }
 0x1b5   : > { %v2391_v14 = vadd.f32 %v2390_v13, %v2389_v10  ;;  %v2502_v15 = vpop.f32.mrb[53].mxu1  ;;  %v2392_v16 = vpop.f32.mrb[54].mxu0  ;;  %2546 = vmatpush3.bf16.msra.mxu0 (!%p2124_p13), %v2793_v2  ;;  %2600 = vmatpush3.bf16.msra.mxu1 (!%p2124_p13), %v2793_v2  ;;  %v1498_v10 = vpack.c.bf16 (!%p2124_p13), %v1475_v9, %v1474_v7  ;;  %v2798_v13 = vld [vmem:[%s3247_s2 + $0x30] sm:$0xff] (!%p2124_p13)  }
 0x1b6   : > { %1447 = vst [vmem:[#allocation2 + $0xc8] sm:$0xff] %v1415_v11  ;;  %v2503_v17 = vadd.f32 %v2502_v15, %v2501_v12  ;;  %v2504_v18 = vpop.f32.mrb[54].mxu1  ;;  %v2393_v19 = vpop.f32.mrb[55].mxu0  ;;  %2547 = vmatprep.subr.bf16.mxu0 (!%p2124_p13), %v2794_v3  ;;  %2593 = vmatprep.subr.bf16.mxu1 (!%p2124_p13), %v2794_v3  ;;  %v2796_v11 = vld [vmem:[%s3247_s2 + $0x20] sm:$0xff] (!%p2124_p13)   ;;  %v2797_v12 = vld [vmem:[%s3247_s2 + $0x28] sm:$0xff] (!%p2124_p13)   ;;  %v1460_v15 = vld [vmem:[#allocation2 + $0x10] sm:$0xff] (!%p2124_p13) }
 0x1b7   : > { %v2394_v21 = vadd.f32 %v2393_v19, %v2392_v16  ;;  %v2505_v22 = vpop.f32.mrb[55].mxu1  ;;  %2559 = vmatprep.mubr.bf16.mxu0 (!%p2124_p13), %v1490_v8  ;;  %2575 = vmatprep.mubr.bf16.mxu1 (!%p2124_p13), %v1498_v10  ;;  %v1461_v16 = vld [vmem:[#allocation2 + $0x18] sm:$0xff] (!%p2124_p13)  ;;  %v1462_v19 = vld [vmem:[#allocation2 + $0x20] sm:$0xff] (!%p2124_p13) }
 0x1b8   : > { %v1368_v23 = vadd.f32 %v2503_v17, %v2391_v14  ;;  %v2506_v24 = vadd.f32 %v2505_v22, %v2504_v18  ;;  %v2799_v14 = vld [vmem:[%s3247_s2 + $0x38] sm:$0xff] (!%p2124_p13)   ;;  %v1476_v17 = vld [vmem:[#allocation2 + $0x90] sm:$0xff] (!%p2124_p13)  ;;  %v1479_v22 = vld [vmem:[#allocation2 + $0xa8] sm:$0xff] (!%p2124_p13) }
 0x1b9   : > { %2548 = vmatpush3.bf16.msra.mxu0 (!%p2124_p13), %v2794_v3  ;;  %2601 = vmatpush3.bf16.msra.mxu1 (!%p2124_p13), %v2794_v3  ;;  %v1477_v18 = vld [vmem:[#allocation2 + $0x98] sm:$0xff] (!%p2124_p13) }
 0x1ba   : > { %v1416_v26 = vadd.f32 %v1368_v23, %v422_v20  ;;  %v1371_v27 = vadd.f32 %v2506_v24, %v2394_v21  ;;  %2549 = vmatprep.subr.bf16.mxu0 (!%p2124_p13), %v2795_v4  ;;  %2594 = vmatprep.subr.bf16.mxu1 (!%p2124_p13), %v2795_v4  ;;  %v1463_v20 = vld [vmem:[#allocation2 + $0x28] sm:$0xff] (!%p2124_p13)  ;;  %v1478_v21 = vld [vmem:[#allocation2 + $0xa0] sm:$0xff] (!%p2124_p13)  ;;  %v1491_v23 = vpack.c.bf16 (!%p2124_p13), %v1461_v16, %v1460_v15 }
 0x1bb   : > { %v2395_v28 = vpop.f32.mrb[56].mxu0  ;;  %v1499_v24 = vpack.c.bf16 (!%p2124_p13), %v1477_v18, %v1476_v17 }
 0x1bc   : > { %1448 = vst [vmem:[#allocation2 + $0xd0] sm:$0xff] %v1416_v26  ;;  %v1417_v29 = vadd.f32 %v1371_v27, %v423_v25  ;;  %v2507_v30 = vpop.f32.mrb[56].mxu1  ;;  %v2396_v31 = vpop.f32.mrb[57].mxu0  ;;  %v1492_v25 = vpack.c.bf16 (!%p2124_p13), %v1463_v20, %v1462_v19  ;;  %v1500_v26 = vpack.c.bf16 (!%p2124_p13), %v1479_v22, %v1478_v21  ;;  %v1464_v27 = vld [vmem:[#allocation2 + $0x30] sm:$0xff] (!%p2124_p13) }
 0x1bd   : > { %v2397_v32 = vadd.f32 %v2396_v31, %v2395_v28  ;;  %v2508_v33 = vpop.f32.mrb[57].mxu1  ;;  %v2398_v34 = vpop.f32.mrb[58].mxu0  ;;  %2550 = vmatpush3.bf16.msra.mxu0 (!%p2124_p13), %v2795_v4  ;;  %2602 = vmatpush3.bf16.msra.mxu1 (!%p2124_p13), %v2795_v4  ;;  %v1465_v28 = vld [vmem:[#allocation2 + $0x38] sm:$0xff] (!%p2124_p13)  ;;  %v1466_v31 = vld [vmem:[#allocation2 + $0x40] sm:$0xff] (!%p2124_p13) }
 0x1be   : > { %1449 = vst [vmem:[#allocation2 + $0xd8] sm:$0xff] %v1417_v29  ;;  %v2509_v35 = vadd.f32 %v2508_v33, %v2507_v30  ;;  %v2510_v36 = vpop.f32.mrb[58].mxu1  ;;  %v2399_v37 = vpop.f32.mrb[59].mxu0  ;;  %2551 = vmatprep.subr.bf16.mxu0 (!%p2124_p13), %v2796_v11  ;;  %2595 = vmatprep.subr.bf16.mxu1 (!%p2124_p13), %v2796_v11  ;;  %v1480_v29 = vld [vmem:[#allocation2 + $0xb0] sm:$0xff] (!%p2124_p13)  ;;  %v1481_v30 = vld [vmem:[#allocation2 + $0xb8] sm:$0xff] (!%p2124_p13)  ;;  %v1482_v33 = vld [vmem:[#allocation2 + $0xc0] sm:$0xff] (!%p2124_p13) }
 0x1bf   : > { %v2400_v39 = vadd.f32 %v2399_v37, %v2398_v34  ;;  %v2511_v40 = vpop.f32.mrb[59].mxu1  ;;  %v1483_v34 = vld [vmem:[#allocation2 + $0xc8] sm:$0xff] (!%p2124_p13) }
 0x1c0   : > { %v1376_v41 = vadd.f32 %v2509_v35, %v2397_v32  ;;  %v2512_v42 = vadd.f32 %v2511_v40, %v2510_v36  ;;  %v1467_v32 = vld [vmem:[#allocation2 + $0x48] sm:$0xff] (!%p2124_p13)  ;;  %v1493_v35 = vpack.c.bf16 (!%p2124_p13), %v1465_v28, %v1464_v27  ;;  %v1501_v36 = vpack.c.bf16 (!%p2124_p13), %v1481_v30, %v1480_v29  ;;  %v1469_v40 = vld [vmem:[#allocation2 + $0x58] sm:$0xff] (!%p2124_p13) }
 0x1c1   : > { %2552 = vmatpush3.bf16.msra.mxu0 (!%p2124_p13), %v2796_v11  ;;  %2603 = vmatpush3.bf16.msra.mxu1 (!%p2124_p13), %v2796_v11  ;;  %v1494_v37 = vpack.c.bf16 (!%p2124_p13), %v1467_v32, %v1466_v31 }
 0x1c2   : > { %v1418_v44 = vadd.f32 %v1376_v41, %v424_v38  ;;  %v1379_v45 = vadd.f32 %v2512_v42, %v2400_v39  ;;  %2553 = vmatprep.subr.bf16.mxu0 (!%p2124_p13), %v2797_v12  ;;  %2596 = vmatprep.subr.bf16.mxu1 (!%p2124_p13), %v2797_v12  ;;  %v1502_v38 = vpack.c.bf16 (!%p2124_p13), %v1483_v34, %v1482_v33  ;;  %v1468_v39 = vld [vmem:[#allocation2 + $0x50] sm:$0xff] (!%p2124_p13) }
 0x1c3   : > { %v2401_v46 = vpop.f32.mrb[60].mxu0  ;;  %v1484_v41 = vld [vmem:[#allocation2 + $0xd0] sm:$0xff] (!%p2124_p13) }
 0x1c4   : > { %1450 = vst [vmem:[#allocation2 + $0xe0] sm:$0xff] %v1418_v44  ;;  %v1419_v47 = vadd.f32 %v1379_v45, %v425_v43  ;;  %v2513_v48 = vpop.f32.mrb[60].mxu1  ;;  %v2402_v49 = vpop.f32.mrb[61].mxu0  ;;  %v1470_v43 = vld [vmem:[#allocation2 + $0x60] sm:$0xff] (!%p2124_p13)  ;;  %v1471_v44 = vld [vmem:[#allocation2 + $0x68] sm:$0xff] (!%p2124_p13) }
 0x1c5   : > { %v2403_v50 = vadd.f32 %v2402_v49, %v2401_v46  ;;  %v2514_v51 = vpop.f32.mrb[61].mxu1  ;;  %v2404_v52 = vpop.f32.mrb[62].mxu0  ;;  %2554 = vmatpush3.bf16.msra.mxu0 (!%p2124_p13), %v2797_v12  ;;  %2604 = vmatpush3.bf16.msra.mxu1 (!%p2124_p13), %v2797_v12  ;;  %v1485_v42 = vld [vmem:[#allocation2 + $0xd8] sm:$0xff] (!%p2124_p13)  ;;  %v1496_v49 = vpack.c.bf16 (!%p2124_p13), %v1471_v44, %v1470_v43 }
 0x1c6   : > { %1451 = vst [vmem:[#allocation2 + $0xe8] sm:$0xff] %v1419_v47  ;;  %v2515_v53 = vadd.f32 %v2514_v51, %v2513_v48  ;;  %v2516_v54 = vpop.f32.mrb[62].mxu1  ;;  %v2405_v55 = vpop.f32.mrb[63].mxu0  ;;  %2555 = vmatprep.subr.bf16.mxu0 (!%p2124_p13), %v2798_v13  ;;  %2597 = vmatprep.subr.bf16.mxu1 (!%p2124_p13), %v2798_v13  ;;  %v1495_v47 = vpack.c.bf16 (!%p2124_p13), %v1469_v40, %v1468_v39  ;;  %v1472_v51 = vld [vmem:[#allocation2 + $0x70] sm:$0xff] (!%p2124_p13) }
 0x1c7   : > { %v2406_v57 = vadd.f32 %v2405_v55, %v2404_v52  ;;  %v2517_v58 = vpop.f32.mrb[63].mxu1  ;;  %v1503_v48 = vpack.c.bf16 (!%p2124_p13), %v1485_v42, %v1484_v41  ;;  %v1473_v52 = vld [vmem:[#allocation2 + $0x78] sm:$0xff] (!%p2124_p13) }
 0x1c8   : > { %v1384_v59 = vadd.f32 %v2515_v53, %v2403_v50  ;;  %v2518_v60 = vadd.f32 %v2517_v58, %v2516_v54  ;;  %1457 = sbr.rel (%p2124_p13) target bundleno = 708 (0x2c4), region = 63  ;;  %v1497_v55 = vpack.c.bf16 (!%p2124_p13), %v1473_v52, %v1472_v51 }
 0x1c9   : > { %2556 = vmatpush3.bf16.msra.mxu0 (!%p2124_p13), %v2798_v13  ;;  %2605 = vmatpush3.bf16.msra.mxu1 (!%p2124_p13), %v2798_v13 }
 0x1ca   : > { %v1420_v62 = vadd.f32 %v1384_v59, %v426_v56  ;;  %v1387_v63 = vadd.f32 %v2518_v60, %v2406_v57  ;;  %2557 = vmatprep.subr.bf16.mxu0 (!%p2124_p13), %v2799_v14  ;;  %2598 = vmatprep.subr.bf16.mxu1 (!%p2124_p13), %v2799_v14 }
 0x1cb   : > { %v1486_v45 = vld [vmem:[#allocation2 + $0xe0] sm:$0xff] (!%p2124_p13) }
 0x1cc   : > { %1452 = vst [vmem:[#allocation2 + $0xf0] sm:$0xff] %v1420_v62  ;;  %v1421_v0 = vadd.f32 %v1387_v63, %v427_v61 }
 0x1cd   : > { %2558 = vmatpush3.bf16.msra.mxu0 (!%p2124_p13), %v2799_v14  ;;  %2606 = vmatpush3.bf16.msra.mxu1 (!%p2124_p13), %v2799_v14  ;;  %v1487_v46 = vld [vmem:[#allocation2 + $0xe8] sm:$0xff] (!%p2124_p13) }
 0x1ce   : > { %1453 = vst [vmem:[#allocation2 + $0xf8] sm:$0xff] %v1421_v0  ;;  %v1504_v50 = vpack.c.bf16 (!%p2124_p13), %v1487_v46, %v1486_v45 }
 0x1d0   : > { %2560 = vmatmul.mubr.bf16.vlgmr.msra.gmra.mrb[0].mxu0 %v1491_v23  ;;  %2576 = vmatmul.mubr.bf16.vlgmr.msra.gmra.mrb[0].mxu1 %v1499_v24 }
 0x1d1   : > { %2563 = vmatprep.mubr.bf16.mxu0 %v1492_v25  ;;  %2579 = vmatprep.mubr.bf16.mxu1 %v1500_v26 }
 0x1d3   : > { %v1488_v53 = vld [vmem:[#allocation2 + $0xf0] sm:$0xff] }
 0x1d5   : > { %v1489_v54 = vld [vmem:[#allocation2 + $0xf8] sm:$0xff] }
 0x1d6   : > { %v1505_v56 = vpack.c.bf16 %v1489_v54, %v1488_v53 }
 0x1d8   : > { %2564 = vmatmul.mubr.bf16.gmra.mrb[4].mxu0 %v1493_v35  ;;  %2580 = vmatmul.mubr.bf16.gmra.mrb[4].mxu1 %v1501_v36 }
 0x1d9   : > { %2567 = vmatprep.mubr.bf16.mxu0 %v1494_v37  ;;  %2583 = vmatprep.mubr.bf16.mxu1 %v1502_v38 }
 0x1e0   : > { %2568 = vmatmul.mubr.bf16.gmra.mrb[8].mxu0 %v1495_v47  ;;  %2584 = vmatmul.mubr.bf16.gmra.mrb[8].mxu1 %v1503_v48 }
 0x1e1   : > { %2571 = vmatprep.mubr.bf16.mxu0 %v1496_v49  ;;  %2587 = vmatprep.mubr.bf16.mxu1 %v1504_v50 }
 0x1e8   : > { %2572 = vmatmul.mubr.bf16.gmra.mrb[12].mxu0 %v1497_v55  ;;  %2588 = vmatmul.mubr.bf16.gmra.mrb[12].mxu1 %v1505_v56 }
 0x2a3   : > { %v2561_v57 = vpop.f32.mrb[0].mxu0  ;;  %v2577_v58 = vpop.f32.mrb[0].mxu1 }
 0x2a4   : > { %v1604_v59 = vpop.f32.mrb[1].mxu0  ;;  %v1668_v60 = vpop.f32.mrb[1].mxu1  ;;  %v1733_v63 = vmax.f32 %v2561_v57, 0.0  ;;  %v1749_v0 = vmax.f32 %v2577_v58, 0.0 }
 0x2a5   : > { %v2562_v61 = vpop.f32.mrb[2].mxu0  ;;  %v2578_v62 = vpop.f32.mrb[2].mxu1  ;;  %v1731_v5 = vmax.f32 %v1604_v59, 0.0  ;;  %v1747_v6 = vmax.f32 %v1668_v60, 0.0 }
 0x2a6   : > { %v1734_v1 = vmax.f32 %v2562_v61, 0.0  ;;  %v1750_v2 = vmax.f32 %v2578_v62, 0.0  ;;  %v1607_v3 = vpop.f32.mrb[3].mxu0  ;;  %v1671_v4 = vpop.f32.mrb[3].mxu1 }
 0x2a7   : > { %v1732_v7 = vmax.f32 %v1607_v3, 0.0  ;;  %v1748_v8 = vmax.f32 %v1671_v4, 0.0 }
 0x2a8   : > { %v2208_v9 = vpack.c.bf16 %v1734_v1, %v1733_v63  ;;  %v2248_v10 = vpack.c.bf16 %v1750_v2, %v1749_v0 }
 0x2a9   : > { %v2203_v11 = vpack.c.bf16 %v1732_v7, %v1731_v5  ;;  %v2243_v12 = vpack.c.bf16 %v1748_v8, %v1747_v6 }
 0x2aa   : > { %2280 = vst [vmem:[%s3082_s30 + $0x8] sm:$0xff] %v2208_v9   ;;  %2288 = vst [vmem:[%s3082_s30 + $0x48] sm:$0xff] %v2248_v10  }
 0x2ab   : > { %2204 = vst [vmem:[%s3082_s30] sm:$0xff] %v2203_v11   ;;  %2287 = vst [vmem:[%s3082_s30 + $0x40] sm:$0xff] %v2243_v12   ;;  %v2565_v13 = vpop.f32.mrb[4].mxu0  ;;  %v2581_v14 = vpop.f32.mrb[4].mxu1 }
 0x2ac   : > { %v1620_v15 = vpop.f32.mrb[5].mxu0  ;;  %v1684_v16 = vpop.f32.mrb[5].mxu1  ;;  %v1737_v19 = vmax.f32 %v2565_v13, 0.0  ;;  %v1753_v20 = vmax.f32 %v2581_v14, 0.0 }
 0x2ad   : > { %v2566_v17 = vpop.f32.mrb[6].mxu0  ;;  %v2582_v18 = vpop.f32.mrb[6].mxu1  ;;  %v1735_v25 = vmax.f32 %v1620_v15, 0.0  ;;  %v1751_v26 = vmax.f32 %v1684_v16, 0.0 }
 0x2ae   : > { %v1738_v21 = vmax.f32 %v2566_v17, 0.0  ;;  %v1754_v22 = vmax.f32 %v2582_v18, 0.0  ;;  %v1623_v23 = vpop.f32.mrb[7].mxu0  ;;  %v1687_v24 = vpop.f32.mrb[7].mxu1 }
 0x2af   : > { %v1736_v27 = vmax.f32 %v1623_v23, 0.0  ;;  %v1752_v28 = vmax.f32 %v1687_v24, 0.0 }
 0x2b0   : > { %v2218_v29 = vpack.c.bf16 %v1738_v21, %v1737_v19  ;;  %v2258_v30 = vpack.c.bf16 %v1754_v22, %v1753_v20 }
 0x2b1   : > { %v2213_v31 = vpack.c.bf16 %v1736_v27, %v1735_v25  ;;  %v2253_v32 = vpack.c.bf16 %v1752_v28, %v1751_v26 }
 0x2b2   : > { %2282 = vst [vmem:[%s3082_s30 + $0x18] sm:$0xff] %v2218_v29   ;;  %2290 = vst [vmem:[%s3082_s30 + $0x58] sm:$0xff] %v2258_v30  }
 0x2b3   : > { %2281 = vst [vmem:[%s3082_s30 + $0x10] sm:$0xff] %v2213_v31   ;;  %2289 = vst [vmem:[%s3082_s30 + $0x50] sm:$0xff] %v2253_v32   ;;  %v2569_v33 = vpop.f32.mrb[8].mxu0  ;;  %v2585_v34 = vpop.f32.mrb[8].mxu1 }
 0x2b4   : > { %v1636_v35 = vpop.f32.mrb[9].mxu0  ;;  %v1700_v36 = vpop.f32.mrb[9].mxu1  ;;  %v1741_v39 = vmax.f32 %v2569_v33, 0.0  ;;  %v1757_v40 = vmax.f32 %v2585_v34, 0.0 }
 0x2b5   : > { %v2570_v37 = vpop.f32.mrb[10].mxu0  ;;  %v2586_v38 = vpop.f32.mrb[10].mxu1  ;;  %v1739_v45 = vmax.f32 %v1636_v35, 0.0  ;;  %v1755_v46 = vmax.f32 %v1700_v36, 0.0 }
 0x2b6   : > { %v1742_v41 = vmax.f32 %v2570_v37, 0.0  ;;  %v1758_v42 = vmax.f32 %v2586_v38, 0.0  ;;  %v1639_v43 = vpop.f32.mrb[11].mxu0  ;;  %v1703_v44 = vpop.f32.mrb[11].mxu1 }
 0x2b7   : > { %v1740_v47 = vmax.f32 %v1639_v43, 0.0  ;;  %v1756_v48 = vmax.f32 %v1703_v44, 0.0 }
 0x2b8   : > { %v2228_v49 = vpack.c.bf16 %v1742_v41, %v1741_v39  ;;  %v2268_v50 = vpack.c.bf16 %v1758_v42, %v1757_v40 }
 0x2b9   : > { %v2223_v51 = vpack.c.bf16 %v1740_v47, %v1739_v45  ;;  %v2263_v52 = vpack.c.bf16 %v1756_v48, %v1755_v46 }
 0x2ba   : > { %2284 = vst [vmem:[%s3082_s30 + $0x28] sm:$0xff] %v2228_v49   ;;  %2292 = vst [vmem:[%s3082_s30 + $0x68] sm:$0xff] %v2268_v50  }
 0x2bb   : > { %2283 = vst [vmem:[%s3082_s30 + $0x20] sm:$0xff] %v2223_v51   ;;  %2291 = vst [vmem:[%s3082_s30 + $0x60] sm:$0xff] %v2263_v52   ;;  %v2573_v53 = vpop.f32.mrb[12].mxu0  ;;  %v2589_v54 = vpop.f32.mrb[12].mxu1 }
 0x2bc   : > { %v1652_v55 = vpop.f32.mrb[13].mxu0  ;;  %v1716_v56 = vpop.f32.mrb[13].mxu1  ;;  %v1745_v59 = vmax.f32 %v2573_v53, 0.0  ;;  %v1761_v60 = vmax.f32 %v2589_v54, 0.0 }
 0x2bd   : > { %v2574_v57 = vpop.f32.mrb[14].mxu0  ;;  %v2590_v58 = vpop.f32.mrb[14].mxu1  ;;  %v1743_v1 = vmax.f32 %v1652_v55, 0.0  ;;  %v1759_v2 = vmax.f32 %v1716_v56, 0.0 }
 0x2be   : > { %v1746_v61 = vmax.f32 %v2574_v57, 0.0  ;;  %v1762_v62 = vmax.f32 %v2590_v58, 0.0  ;;  %v1655_v63 = vpop.f32.mrb[15].mxu0  ;;  %v1719_v0 = vpop.f32.mrb[15].mxu1 }
 0x2bf   : > { %v1744_v3 = vmax.f32 %v1655_v63, 0.0  ;;  %v1760_v4 = vmax.f32 %v1719_v0, 0.0 }
 0x2c0   : > { %v2238_v5 = vpack.c.bf16 %v1746_v61, %v1745_v59  ;;  %v2278_v6 = vpack.c.bf16 %v1762_v62, %v1761_v60 }
 0x2c1   : > { %v2233_v7 = vpack.c.bf16 %v1744_v3, %v1743_v1  ;;  %v2273_v8 = vpack.c.bf16 %v1760_v4, %v1759_v2 }
 0x2c2   : > { %2286 = vst [vmem:[%s3082_s30 + $0x38] sm:$0xff] %v2238_v5   ;;  %2294 = vst [vmem:[%s3082_s30 + $0x78] sm:$0xff] %v2278_v6  }
 0x2c3   : > { %2285 = vst [vmem:[%s3082_s30 + $0x30] sm:$0xff] %v2233_v7   ;;  %2293 = vst [vmem:[%s3082_s30 + $0x70] sm:$0xff] %v2273_v8  }
 0x2c4 PF: > { %s13_s18 = sadd.s32 1, %s2854_s18   ;;  %s3249_s12 = smov %s2834_s13 }
 0x2c5   : > { %p10_p0 = scmp.ge.s32.totalorder %s13_s18, 10   ;;  %s3250_s13 = smov %s2928_s25 }
 0x2c6   : > { %s3251_s14 = smov %s2846_s16  ;;  %s3252_s15 = smov %s2850_s17 }
 0x2c7   : > { %s3253_s16 = smov %s3256_s19  ;;  %s3254_s17 = smov %s3260_s20 }
 0x2c8   :  { %12 = sbr.rel (!%p10_p0) target bundleno = 4 (0x4), region = 101 }

// kernel: gnn_forward.5
= control target key start
LH: loop header
LB: loop body
LE: loop exit
PB: predicated region body
PF: predicated region fallthrough
CT: control target
= control target key end

     0   :  { %s2558_s12 = smov 0   ;;  %s2560_s13 = smov 0   ;;  %s2942_s0 = inlined_call_operand.vmem [shape: bf16[1024,1024], index: 0, kind: input, shape index: {}]   ;;  %s2943_s1 = inlined_call_operand.vmem [shape: bf16[1024,128], index: 1, kind: input, shape index: {}]   ;;  %s2944_s2 = inlined_call_operand.vmem [shape: bf16[128,128], index: 2, kind: input, shape index: {}]   ;;  %s2945_s3 = inlined_call_operand.vmem [shape: f32[1024,128], index: 3, kind: output, shape index: {}]  }
   0x1   :  { %s2562_s14 = smov 0   ;;  %s2564_s15 = smov 0  }
   0x2   :  { %s2566_s16 = smov 0   ;;  %s2568_s17 = smov 0  }
   0x3   :  { %s2570_s18 = smov 0  }
   0x4 LB: > { %s22_s19 = sadd.s32 1, %s2527_s16  ;;  %s25_s20 = sadd.s32 1, %s2531_s17  ;;  %s2535_s18 = sphi %s2570_s18, %s13_s18   ;;  %s2531_s17 = sphi %s2568_s17, %s2951_s17   ;;  %s2527_s16 = sphi %s2566_s16, %s2950_s16   ;;  %s2523_s15 = sphi %s2564_s15, %s2949_s15   ;;  %s2519_s14 = sphi %s2562_s14, %s2948_s14   ;;  %s2515_s13 = sphi %s2560_s13, %s2947_s13   ;;  %s2511_s12 = sphi %s2558_s12, %s2946_s12  }
   0x5   : > { %p23_p0 = scmp.ge.s32.totalorder %s22_s19, 2  ;;  %p41_p1 = scmp.ne.s32.totalorder %s2515_s13, %s2511_s12 }
   0x6   : > { %p42_p2 = scmp.eq.s32.totalorder %s2535_s18, 0  ;;  %s34_s24 = sadd.s32 1, %s2515_s13 }
   0x7   : > { %s2953_s19 = smov (%p23_p0, %s22_s19), 0  ;;  %s2955_s20 = smov (!%p23_p0, %s25_s20), %s2531_s17 }
   0x8   : > { %p43_p3 = por %p42_p2, %p41_p1  ;;  %p27_p4 = scmp.ge.s32.totalorder %s2955_s20, 4 }
   0x9   : > { %s30_s21 = ssub.s32 %s2527_s16, %s2953_s19  ;;  %p1855_p6 = scmp.ge.s32.totalorder %s2535_s18, 8 }
   0xa   : > { %s2957_s20 = smov (%p27_p4, %s2955_s20), 0 }
   0xb   : > { %s29_s22 = ssub.s32 %s2531_s17, %s2957_s20  ;;  %143 = sbr.rel (%p1855_p6) target bundleno = 57 (0x39), region = 20 }
   0xc   : > { %s31_s23 = sor.u32 %s30_s21, %s29_s22 }
   0xd   : > { %p32_p5 = scmp.eq.s32.totalorder %s31_s23, 0 }
   0xf   : > { %s2609_s25 = scalar_select %p32_p5, %s2515_s13, %s34_s24  }
  0x12   : > { %146 = sbr.rel (!%p43_p3) target bundleno = 57 (0x39), region = 24  ;;  %s148_s26 = sand.u32 (%p43_p3), 1, %s2515_s13  }
  0x13   : > { %s1858_s27 = sshll.u32 (%p43_p3), %s2527_s16, 2  ;;  %s1856_s28 = sshll.u32 (%p43_p3), %s148_s26, 9 }
  0x14   : > { %s1975_s29 = sshll.u32 (%p43_p3), %s2531_s17, 8  ;;  %s2623_s8 = scalar_lea.vmem (%p43_p3), [#allocation3], %s1856_s28 }
  0x15   : > { %s154_s30 = sadd.s32 (%p43_p3), %s1975_s29, %s1858_s27 }
  0x16   : > { %s1860_s4 = sshll.u32 (%p43_p3), %s154_s30, 2 }
  0x17   : > { %s2618_s7 = scalar_lea.vmem (%p43_p3), %s2942_s0, %s1860_s4 }
  0x18   : > { %v169_v0 = vld [vmem:[%s2618_s7] sm:$0xff] (%p43_p3)  ;;  %v171_v1 = vld [vmem:[%s2618_s7 + $0x8] sm:$0xff] (%p43_p3) }
  0x19   : > { %v173_v2 = vld [vmem:[%s2618_s7 + $0x20] sm:$0xff]  ;;  %170 = vst [vmem:[%s2623_s8] sm:$0xff] %v169_v0  ;;  %172 = vst [vmem:[%s2623_s8 + $0x8] sm:$0xff] %v171_v1  ;;  %v175_v3 = vld [vmem:[%s2618_s7 + $0x28] sm:$0xff] }
  0x1a   : > { %174 = vst [vmem:[%s2623_s8 + $0x10] sm:$0xff] %v173_v2  ;;  %v177_v4 = vld [vmem:[%s2618_s7 + $0x40] sm:$0xff]  ;;  %v179_v5 = vld [vmem:[%s2618_s7 + $0x48] sm:$0xff]  ;;  %176 = vst [vmem:[%s2623_s8 + $0x18] sm:$0xff] %v175_v3 }
  0x1b   : > { %178 = vst [vmem:[%s2623_s8 + $0x20] sm:$0xff] %v177_v4  ;;  %180 = vst [vmem:[%s2623_s8 + $0x28] sm:$0xff] %v179_v5  ;;  %v181_v6 = vld [vmem:[%s2618_s7 + $0x60] sm:$0xff]  ;;  %v183_v7 = vld [vmem:[%s2618_s7 + $0x68] sm:$0xff] }
  0x1c   : > { %v185_v8 = vld [vmem:[%s2618_s7 + $0x80] sm:$0xff]  ;;  %182 = vst [vmem:[%s2623_s8 + $0x30] sm:$0xff] %v181_v6  ;;  %184 = vst [vmem:[%s2623_s8 + $0x38] sm:$0xff] %v183_v7  ;;  %v187_v9 = vld [vmem:[%s2618_s7 + $0x88] sm:$0xff] }
  0x1d   : > { %186 = vst [vmem:[%s2623_s8 + $0x40] sm:$0xff] %v185_v8  ;;  %v189_v10 = vld [vmem:[%s2618_s7 + $0xa0] sm:$0xff]  ;;  %v191_v11 = vld [vmem:[%s2618_s7 + $0xa8] sm:$0xff]  ;;  %188 = vst [vmem:[%s2623_s8 + $0x48] sm:$0xff] %v187_v9 }
  0x1e   : > { %190 = vst [vmem:[%s2623_s8 + $0x50] sm:$0xff] %v189_v10  ;;  %192 = vst [vmem:[%s2623_s8 + $0x58] sm:$0xff] %v191_v11  ;;  %v193_v12 = vld [vmem:[%s2618_s7 + $0xc0] sm:$0xff]  ;;  %v195_v13 = vld [vmem:[%s2618_s7 + $0xc8] sm:$0xff] }
  0x1f   : > { %v197_v14 = vld [vmem:[%s2618_s7 + $0xe0] sm:$0xff]  ;;  %194 = vst [vmem:[%s2623_s8 + $0x60] sm:$0xff] %v193_v12  ;;  %196 = vst [vmem:[%s2623_s8 + $0x68] sm:$0xff] %v195_v13  ;;  %v199_v15 = vld [vmem:[%s2618_s7 + $0xe8] sm:$0xff] }
  0x20   : > { %198 = vst [vmem:[%s2623_s8 + $0x70] sm:$0xff] %v197_v14  ;;  %v201_v16 = vld [vmem:[%s2618_s7 + $0x100] sm:$0xff]  ;;  %v203_v17 = vld [vmem:[%s2618_s7 + $0x108] sm:$0xff]  ;;  %200 = vst [vmem:[%s2623_s8 + $0x78] sm:$0xff] %v199_v15 }
  0x21   : > { %202 = vst [vmem:[%s2623_s8 + $0x80] sm:$0xff] %v201_v16  ;;  %204 = vst [vmem:[%s2623_s8 + $0x88] sm:$0xff] %v203_v17  ;;  %v205_v18 = vld [vmem:[%s2618_s7 + $0x120] sm:$0xff]  ;;  %v207_v19 = vld [vmem:[%s2618_s7 + $0x128] sm:$0xff] }
  0x22   : > { %v209_v20 = vld [vmem:[%s2618_s7 + $0x140] sm:$0xff]  ;;  %206 = vst [vmem:[%s2623_s8 + $0x90] sm:$0xff] %v205_v18  ;;  %208 = vst [vmem:[%s2623_s8 + $0x98] sm:$0xff] %v207_v19  ;;  %v211_v21 = vld [vmem:[%s2618_s7 + $0x148] sm:$0xff] }
  0x23   : > { %210 = vst [vmem:[%s2623_s8 + $0xa0] sm:$0xff] %v209_v20  ;;  %v213_v22 = vld [vmem:[%s2618_s7 + $0x160] sm:$0xff]  ;;  %v215_v23 = vld [vmem:[%s2618_s7 + $0x168] sm:$0xff]  ;;  %212 = vst [vmem:[%s2623_s8 + $0xa8] sm:$0xff] %v211_v21 }
  0x24   : > { %214 = vst [vmem:[%s2623_s8 + $0xb0] sm:$0xff] %v213_v22  ;;  %216 = vst [vmem:[%s2623_s8 + $0xb8] sm:$0xff] %v215_v23  ;;  %v217_v24 = vld [vmem:[%s2618_s7 + $0x180] sm:$0xff]  ;;  %v219_v25 = vld [vmem:[%s2618_s7 + $0x188] sm:$0xff] }
  0x25   : > { %v221_v26 = vld [vmem:[%s2618_s7 + $0x1a0] sm:$0xff]  ;;  %218 = vst [vmem:[%s2623_s8 + $0xc0] sm:$0xff] %v217_v24  ;;  %220 = vst [vmem:[%s2623_s8 + $0xc8] sm:$0xff] %v219_v25  ;;  %v223_v27 = vld [vmem:[%s2618_s7 + $0x1a8] sm:$0xff] }
  0x26   : > { %222 = vst [vmem:[%s2623_s8 + $0xd0] sm:$0xff] %v221_v26  ;;  %v225_v28 = vld [vmem:[%s2618_s7 + $0x1c0] sm:$0xff]  ;;  %v227_v29 = vld [vmem:[%s2618_s7 + $0x1c8] sm:$0xff]  ;;  %224 = vst [vmem:[%s2623_s8 + $0xd8] sm:$0xff] %v223_v27 }
  0x27   : > { %226 = vst [vmem:[%s2623_s8 + $0xe0] sm:$0xff] %v225_v28  ;;  %228 = vst [vmem:[%s2623_s8 + $0xe8] sm:$0xff] %v227_v29  ;;  %v229_v30 = vld [vmem:[%s2618_s7 + $0x1e0] sm:$0xff]  ;;  %v231_v31 = vld [vmem:[%s2618_s7 + $0x1e8] sm:$0xff] }
  0x28   : > { %v233_v32 = vld [vmem:[%s2618_s7 + $0x200] sm:$0xff]  ;;  %230 = vst [vmem:[%s2623_s8 + $0xf0] sm:$0xff] %v229_v30  ;;  %232 = vst [vmem:[%s2623_s8 + $0xf8] sm:$0xff] %v231_v31  ;;  %v235_v33 = vld [vmem:[%s2618_s7 + $0x208] sm:$0xff] }
  0x29   : > { %234 = vst [vmem:[%s2623_s8 + $0x100] sm:$0xff] %v233_v32  ;;  %v237_v34 = vld [vmem:[%s2618_s7 + $0x220] sm:$0xff]  ;;  %v239_v35 = vld [vmem:[%s2618_s7 + $0x228] sm:$0xff]  ;;  %236 = vst [vmem:[%s2623_s8 + $0x108] sm:$0xff] %v235_v33 }
  0x2a   : > { %238 = vst [vmem:[%s2623_s8 + $0x110] sm:$0xff] %v237_v34  ;;  %240 = vst [vmem:[%s2623_s8 + $0x118] sm:$0xff] %v239_v35  ;;  %v241_v36 = vld [vmem:[%s2618_s7 + $0x240] sm:$0xff]  ;;  %v243_v37 = vld [vmem:[%s2618_s7 + $0x248] sm:$0xff] }
  0x2b   : > { %v245_v38 = vld [vmem:[%s2618_s7 + $0x260] sm:$0xff]  ;;  %242 = vst [vmem:[%s2623_s8 + $0x120] sm:$0xff] %v241_v36  ;;  %244 = vst [vmem:[%s2623_s8 + $0x128] sm:$0xff] %v243_v37  ;;  %v247_v39 = vld [vmem:[%s2618_s7 + $0x268] sm:$0xff] }
  0x2c   : > { %246 = vst [vmem:[%s2623_s8 + $0x130] sm:$0xff] %v245_v38  ;;  %v249_v40 = vld [vmem:[%s2618_s7 + $0x280] sm:$0xff]  ;;  %v251_v41 = vld [vmem:[%s2618_s7 + $0x288] sm:$0xff]  ;;  %248 = vst [vmem:[%s2623_s8 + $0x138] sm:$0xff] %v247_v39 }
  0x2d   : > { %250 = vst [vmem:[%s2623_s8 + $0x140] sm:$0xff] %v249_v40  ;;  %252 = vst [vmem:[%s2623_s8 + $0x148] sm:$0xff] %v251_v41  ;;  %v253_v42 = vld [vmem:[%s2618_s7 + $0x2a0] sm:$0xff]  ;;  %v255_v43 = vld [vmem:[%s2618_s7 + $0x2a8] sm:$0xff] }
  0x2e   : > { %v257_v44 = vld [vmem:[%s2618_s7 + $0x2c0] sm:$0xff]  ;;  %254 = vst [vmem:[%s2623_s8 + $0x150] sm:$0xff] %v253_v42  ;;  %256 = vst [vmem:[%s2623_s8 + $0x158] sm:$0xff] %v255_v43  ;;  %v259_v45 = vld [vmem:[%s2618_s7 + $0x2c8] sm:$0xff] }
  0x2f   : > { %258 = vst [vmem:[%s2623_s8 + $0x160] sm:$0xff] %v257_v44  ;;  %v261_v46 = vld [vmem:[%s2618_s7 + $0x2e0] sm:$0xff]  ;;  %v263_v47 = vld [vmem:[%s2618_s7 + $0x2e8] sm:$0xff]  ;;  %260 = vst [vmem:[%s2623_s8 + $0x168] sm:$0xff] %v259_v45 }
  0x30   : > { %262 = vst [vmem:[%s2623_s8 + $0x170] sm:$0xff] %v261_v46  ;;  %264 = vst [vmem:[%s2623_s8 + $0x178] sm:$0xff] %v263_v47  ;;  %v265_v48 = vld [vmem:[%s2618_s7 + $0x300] sm:$0xff]  ;;  %v267_v49 = vld [vmem:[%s2618_s7 + $0x308] sm:$0xff] }
  0x31   : > { %v269_v50 = vld [vmem:[%s2618_s7 + $0x320] sm:$0xff]  ;;  %266 = vst [vmem:[%s2623_s8 + $0x180] sm:$0xff] %v265_v48  ;;  %268 = vst [vmem:[%s2623_s8 + $0x188] sm:$0xff] %v267_v49  ;;  %v271_v51 = vld [vmem:[%s2618_s7 + $0x328] sm:$0xff] }
  0x32   : > { %270 = vst [vmem:[%s2623_s8 + $0x190] sm:$0xff] %v269_v50  ;;  %v273_v52 = vld [vmem:[%s2618_s7 + $0x340] sm:$0xff]  ;;  %v275_v53 = vld [vmem:[%s2618_s7 + $0x348] sm:$0xff]  ;;  %272 = vst [vmem:[%s2623_s8 + $0x198] sm:$0xff] %v271_v51 }
  0x33   : > { %274 = vst [vmem:[%s2623_s8 + $0x1a0] sm:$0xff] %v273_v52  ;;  %276 = vst [vmem:[%s2623_s8 + $0x1a8] sm:$0xff] %v275_v53  ;;  %v277_v54 = vld [vmem:[%s2618_s7 + $0x360] sm:$0xff]  ;;  %v279_v55 = vld [vmem:[%s2618_s7 + $0x368] sm:$0xff] }
  0x34   : > { %v281_v56 = vld [vmem:[%s2618_s7 + $0x380] sm:$0xff]  ;;  %278 = vst [vmem:[%s2623_s8 + $0x1b0] sm:$0xff] %v277_v54  ;;  %280 = vst [vmem:[%s2623_s8 + $0x1b8] sm:$0xff] %v279_v55  ;;  %v283_v57 = vld [vmem:[%s2618_s7 + $0x388] sm:$0xff] }
  0x35   : > { %282 = vst [vmem:[%s2623_s8 + $0x1c0] sm:$0xff] %v281_v56  ;;  %v285_v58 = vld [vmem:[%s2618_s7 + $0x3a0] sm:$0xff]  ;;  %v287_v59 = vld [vmem:[%s2618_s7 + $0x3a8] sm:$0xff]  ;;  %284 = vst [vmem:[%s2623_s8 + $0x1c8] sm:$0xff] %v283_v57 }
  0x36   : > { %286 = vst [vmem:[%s2623_s8 + $0x1d0] sm:$0xff] %v285_v58  ;;  %288 = vst [vmem:[%s2623_s8 + $0x1d8] sm:$0xff] %v287_v59  ;;  %v289_v60 = vld [vmem:[%s2618_s7 + $0x3c0] sm:$0xff]  ;;  %v291_v61 = vld [vmem:[%s2618_s7 + $0x3c8] sm:$0xff] }
  0x37   : > { %v293_v62 = vld [vmem:[%s2618_s7 + $0x3e0] sm:$0xff]  ;;  %290 = vst [vmem:[%s2623_s8 + $0x1e0] sm:$0xff] %v289_v60  ;;  %292 = vst [vmem:[%s2623_s8 + $0x1e8] sm:$0xff] %v291_v61  ;;  %v295_v63 = vld [vmem:[%s2618_s7 + $0x3e8] sm:$0xff] }
  0x38   : > { %294 = vst [vmem:[%s2623_s8 + $0x1f0] sm:$0xff] %v293_v62  ;;  %296 = vst [vmem:[%s2623_s8 + $0x1f8] sm:$0xff] %v295_v63 }
  0x39 PF: > { %p1861_p7 = scmp.ge.s32.totalorder %s2535_s18, 1  ;;  %p310_p8 = scmp.lt.s32.totalorder %s2535_s18, 9 }
  0x3b   : > { %p311_p9 = pnand %p1861_p7, %p310_p8 }
  0x3c   : > { %s317_s9 = sand.u32 (!%p311_p9), 1, %s2511_s12   ;;  %s1863_s10 = sshll.u32 (!%p311_p9), %s2519_s14, 6 }
  0x3d   : > { %314 = sbr.rel (%p311_p9) target bundleno = 704 (0x2c0), region = 51  ;;  %s1862_s11 = sshll.u32 (!%p311_p9), %s317_s9, 9 }
  0x3e   : > { %p348_p10 = scmp.lt.s32.totalorder (!%p311_p9), %s1863_s10, 127  ;;  %s1865_s21 = sshll.u32 (!%p311_p9), %s2523_s15, 5 }
  0x3f   : > { %p354_p11 = scmp.lt.s32.totalorder (!%p311_p9), %s1865_s21, 127  ;;  %s2765_s12 = scalar_lea.vmem (!%p311_p9), [#allocation3], %s1862_s11 }
  0x40   : > { %p1867_p12 = scmp.ne.s32.totalorder (!%p311_p9), %s2519_s14, 0 }
  0x44   : > { %s2959_s10 = smov (!%p348_p10, %s1863_s10), 127  ;;  %s2961_s21 = smov (!%p354_p11, %s1865_s21), 127 }
  0x45   : > { %s1864_s22 = sshll.u32 %s2959_s10, 2  ;;  %s1866_s27 = sshll.u32 %s2961_s21, 3  ;;  %v2537_v0 = vmov (!%p1867_p12), 0.0  }
  0x46   : > { %s2758_s26 = scalar_lea.vmem %s2943_s1, %s1864_s22  ;;  %s2763_s30 = scalar_lea.vmem %s2945_s3, %s1866_s27  ;;  %364 = vst [vmem:[#allocation2] sm:$0xff] (!%p1867_p12), %v2537_v0  ;;  %365 = vst [vmem:[#allocation2 + $0x8] sm:$0xff] (!%p1867_p12), %v2537_v0 }
  0x47   : > { %363 = sbr.rel (%p1867_p12) target bundleno = 86 (0x56), region = 59  ;;  %366 = vst [vmem:[#allocation2 + $0x10] sm:$0xff] (!%p1867_p12), %v2537_v0  ;;  %367 = vst [vmem:[#allocation2 + $0x18] sm:$0xff] (!%p1867_p12), %v2537_v0 }
  0x48   : > { %368 = vst [vmem:[#allocation2 + $0x20] sm:$0xff] (!%p1867_p12), %v2537_v0  ;;  %369 = vst [vmem:[#allocation2 + $0x28] sm:$0xff] (!%p1867_p12), %v2537_v0 }
  0x49   : > { %370 = vst [vmem:[#allocation2 + $0x30] sm:$0xff] (!%p1867_p12), %v2537_v0  ;;  %371 = vst [vmem:[#allocation2 + $0x38] sm:$0xff] (!%p1867_p12), %v2537_v0 }
  0x4a   : > { %372 = vst [vmem:[#allocation2 + $0x40] sm:$0xff] (!%p1867_p12), %v2537_v0  ;;  %373 = vst [vmem:[#allocation2 + $0x48] sm:$0xff] (!%p1867_p12), %v2537_v0 }
  0x4b   : > { %374 = vst [vmem:[#allocation2 + $0x50] sm:$0xff] (!%p1867_p12), %v2537_v0  ;;  %375 = vst [vmem:[#allocation2 + $0x58] sm:$0xff] (!%p1867_p12), %v2537_v0 }
  0x4c   : > { %376 = vst [vmem:[#allocation2 + $0x60] sm:$0xff] (!%p1867_p12), %v2537_v0  ;;  %377 = vst [vmem:[#allocation2 + $0x68] sm:$0xff] (!%p1867_p12), %v2537_v0 }
  0x4d   : > { %378 = vst [vmem:[#allocation2 + $0x70] sm:$0xff] (!%p1867_p12), %v2537_v0  ;;  %379 = vst [vmem:[#allocation2 + $0x78] sm:$0xff] (!%p1867_p12), %v2537_v0 }
  0x4e   : > { %380 = vst [vmem:[#allocation2 + $0x80] sm:$0xff] %v2537_v0  ;;  %381 = vst [vmem:[#allocation2 + $0x88] sm:$0xff] %v2537_v0 }
  0x4f   : > { %382 = vst [vmem:[#allocation2 + $0x90] sm:$0xff] %v2537_v0  ;;  %383 = vst [vmem:[#allocation2 + $0x98] sm:$0xff] %v2537_v0 }
  0x50   : > { %384 = vst [vmem:[#allocation2 + $0xa0] sm:$0xff] %v2537_v0  ;;  %385 = vst [vmem:[#allocation2 + $0xa8] sm:$0xff] %v2537_v0 }
  0x51   : > { %386 = vst [vmem:[#allocation2 + $0xb0] sm:$0xff] %v2537_v0  ;;  %387 = vst [vmem:[#allocation2 + $0xb8] sm:$0xff] %v2537_v0 }
  0x52   : > { %388 = vst [vmem:[#allocation2 + $0xc0] sm:$0xff] %v2537_v0  ;;  %389 = vst [vmem:[#allocation2 + $0xc8] sm:$0xff] %v2537_v0 }
  0x53   : > { %390 = vst [vmem:[#allocation2 + $0xd0] sm:$0xff] %v2537_v0  ;;  %391 = vst [vmem:[#allocation2 + $0xd8] sm:$0xff] %v2537_v0 }
  0x54   : > { %392 = vst [vmem:[#allocation2 + $0xe0] sm:$0xff] %v2537_v0  ;;  %393 = vst [vmem:[#allocation2 + $0xe8] sm:$0xff] %v2537_v0 }
  0x55   : > { %394 = vst [vmem:[#allocation2 + $0xf0] sm:$0xff] %v2537_v0  ;;  %395 = vst [vmem:[#allocation2 + $0xf8] sm:$0xff] %v2537_v0 }
  0x56 PF: > { %v2345_v1 = vld [vmem:[%s2758_s26 + $0x40] sm:$0xff]   ;;  %v2349_v5 = vld [vmem:[%s2758_s26 + $0x48] sm:$0xff]   ;;  %v2353_v9 = vld [vmem:[%s2758_s26 + $0x50] sm:$0xff]   ;;  %p1964_p13 = scmp.ne.s32.totalorder %s2519_s14, 1 }
  0x57   : > { %v2346_v2 = vld [vmem:[%s2758_s26 + $0xc0] sm:$0xff]   ;;  %1976 = vmatprep.subr.bf16.mxu0 %v2345_v1  ;;  %v2350_v6 = vld [vmem:[%s2758_s26 + $0xc8] sm:$0xff]   ;;  %v2354_v10 = vld [vmem:[%s2758_s26 + $0xd0] sm:$0xff]  }
  0x58   : > { %v2347_v3 = vld [vmem:[%s2758_s26] sm:$0xff]   ;;  %2088 = vmatprep.subr.bf16.mxu1 %v2346_v2  ;;  %v2351_v7 = vld [vmem:[%s2758_s26 + $0x8] sm:$0xff]   ;;  %v2355_v11 = vld [vmem:[%s2758_s26 + $0x10] sm:$0xff]  }
  0x59   : > { %v2348_v4 = vld [vmem:[%s2758_s26 + $0x80] sm:$0xff]   ;;  %1977 = vmatpush3.bf16.msra.mxu0 %v2347_v3  ;;  %v2352_v8 = vld [vmem:[%s2758_s26 + $0x88] sm:$0xff]   ;;  %v2356_v12 = vld [vmem:[%s2758_s26 + $0x90] sm:$0xff]  }
  0x5a   : > { %2089 = vmatpush3.bf16.msra.mxu1 %v2348_v4  ;;  %1978 = vmatprep.subr.bf16.mxu0 %v2349_v5  ;;  %v2357_v13 = vld [vmem:[%s2758_s26 + $0x58] sm:$0xff]   ;;  %v2361_v17 = vld [vmem:[%s2758_s26 + $0x60] sm:$0xff]   ;;  %v2365_v21 = vld [vmem:[%s2758_s26 + $0x68] sm:$0xff]  }
  0x5b   : > { %2090 = vmatprep.subr.bf16.mxu1 %v2350_v6  ;;  %v2358_v14 = vld [vmem:[%s2758_s26 + $0xd8] sm:$0xff]   ;;  %v2362_v18 = vld [vmem:[%s2758_s26 + $0xe0] sm:$0xff]   ;;  %v2366_v22 = vld [vmem:[%s2758_s26 + $0xe8] sm:$0xff]  }
  0x5c   : > { %v2359_v15 = vld [vmem:[%s2758_s26 + $0x18] sm:$0xff]   ;;  %v2363_v19 = vld [vmem:[%s2758_s26 + $0x20] sm:$0xff]   ;;  %v2367_v23 = vld [vmem:[%s2758_s26 + $0x28] sm:$0xff]  }
  0x5d   : > { %1979 = vmatpush3.bf16.msra.mxu0 %v2351_v7  ;;  %v2360_v16 = vld [vmem:[%s2758_s26 + $0x98] sm:$0xff]   ;;  %v2364_v20 = vld [vmem:[%s2758_s26 + $0xa0] sm:$0xff]   ;;  %v2368_v24 = vld [vmem:[%s2758_s26 + $0xa8] sm:$0xff]  }
  0x5e   : > { %2091 = vmatpush3.bf16.msra.mxu1 %v2352_v8  ;;  %1980 = vmatprep.subr.bf16.mxu0 %v2353_v9  ;;  %v2369_v25 = vld [vmem:[%s2758_s26 + $0x70] sm:$0xff]   ;;  %v2373_v29 = vld [vmem:[%s2758_s26 + $0x78] sm:$0xff]  }
  0x5f   : > { %2092 = vmatprep.subr.bf16.mxu1 %v2354_v10  ;;  %v2370_v26 = vld [vmem:[%s2758_s26 + $0xf0] sm:$0xff]   ;;  %v2374_v30 = vld [vmem:[%s2758_s26 + $0xf8] sm:$0xff]  }
  0x60   : > { %v2371_v27 = vld [vmem:[%s2758_s26 + $0x30] sm:$0xff]   ;;  %v2375_v31 = vld [vmem:[%s2758_s26 + $0x38] sm:$0xff]  }
  0x61   : > { %1981 = vmatpush3.bf16.msra.mxu0 %v2355_v11  ;;  %v2372_v28 = vld [vmem:[%s2758_s26 + $0xb0] sm:$0xff]   ;;  %v2376_v32 = vld [vmem:[%s2758_s26 + $0xb8] sm:$0xff]  }
  0x62   : > { %2093 = vmatpush3.bf16.msra.mxu1 %v2356_v12  ;;  %1982 = vmatprep.subr.bf16.mxu0 %v2357_v13  ;;  %v2377_v33 = vld [vmem:[%s2765_s12] ss:$16 sps:$4 sm:$0xff]   ;;  %v2379_v34 = vld [vmem:[%s2765_s12 + $0x4] ss:$16 sps:$4 sm:$0xff]   ;;  %v2380_v35 = vld [vmem:[%s2765_s12 + $0x8] ss:$16 sps:$4 sm:$0xff]  }
  0x63   : > { %2094 = vmatprep.subr.bf16.mxu1 %v2358_v14  ;;  %v2382_v36 = vld [vmem:[%s2765_s12 + $0xc] ss:$16 sps:$4 sm:$0xff]   ;;  %1100 = vmatprep.mubr.bf16.mxu0 %v2379_v34  ;;  %v2383_v37 = vld [vmem:[%s2765_s12 + $0x24] ss:$16 sps:$4 sm:$0xff]   ;;  %v2387_v39 = vld [vmem:[%s2765_s12 + $0x20] ss:$16 sps:$4 sm:$0xff]  }
  0x64   : > { %1261 = vmatprep.mubr.bf16.mxu1 %v2382_v36  ;;  %v2385_v38 = vld [vmem:[%s2765_s12 + $0x2c] ss:$16 sps:$4 sm:$0xff]   ;;  %v2388_v40 = vld [vmem:[%s2765_s12 + $0x28] ss:$16 sps:$4 sm:$0xff]   ;;  %v2389_v41 = vld [vmem:[%s2765_s12 + $0x44] ss:$16 sps:$4 sm:$0xff]  }
  0x65   : > { %1983 = vmatpush3.bf16.msra.mxu0 %v2359_v15  ;;  %v2391_v42 = vld [vmem:[%s2765_s12 + $0x4c] ss:$16 sps:$4 sm:$0xff]   ;;  %v2393_v43 = vld [vmem:[%s2765_s12 + $0x40] ss:$16 sps:$4 sm:$0xff]   ;;  %v2394_v44 = vld [vmem:[%s2765_s12 + $0x48] ss:$16 sps:$4 sm:$0xff]  }
  0x66   : > { %2095 = vmatpush3.bf16.msra.mxu1 %v2360_v16  ;;  %1984 = vmatprep.subr.bf16.mxu0 %v2361_v17  ;;  %v2395_v45 = vld [vmem:[%s2765_s12 + $0x64] ss:$16 sps:$4 sm:$0xff]   ;;  %v2397_v46 = vld [vmem:[%s2765_s12 + $0x6c] ss:$16 sps:$4 sm:$0xff]   ;;  %v2399_v47 = vld [vmem:[%s2765_s12 + $0x60] ss:$16 sps:$4 sm:$0xff]  }
  0x67   : > { %2096 = vmatprep.subr.bf16.mxu1 %v2362_v18  ;;  %v2400_v48 = vld [vmem:[%s2765_s12 + $0x68] ss:$16 sps:$4 sm:$0xff]   ;;  %v2401_v49 = vld [vmem:[%s2765_s12 + $0x84] ss:$16 sps:$4 sm:$0xff]   ;;  %v2403_v50 = vld [vmem:[%s2765_s12 + $0x8c] ss:$16 sps:$4 sm:$0xff]  }
  0x68   : > { %v2405_v51 = vld [vmem:[%s2765_s12 + $0x80] ss:$16 sps:$4 sm:$0xff]   ;;  %v2406_v52 = vld [vmem:[%s2765_s12 + $0x88] ss:$16 sps:$4 sm:$0xff]   ;;  %v2407_v53 = vld [vmem:[%s2765_s12 + $0xa4] ss:$16 sps:$4 sm:$0xff]  }
  0x69   : > { %1985 = vmatpush3.bf16.msra.mxu0 %v2363_v19  ;;  %v2409_v54 = vld [vmem:[%s2765_s12 + $0xac] ss:$16 sps:$4 sm:$0xff]   ;;  %v2411_v55 = vld [vmem:[%s2765_s12 + $0xa0] ss:$16 sps:$4 sm:$0xff]   ;;  %v2412_v56 = vld [vmem:[%s2765_s12 + $0xa8] ss:$16 sps:$4 sm:$0xff]  }
  0x6a   : > { %2097 = vmatpush3.bf16.msra.mxu1 %v2364_v20  ;;  %1986 = vmatprep.subr.bf16.mxu0 %v2365_v21  ;;  %v2413_v57 = vld [vmem:[%s2765_s12 + $0xc4] ss:$16 sps:$4 sm:$0xff]   ;;  %v2415_v58 = vld [vmem:[%s2765_s12 + $0xcc] ss:$16 sps:$4 sm:$0xff]   ;;  %v2417_v59 = vld [vmem:[%s2765_s12 + $0xc0] ss:$16 sps:$4 sm:$0xff]  }
  0x6b   : > { %2098 = vmatprep.subr.bf16.mxu1 %v2366_v22  ;;  %v2418_v60 = vld [vmem:[%s2765_s12 + $0xc8] ss:$16 sps:$4 sm:$0xff]   ;;  %v2419_v61 = vld [vmem:[%s2765_s12 + $0xe4] ss:$16 sps:$4 sm:$0xff]   ;;  %v2421_v62 = vld [vmem:[%s2765_s12 + $0xec] ss:$16 sps:$4 sm:$0xff]  }
  0x6c   : > { %v2423_v63 = vld [vmem:[%s2765_s12 + $0xe0] ss:$16 sps:$4 sm:$0xff]   ;;  %v2424_v0 = vld [vmem:[%s2765_s12 + $0xe8] ss:$16 sps:$4 sm:$0xff]   ;;  %v2425_v1 = vld [vmem:[%s2765_s12 + $0x104] ss:$16 sps:$4 sm:$0xff]  }
  0x6d   : > { %1987 = vmatpush3.bf16.msra.mxu0 %v2367_v23  ;;  %v2427_v2 = vld [vmem:[%s2765_s12 + $0x10c] ss:$16 sps:$4 sm:$0xff]   ;;  %v2429_v3 = vld [vmem:[%s2765_s12 + $0x100] ss:$16 sps:$4 sm:$0xff]   ;;  %v2430_v4 = vld [vmem:[%s2765_s12 + $0x108] ss:$16 sps:$4 sm:$0xff]  }
  0x6e   : > { %2099 = vmatpush3.bf16.msra.mxu1 %v2368_v24  ;;  %1988 = vmatprep.subr.bf16.mxu0 %v2369_v25  ;;  %v2431_v5 = vld [vmem:[%s2765_s12 + $0x124] ss:$16 sps:$4 sm:$0xff]   ;;  %v2433_v6 = vld [vmem:[%s2765_s12 + $0x12c] ss:$16 sps:$4 sm:$0xff]   ;;  %v2435_v7 = vld [vmem:[%s2765_s12 + $0x120] ss:$16 sps:$4 sm:$0xff]  }
  0x6f   : > { %2100 = vmatprep.subr.bf16.mxu1 %v2370_v26  ;;  %v2436_v8 = vld [vmem:[%s2765_s12 + $0x128] ss:$16 sps:$4 sm:$0xff]   ;;  %v2437_v9 = vld [vmem:[%s2765_s12 + $0x144] ss:$16 sps:$4 sm:$0xff]   ;;  %v2439_v10 = vld [vmem:[%s2765_s12 + $0x14c] ss:$16 sps:$4 sm:$0xff]  }
  0x70   : > { %v2441_v11 = vld [vmem:[%s2765_s12 + $0x140] ss:$16 sps:$4 sm:$0xff]   ;;  %v2442_v12 = vld [vmem:[%s2765_s12 + $0x148] ss:$16 sps:$4 sm:$0xff]   ;;  %v2443_v13 = vld [vmem:[%s2765_s12 + $0x164] ss:$16 sps:$4 sm:$0xff]  }
  0x71   : > { %1989 = vmatpush3.bf16.msra.mxu0 %v2371_v27  ;;  %v2445_v14 = vld [vmem:[%s2765_s12 + $0x16c] ss:$16 sps:$4 sm:$0xff]   ;;  %v2447_v15 = vld [vmem:[%s2765_s12 + $0x160] ss:$16 sps:$4 sm:$0xff]   ;;  %v2448_v16 = vld [vmem:[%s2765_s12 + $0x168] ss:$16 sps:$4 sm:$0xff]  }
  0x72   : > { %2101 = vmatpush3.bf16.msra.mxu1 %v2372_v28  ;;  %1990 = vmatprep.subr.bf16.mxu0 %v2373_v29  ;;  %v2449_v17 = vld [vmem:[%s2765_s12 + $0x184] ss:$16 sps:$4 sm:$0xff]   ;;  %v2451_v18 = vld [vmem:[%s2765_s12 + $0x18c] ss:$16 sps:$4 sm:$0xff]   ;;  %v2453_v19 = vld [vmem:[%s2765_s12 + $0x180] ss:$16 sps:$4 sm:$0xff]  }
  0x73   : > { %2102 = vmatprep.subr.bf16.mxu1 %v2374_v30  ;;  %v2454_v20 = vld [vmem:[%s2765_s12 + $0x188] ss:$16 sps:$4 sm:$0xff]   ;;  %v2455_v21 = vld [vmem:[%s2765_s12 + $0x1a4] ss:$16 sps:$4 sm:$0xff]   ;;  %v2457_v22 = vld [vmem:[%s2765_s12 + $0x1ac] ss:$16 sps:$4 sm:$0xff]  }
  0x74   : > { %v2459_v23 = vld [vmem:[%s2765_s12 + $0x1a0] ss:$16 sps:$4 sm:$0xff]   ;;  %v2460_v24 = vld [vmem:[%s2765_s12 + $0x1a8] ss:$16 sps:$4 sm:$0xff]   ;;  %v2461_v25 = vld [vmem:[%s2765_s12 + $0x1c4] ss:$16 sps:$4 sm:$0xff]  }
  0x75   : > { %1991 = vmatpush3.bf16.msra.mxu0 %v2375_v31  ;;  %v2463_v26 = vld [vmem:[%s2765_s12 + $0x1cc] ss:$16 sps:$4 sm:$0xff]   ;;  %v2465_v27 = vld [vmem:[%s2765_s12 + $0x1c0] ss:$16 sps:$4 sm:$0xff]   ;;  %v2466_v28 = vld [vmem:[%s2765_s12 + $0x1c8] ss:$16 sps:$4 sm:$0xff]  }
  0x76   : > { %2103 = vmatpush3.bf16.msra.mxu1 %v2376_v32  ;;  %v2467_v29 = vld [vmem:[%s2765_s12 + $0x1e4] ss:$16 sps:$4 sm:$0xff]   ;;  %v2469_v30 = vld [vmem:[%s2765_s12 + $0x1ec] ss:$16 sps:$4 sm:$0xff]   ;;  %v2471_v31 = vld [vmem:[%s2765_s12 + $0x1e0] ss:$16 sps:$4 sm:$0xff]  }
  0x77   : > { %v2472_v32 = vld [vmem:[%s2765_s12 + $0x1e8] ss:$16 sps:$4 sm:$0xff]  }
  0x78   : > { %1101 = vmatmul.mubr.bf16.vlgmr.msra.gmra.mrb[0].mxu0 %v2377_v33 }
  0x79   : > { %1262 = vmatmul.mubr.bf16.vlgmr.msra.gmra.mrb[0].mxu1 %v2380_v35  ;;  %1108 = vmatprep.mubr.bf16.mxu0 %v2383_v37 }
  0x7a   : > { %1269 = vmatprep.mubr.bf16.mxu1 %v2385_v38 }
  0x80   : > { %1109 = vmatmul.mubr.bf16.gmra.mrb[4].mxu0 %v2387_v39 }
  0x81   : > { %1270 = vmatmul.mubr.bf16.gmra.mrb[4].mxu1 %v2388_v40  ;;  %1116 = vmatprep.mubr.bf16.mxu0 %v2389_v41 }
  0x82   : > { %1277 = vmatprep.mubr.bf16.mxu1 %v2391_v42  ;;  %v396_v42 = vld [vmem:[#allocation2] sm:$0xff] }
  0x88   : > { %1117 = vmatmul.mubr.bf16.gmra.mrb[8].mxu0 %v2393_v43 }
  0x89   : > { %1278 = vmatmul.mubr.bf16.gmra.mrb[8].mxu1 %v2394_v44  ;;  %1124 = vmatprep.mubr.bf16.mxu0 %v2395_v45 }
  0x8a   : > { %1285 = vmatprep.mubr.bf16.mxu1 %v2397_v46 }
  0x90   : > { %1125 = vmatmul.mubr.bf16.gmra.mrb[12].mxu0 %v2399_v47  ;;  %v397_v47 = vld [vmem:[#allocation2 + $0x8] sm:$0xff] }
  0x91   : > { %1286 = vmatmul.mubr.bf16.gmra.mrb[12].mxu1 %v2400_v48  ;;  %1132 = vmatprep.mubr.bf16.mxu0 %v2401_v49 }
  0x92   : > { %1293 = vmatprep.mubr.bf16.mxu1 %v2403_v50 }
  0x98   : > { %1133 = vmatmul.mubr.bf16.gmra.mrb[16].mxu0 %v2405_v51 }
  0x99   : > { %1294 = vmatmul.mubr.bf16.gmra.mrb[16].mxu1 %v2406_v52  ;;  %1140 = vmatprep.mubr.bf16.mxu0 %v2407_v53 }
  0x9a   : > { %1301 = vmatprep.mubr.bf16.mxu1 %v2409_v54 }
  0xa0   : > { %1141 = vmatmul.mubr.bf16.gmra.mrb[20].mxu0 %v2411_v55 }
  0xa1   : > { %1302 = vmatmul.mubr.bf16.gmra.mrb[20].mxu1 %v2412_v56  ;;  %1148 = vmatprep.mubr.bf16.mxu0 %v2413_v57 }
  0xa2   : > { %1309 = vmatprep.mubr.bf16.mxu1 %v2415_v58 }
  0xa8   : > { %1149 = vmatmul.mubr.bf16.gmra.mrb[24].mxu0 %v2417_v59 }
  0xa9   : > { %1310 = vmatmul.mubr.bf16.gmra.mrb[24].mxu1 %v2418_v60  ;;  %1156 = vmatprep.mubr.bf16.mxu0 %v2419_v61  ;;  %v398_v60 = vld [vmem:[#allocation2 + $0x10] sm:$0xff] }
  0xaa   : > { %1317 = vmatprep.mubr.bf16.mxu1 %v2421_v62 }
  0xb0   : > { %1157 = vmatmul.mubr.bf16.gmra.mrb[28].mxu0 %v2423_v63 }
  0xb1   : > { %1318 = vmatmul.mubr.bf16.gmra.mrb[28].mxu1 %v2424_v0  ;;  %1164 = vmatprep.mubr.bf16.mxu0 %v2425_v1  ;;  %v399_v1 = vld [vmem:[#allocation2 + $0x18] sm:$0xff] }
  0xb2   : > { %1325 = vmatprep.mubr.bf16.mxu1 %v2427_v2 }
  0xb8   : > { %1165 = vmatmul.mubr.bf16.gmra.mrb[32].mxu0 %v2429_v3 }
  0xb9   : > { %1326 = vmatmul.mubr.bf16.gmra.mrb[32].mxu1 %v2430_v4  ;;  %1172 = vmatprep.mubr.bf16.mxu0 %v2431_v5 }
  0xba   : > { %1333 = vmatprep.mubr.bf16.mxu1 %v2433_v6 }
  0xc0   : > { %1173 = vmatmul.mubr.bf16.gmra.mrb[36].mxu0 %v2435_v7 }
  0xc1   : > { %1334 = vmatmul.mubr.bf16.gmra.mrb[36].mxu1 %v2436_v8  ;;  %1180 = vmatprep.mubr.bf16.mxu0 %v2437_v9 }
  0xc2   : > { %1341 = vmatprep.mubr.bf16.mxu1 %v2439_v10 }
  0xc8   : > { %1181 = vmatmul.mubr.bf16.gmra.mrb[40].mxu0 %v2441_v11 }
  0xc9   : > { %1342 = vmatmul.mubr.bf16.gmra.mrb[40].mxu1 %v2442_v12  ;;  %1188 = vmatprep.mubr.bf16.mxu0 %v2443_v13 }
  0xca   : > { %1349 = vmatprep.mubr.bf16.mxu1 %v2445_v14  ;;  %v400_v14 = vld [vmem:[#allocation2 + $0x20] sm:$0xff] }
  0xd0   : > { %1189 = vmatmul.mubr.bf16.gmra.mrb[44].mxu0 %v2447_v15 }
  0xd1   : > { %1350 = vmatmul.mubr.bf16.gmra.mrb[44].mxu1 %v2448_v16  ;;  %1196 = vmatprep.mubr.bf16.mxu0 %v2449_v17 }
  0xd2   : > { %1357 = vmatprep.mubr.bf16.mxu1 %v2451_v18 }
  0xd8   : > { %1197 = vmatmul.mubr.bf16.gmra.mrb[48].mxu0 %v2453_v19  ;;  %v401_v19 = vld [vmem:[#allocation2 + $0x28] sm:$0xff] }
  0xd9   : > { %1358 = vmatmul.mubr.bf16.gmra.mrb[48].mxu1 %v2454_v20  ;;  %1204 = vmatprep.mubr.bf16.mxu0 %v2455_v21 }
  0xda   : > { %1365 = vmatprep.mubr.bf16.mxu1 %v2457_v22 }
  0xe0   : > { %1205 = vmatmul.mubr.bf16.gmra.mrb[52].mxu0 %v2459_v23 }
  0xe1   : > { %1366 = vmatmul.mubr.bf16.gmra.mrb[52].mxu1 %v2460_v24  ;;  %1212 = vmatprep.mubr.bf16.mxu0 %v2461_v25 }
  0xe2   : > { %1373 = vmatprep.mubr.bf16.mxu1 %v2463_v26 }
  0xe8   : > { %1213 = vmatmul.mubr.bf16.gmra.mrb[56].mxu0 %v2465_v27 }
  0xe9   : > { %1374 = vmatmul.mubr.bf16.gmra.mrb[56].mxu1 %v2466_v28  ;;  %1220 = vmatprep.mubr.bf16.mxu0 %v2467_v29 }
  0xea   : > { %1381 = vmatprep.mubr.bf16.mxu1 %v2469_v30 }
  0xf0   : > { %1221 = vmatmul.mubr.bf16.gmra.mrb[60].mxu0 %v2471_v31 }
  0xf1   : > { %1382 = vmatmul.mubr.bf16.gmra.mrb[60].mxu1 %v2472_v32  ;;  %v402_v32 = vld [vmem:[#allocation2 + $0x30] sm:$0xff] }
 0x14b   : > { %v1992_v33 = vpop.f32.mrb[0].mxu0 }
 0x14c   : > { %v2104_v34 = vpop.f32.mrb[0].mxu1  ;;  %v1993_v35 = vpop.f32.mrb[1].mxu0 }
 0x14d   : > { %v1994_v36 = vadd.f32 %v1993_v35, %v1992_v33  ;;  %v2105_v37 = vpop.f32.mrb[1].mxu1  ;;  %v1995_v38 = vpop.f32.mrb[2].mxu0 }
 0x14e   : > { %v2106_v39 = vadd.f32 %v2105_v37, %v2104_v34  ;;  %v2107_v40 = vpop.f32.mrb[2].mxu1  ;;  %v1996_v41 = vpop.f32.mrb[3].mxu0  ;;  %v403_v37 = vld [vmem:[#allocation2 + $0x38] sm:$0xff] }
 0x14f   : > { %v1997_v43 = vadd.f32 %v1996_v41, %v1995_v38  ;;  %v2108_v44 = vpop.f32.mrb[3].mxu1 }
 0x150   : > { %v1264_v45 = vadd.f32 %v2106_v39, %v1994_v36  ;;  %v2109_v46 = vadd.f32 %v2108_v44, %v2107_v40 }
 0x152   : > { %v1390_v48 = vadd.f32 %v1264_v45, %v396_v42  ;;  %v1267_v49 = vadd.f32 %v2109_v46, %v1997_v43 }
 0x153   : > { %v1998_v50 = vpop.f32.mrb[4].mxu0 }
 0x154   : > { %1422 = vst [vmem:[#allocation2] sm:$0xff] %v1390_v48  ;;  %v1391_v51 = vadd.f32 %v1267_v49, %v397_v47  ;;  %v2110_v52 = vpop.f32.mrb[4].mxu1  ;;  %v1999_v53 = vpop.f32.mrb[5].mxu0 }
 0x155   : > { %v2000_v54 = vadd.f32 %v1999_v53, %v1998_v50  ;;  %v2111_v55 = vpop.f32.mrb[5].mxu1  ;;  %v2001_v56 = vpop.f32.mrb[6].mxu0  ;;  %v404_v50 = vld [vmem:[#allocation2 + $0x40] sm:$0xff] }
 0x156   : > { %1423 = vst [vmem:[#allocation2 + $0x8] sm:$0xff] %v1391_v51  ;;  %v2112_v57 = vadd.f32 %v2111_v55, %v2110_v52  ;;  %v2113_v58 = vpop.f32.mrb[6].mxu1  ;;  %v2002_v59 = vpop.f32.mrb[7].mxu0  ;;  %v405_v55 = vld [vmem:[#allocation2 + $0x48] sm:$0xff] }
 0x157   : > { %v2003_v61 = vadd.f32 %v2002_v59, %v2001_v56  ;;  %v2114_v62 = vpop.f32.mrb[7].mxu1 }
 0x158   : > { %v1272_v63 = vadd.f32 %v2112_v57, %v2000_v54  ;;  %v2115_v0 = vadd.f32 %v2114_v62, %v2113_v58 }
 0x15a   : > { %v1392_v2 = vadd.f32 %v1272_v63, %v398_v60  ;;  %v1275_v3 = vadd.f32 %v2115_v0, %v2003_v61 }
 0x15b   : > { %v2004_v4 = vpop.f32.mrb[8].mxu0 }
 0x15c   : > { %1424 = vst [vmem:[#allocation2 + $0x10] sm:$0xff] %v1392_v2  ;;  %v1393_v5 = vadd.f32 %v1275_v3, %v399_v1  ;;  %v2116_v6 = vpop.f32.mrb[8].mxu1  ;;  %v2005_v7 = vpop.f32.mrb[9].mxu0 }
 0x15d   : > { %v2006_v8 = vadd.f32 %v2005_v7, %v2004_v4  ;;  %v2117_v9 = vpop.f32.mrb[9].mxu1  ;;  %v2007_v10 = vpop.f32.mrb[10].mxu0  ;;  %v406_v4 = vld [vmem:[#allocation2 + $0x50] sm:$0xff] }
 0x15e   : > { %1425 = vst [vmem:[#allocation2 + $0x18] sm:$0xff] %v1393_v5  ;;  %v2118_v11 = vadd.f32 %v2117_v9, %v2116_v6  ;;  %v2119_v12 = vpop.f32.mrb[10].mxu1  ;;  %v2008_v13 = vpop.f32.mrb[11].mxu0  ;;  %v407_v9 = vld [vmem:[#allocation2 + $0x58] sm:$0xff] }
 0x15f   : > { %v2009_v15 = vadd.f32 %v2008_v13, %v2007_v10  ;;  %v2120_v16 = vpop.f32.mrb[11].mxu1 }
 0x160   : > { %v1280_v17 = vadd.f32 %v2118_v11, %v2006_v8  ;;  %v2121_v18 = vadd.f32 %v2120_v16, %v2119_v12 }
 0x162   : > { %v1394_v20 = vadd.f32 %v1280_v17, %v400_v14  ;;  %v1283_v21 = vadd.f32 %v2121_v18, %v2009_v15 }
 0x163   : > { %v2010_v22 = vpop.f32.mrb[12].mxu0 }
 0x164   : > { %1426 = vst [vmem:[#allocation2 + $0x20] sm:$0xff] %v1394_v20  ;;  %v1395_v23 = vadd.f32 %v1283_v21, %v401_v19  ;;  %v2122_v24 = vpop.f32.mrb[12].mxu1  ;;  %v2011_v25 = vpop.f32.mrb[13].mxu0 }
 0x165   : > { %v2012_v26 = vadd.f32 %v2011_v25, %v2010_v22  ;;  %v2123_v27 = vpop.f32.mrb[13].mxu1  ;;  %v2013_v28 = vpop.f32.mrb[14].mxu0  ;;  %v408_v22 = vld [vmem:[#allocation2 + $0x60] sm:$0xff] }
 0x166   : > { %1427 = vst [vmem:[#allocation2 + $0x28] sm:$0xff] %v1395_v23  ;;  %v2124_v29 = vadd.f32 %v2123_v27, %v2122_v24  ;;  %v2125_v30 = vpop.f32.mrb[14].mxu1  ;;  %v2014_v31 = vpop.f32.mrb[15].mxu0  ;;  %v409_v27 = vld [vmem:[#allocation2 + $0x68] sm:$0xff] }
 0x167   : > { %v2015_v33 = vadd.f32 %v2014_v31, %v2013_v28  ;;  %v2126_v34 = vpop.f32.mrb[15].mxu1 }
 0x168   : > { %v1288_v35 = vadd.f32 %v2124_v29, %v2012_v26  ;;  %v2127_v36 = vadd.f32 %v2126_v34, %v2125_v30 }
 0x16a   : > { %v1396_v38 = vadd.f32 %v1288_v35, %v402_v32  ;;  %v1291_v39 = vadd.f32 %v2127_v36, %v2015_v33 }
 0x16b   : > { %v2016_v40 = vpop.f32.mrb[16].mxu0 }
 0x16c   : > { %1428 = vst [vmem:[#allocation2 + $0x30] sm:$0xff] %v1396_v38  ;;  %v1397_v41 = vadd.f32 %v1291_v39, %v403_v37  ;;  %v2128_v42 = vpop.f32.mrb[16].mxu1  ;;  %v2017_v43 = vpop.f32.mrb[17].mxu0 }
 0x16d   : > { %v2018_v44 = vadd.f32 %v2017_v43, %v2016_v40  ;;  %v2129_v45 = vpop.f32.mrb[17].mxu1  ;;  %v2019_v46 = vpop.f32.mrb[18].mxu0  ;;  %v410_v40 = vld [vmem:[#allocation2 + $0x70] sm:$0xff] }
 0x16e   : > { %1429 = vst [vmem:[#allocation2 + $0x38] sm:$0xff] %v1397_v41  ;;  %v2130_v47 = vadd.f32 %v2129_v45, %v2128_v42  ;;  %v2131_v48 = vpop.f32.mrb[18].mxu1  ;;  %v2020_v49 = vpop.f32.mrb[19].mxu0  ;;  %v411_v45 = vld [vmem:[#allocation2 + $0x78] sm:$0xff] }
 0x16f   : > { %v2021_v51 = vadd.f32 %v2020_v49, %v2019_v46  ;;  %v2132_v52 = vpop.f32.mrb[19].mxu1 }
 0x170   : > { %v1296_v53 = vadd.f32 %v2130_v47, %v2018_v44  ;;  %v2133_v54 = vadd.f32 %v2132_v52, %v2131_v48 }
 0x172   : > { %v1398_v56 = vadd.f32 %v1296_v53, %v404_v50  ;;  %v1299_v57 = vadd.f32 %v2133_v54, %v2021_v51 }
 0x173   : > { %v2022_v58 = vpop.f32.mrb[20].mxu0 }
 0x174   : > { %1430 = vst [vmem:[#allocation2 + $0x40] sm:$0xff] %v1398_v56  ;;  %v1399_v59 = vadd.f32 %v1299_v57, %v405_v55  ;;  %v2134_v60 = vpop.f32.mrb[20].mxu1  ;;  %v2023_v61 = vpop.f32.mrb[21].mxu0 }
 0x175   : > { %v2024_v62 = vadd.f32 %v2023_v61, %v2022_v58  ;;  %v2135_v63 = vpop.f32.mrb[21].mxu1  ;;  %v2025_v0 = vpop.f32.mrb[22].mxu0  ;;  %v412_v58 = vld [vmem:[#allocation2 + $0x80] sm:$0xff] }
 0x176   : > { %1431 = vst [vmem:[#allocation2 + $0x48] sm:$0xff] %v1399_v59  ;;  %v2136_v1 = vadd.f32 %v2135_v63, %v2134_v60  ;;  %v2137_v2 = vpop.f32.mrb[22].mxu1  ;;  %v2026_v3 = vpop.f32.mrb[23].mxu0  ;;  %v413_v63 = vld [vmem:[#allocation2 + $0x88] sm:$0xff] }
 0x177   : > { %v2027_v5 = vadd.f32 %v2026_v3, %v2025_v0  ;;  %v2138_v6 = vpop.f32.mrb[23].mxu1 }
 0x178   : > { %v1304_v7 = vadd.f32 %v2136_v1, %v2024_v62  ;;  %v2139_v8 = vadd.f32 %v2138_v6, %v2137_v2 }
 0x17a   : > { %v1400_v10 = vadd.f32 %v1304_v7, %v406_v4  ;;  %v1307_v11 = vadd.f32 %v2139_v8, %v2027_v5 }
 0x17b   : > { %v2028_v12 = vpop.f32.mrb[24].mxu0 }
 0x17c   : > { %1432 = vst [vmem:[#allocation2 + $0x50] sm:$0xff] %v1400_v10  ;;  %v1401_v13 = vadd.f32 %v1307_v11, %v407_v9  ;;  %v2140_v14 = vpop.f32.mrb[24].mxu1  ;;  %v2029_v15 = vpop.f32.mrb[25].mxu0 }
 0x17d   : > { %v2030_v16 = vadd.f32 %v2029_v15, %v2028_v12  ;;  %v2141_v17 = vpop.f32.mrb[25].mxu1  ;;  %v2031_v18 = vpop.f32.mrb[26].mxu0  ;;  %v414_v12 = vld [vmem:[#allocation2 + $0x90] sm:$0xff] }
 0x17e   : > { %1433 = vst [vmem:[#allocation2 + $0x58] sm:$0xff] %v1401_v13  ;;  %v2142_v19 = vadd.f32 %v2141_v17, %v2140_v14  ;;  %v2143_v20 = vpop.f32.mrb[26].mxu1  ;;  %v2032_v21 = vpop.f32.mrb[27].mxu0  ;;  %v415_v17 = vld [vmem:[#allocation2 + $0x98] sm:$0xff] }
 0x17f   : > { %v2033_v23 = vadd.f32 %v2032_v21, %v2031_v18  ;;  %v2144_v24 = vpop.f32.mrb[27].mxu1 }
 0x180   : > { %v1312_v25 = vadd.f32 %v2142_v19, %v2030_v16  ;;  %v2145_v26 = vadd.f32 %v2144_v24, %v2143_v20 }
 0x182   : > { %v1402_v28 = vadd.f32 %v1312_v25, %v408_v22  ;;  %v1315_v29 = vadd.f32 %v2145_v26, %v2033_v23 }
 0x183   : > { %v2034_v30 = vpop.f32.mrb[28].mxu0 }
 0x184   : > { %1434 = vst [vmem:[#allocation2 + $0x60] sm:$0xff] %v1402_v28  ;;  %v1403_v31 = vadd.f32 %v1315_v29, %v409_v27  ;;  %v2146_v32 = vpop.f32.mrb[28].mxu1  ;;  %v2035_v33 = vpop.f32.mrb[29].mxu0 }
 0x185   : > { %v2036_v34 = vadd.f32 %v2035_v33, %v2034_v30  ;;  %v2147_v35 = vpop.f32.mrb[29].mxu1  ;;  %v2037_v36 = vpop.f32.mrb[30].mxu0  ;;  %v416_v30 = vld [vmem:[#allocation2 + $0xa0] sm:$0xff] }
 0x186   : > { %1435 = vst [vmem:[#allocation2 + $0x68] sm:$0xff] %v1403_v31  ;;  %v2148_v37 = vadd.f32 %v2147_v35, %v2146_v32  ;;  %v2149_v38 = vpop.f32.mrb[30].mxu1  ;;  %v2038_v39 = vpop.f32.mrb[31].mxu0  ;;  %v417_v35 = vld [vmem:[#allocation2 + $0xa8] sm:$0xff] }
 0x187   : > { %v2039_v41 = vadd.f32 %v2038_v39, %v2037_v36  ;;  %v2150_v42 = vpop.f32.mrb[31].mxu1 }
 0x188   : > { %v1320_v43 = vadd.f32 %v2148_v37, %v2036_v34  ;;  %v2151_v44 = vadd.f32 %v2150_v42, %v2149_v38 }
 0x18a   : > { %v1404_v46 = vadd.f32 %v1320_v43, %v410_v40  ;;  %v1323_v47 = vadd.f32 %v2151_v44, %v2039_v41 }
 0x18b   : > { %v2040_v48 = vpop.f32.mrb[32].mxu0 }
 0x18c   : > { %1436 = vst [vmem:[#allocation2 + $0x70] sm:$0xff] %v1404_v46  ;;  %v1405_v49 = vadd.f32 %v1323_v47, %v411_v45  ;;  %v2152_v50 = vpop.f32.mrb[32].mxu1  ;;  %v2041_v51 = vpop.f32.mrb[33].mxu0 }
 0x18d   : > { %v2042_v52 = vadd.f32 %v2041_v51, %v2040_v48  ;;  %v2153_v53 = vpop.f32.mrb[33].mxu1  ;;  %v2043_v54 = vpop.f32.mrb[34].mxu0  ;;  %v418_v48 = vld [vmem:[#allocation2 + $0xb0] sm:$0xff] }
 0x18e   : > { %1437 = vst [vmem:[#allocation2 + $0x78] sm:$0xff] %v1405_v49  ;;  %v2154_v55 = vadd.f32 %v2153_v53, %v2152_v50  ;;  %v2155_v56 = vpop.f32.mrb[34].mxu1  ;;  %v2044_v57 = vpop.f32.mrb[35].mxu0  ;;  %v419_v53 = vld [vmem:[#allocation2 + $0xb8] sm:$0xff] }
 0x18f   : > { %v2045_v59 = vadd.f32 %v2044_v57, %v2043_v54  ;;  %v2156_v60 = vpop.f32.mrb[35].mxu1 }
 0x190   : > { %v1328_v61 = vadd.f32 %v2154_v55, %v2042_v52  ;;  %v2157_v62 = vadd.f32 %v2156_v60, %v2155_v56 }
 0x192   : > { %v1406_v0 = vadd.f32 %v1328_v61, %v412_v58  ;;  %v1331_v1 = vadd.f32 %v2157_v62, %v2045_v59 }
 0x193   : > { %v2046_v2 = vpop.f32.mrb[36].mxu0 }
 0x194   : > { %1438 = vst [vmem:[#allocation2 + $0x80] sm:$0xff] %v1406_v0  ;;  %v1407_v3 = vadd.f32 %v1331_v1, %v413_v63  ;;  %v2158_v4 = vpop.f32.mrb[36].mxu1  ;;  %v2047_v5 = vpop.f32.mrb[37].mxu0 }
 0x195   : > { %v2048_v6 = vadd.f32 %v2047_v5, %v2046_v2  ;;  %v2159_v7 = vpop.f32.mrb[37].mxu1  ;;  %v2049_v8 = vpop.f32.mrb[38].mxu0  ;;  %v420_v2 = vld [vmem:[#allocation2 + $0xc0] sm:$0xff] }
 0x196   : > { %1439 = vst [vmem:[#allocation2 + $0x88] sm:$0xff] %v1407_v3  ;;  %v2160_v9 = vadd.f32 %v2159_v7, %v2158_v4  ;;  %v2161_v10 = vpop.f32.mrb[38].mxu1  ;;  %v2050_v11 = vpop.f32.mrb[39].mxu0  ;;  %v421_v7 = vld [vmem:[#allocation2 + $0xc8] sm:$0xff] }
 0x197   : > { %v2051_v13 = vadd.f32 %v2050_v11, %v2049_v8  ;;  %v2162_v14 = vpop.f32.mrb[39].mxu1 }
 0x198   : > { %v1336_v15 = vadd.f32 %v2160_v9, %v2048_v6  ;;  %v2163_v16 = vadd.f32 %v2162_v14, %v2161_v10 }
 0x19a   : > { %v1408_v18 = vadd.f32 %v1336_v15, %v414_v12  ;;  %v1339_v19 = vadd.f32 %v2163_v16, %v2051_v13 }
 0x19b   : > { %v2052_v20 = vpop.f32.mrb[40].mxu0 }
 0x19c   : > { %1440 = vst [vmem:[#allocation2 + $0x90] sm:$0xff] %v1408_v18  ;;  %v1409_v21 = vadd.f32 %v1339_v19, %v415_v17  ;;  %v2164_v22 = vpop.f32.mrb[40].mxu1  ;;  %v2053_v23 = vpop.f32.mrb[41].mxu0 }
 0x19d   : > { %v2054_v24 = vadd.f32 %v2053_v23, %v2052_v20  ;;  %v2165_v25 = vpop.f32.mrb[41].mxu1  ;;  %v2055_v26 = vpop.f32.mrb[42].mxu0  ;;  %v422_v20 = vld [vmem:[#allocation2 + $0xd0] sm:$0xff] }
 0x19e   : > { %1441 = vst [vmem:[#allocation2 + $0x98] sm:$0xff] %v1409_v21  ;;  %v2166_v27 = vadd.f32 %v2165_v25, %v2164_v22  ;;  %v2167_v28 = vpop.f32.mrb[42].mxu1  ;;  %v2056_v29 = vpop.f32.mrb[43].mxu0  ;;  %v423_v25 = vld [vmem:[#allocation2 + $0xd8] sm:$0xff] }
 0x19f   : > { %v2057_v31 = vadd.f32 %v2056_v29, %v2055_v26  ;;  %v2168_v32 = vpop.f32.mrb[43].mxu1 }
 0x1a0   : > { %v1344_v33 = vadd.f32 %v2166_v27, %v2054_v24  ;;  %v2169_v34 = vadd.f32 %v2168_v32, %v2167_v28 }
 0x1a2   : > { %v1410_v36 = vadd.f32 %v1344_v33, %v416_v30  ;;  %v1347_v37 = vadd.f32 %v2169_v34, %v2057_v31 }
 0x1a3   : > { %v2058_v38 = vpop.f32.mrb[44].mxu0 }
 0x1a4   : > { %1442 = vst [vmem:[#allocation2 + $0xa0] sm:$0xff] %v1410_v36  ;;  %v1411_v39 = vadd.f32 %v1347_v37, %v417_v35  ;;  %v2170_v40 = vpop.f32.mrb[44].mxu1  ;;  %v2059_v41 = vpop.f32.mrb[45].mxu0 }
 0x1a5   : > { %v2060_v42 = vadd.f32 %v2059_v41, %v2058_v38  ;;  %v2171_v43 = vpop.f32.mrb[45].mxu1  ;;  %v2061_v44 = vpop.f32.mrb[46].mxu0  ;;  %v424_v38 = vld [vmem:[#allocation2 + $0xe0] sm:$0xff] }
 0x1a6   : > { %1443 = vst [vmem:[#allocation2 + $0xa8] sm:$0xff] %v1411_v39  ;;  %v2172_v45 = vadd.f32 %v2171_v43, %v2170_v40  ;;  %v2173_v46 = vpop.f32.mrb[46].mxu1  ;;  %v2062_v47 = vpop.f32.mrb[47].mxu0  ;;  %v425_v43 = vld [vmem:[#allocation2 + $0xe8] sm:$0xff] }
 0x1a7   : > { %v2063_v49 = vadd.f32 %v2062_v47, %v2061_v44  ;;  %v2174_v50 = vpop.f32.mrb[47].mxu1 }
 0x1a8   : > { %v1352_v51 = vadd.f32 %v2172_v45, %v2060_v42  ;;  %v2175_v52 = vadd.f32 %v2174_v50, %v2173_v46 }
 0x1aa   : > { %v1412_v54 = vadd.f32 %v1352_v51, %v418_v48  ;;  %v1355_v55 = vadd.f32 %v2175_v52, %v2063_v49 }
 0x1ab   : > { %v2064_v56 = vpop.f32.mrb[48].mxu0 }
 0x1ac   : > { %1444 = vst [vmem:[#allocation2 + $0xb0] sm:$0xff] %v1412_v54  ;;  %v1413_v57 = vadd.f32 %v1355_v55, %v419_v53  ;;  %v2176_v58 = vpop.f32.mrb[48].mxu1  ;;  %v2065_v59 = vpop.f32.mrb[49].mxu0 }
 0x1ad   : > { %v2066_v60 = vadd.f32 %v2065_v59, %v2064_v56  ;;  %v2177_v61 = vpop.f32.mrb[49].mxu1  ;;  %v2067_v62 = vpop.f32.mrb[50].mxu0  ;;  %v426_v56 = vld [vmem:[#allocation2 + $0xf0] sm:$0xff] }
 0x1ae   : > { %1445 = vst [vmem:[#allocation2 + $0xb8] sm:$0xff] %v1413_v57  ;;  %v2178_v63 = vadd.f32 %v2177_v61, %v2176_v58  ;;  %v2179_v0 = vpop.f32.mrb[50].mxu1  ;;  %v2068_v1 = vpop.f32.mrb[51].mxu0  ;;  %v427_v61 = vld [vmem:[#allocation2 + $0xf8] sm:$0xff] }
 0x1af   : > { %v2069_v3 = vadd.f32 %v2068_v1, %v2067_v62  ;;  %v2180_v4 = vpop.f32.mrb[51].mxu1  ;;  %v2473_v1 = vld [vmem:[%s2944_s2] sm:$0xff] (!%p1964_p13)  }
 0x1b0   : > { %v1360_v5 = vadd.f32 %v2178_v63, %v2066_v60  ;;  %v2181_v6 = vadd.f32 %v2180_v4, %v2179_v0  ;;  %2224 = vmatprep.subr.bf16.mxu0 (!%p1964_p13), %v2473_v1  ;;  %2272 = vmatprep.subr.bf16.mxu1 (!%p1964_p13), %v2473_v1  ;;  %v2476_v4 = vld [vmem:[%s2944_s2 + $0x18] sm:$0xff] (!%p1964_p13)  }
 0x1b1   : > { %2225 = vmatpush3.bf16.msra.mxu0 (!%p1964_p13), %v2473_v1  ;;  %2280 = vmatpush3.bf16.msra.mxu1 (!%p1964_p13), %v2473_v1 }
 0x1b2   : > { %v1414_v8 = vadd.f32 %v1360_v5, %v420_v2  ;;  %v1363_v9 = vadd.f32 %v2181_v6, %v2069_v3  ;;  %v2474_v2 = vld [vmem:[%s2944_s2 + $0x8] sm:$0xff] (!%p1964_p13)   ;;  %v2475_v3 = vld [vmem:[%s2944_s2 + $0x10] sm:$0xff] (!%p1964_p13)   ;;  %v1458_v5 = vld [vmem:[#allocation2] sm:$0xff] (!%p1964_p13) }
 0x1b3   : > { %v2070_v10 = vpop.f32.mrb[52].mxu0  ;;  %2226 = vmatprep.subr.bf16.mxu0 (!%p1964_p13), %v2474_v2  ;;  %2273 = vmatprep.subr.bf16.mxu1 (!%p1964_p13), %v2474_v2  ;;  %v1459_v6 = vld [vmem:[#allocation2 + $0x8] sm:$0xff] (!%p1964_p13) }
 0x1b4   : > { %1446 = vst [vmem:[#allocation2 + $0xc0] sm:$0xff] %v1414_v8  ;;  %v1415_v11 = vadd.f32 %v1363_v9, %v421_v7  ;;  %v2182_v12 = vpop.f32.mrb[52].mxu1  ;;  %v2071_v13 = vpop.f32.mrb[53].mxu0  ;;  %v1474_v7 = vld [vmem:[#allocation2 + $0x80] sm:$0xff] (!%p1964_p13)  ;;  %v1490_v8 = vpack.c.bf16 (!%p1964_p13), %v1459_v6, %v1458_v5  ;;  %v1475_v9 = vld [vmem:[#allocation2 + $0x88] sm:$0xff] (!%p1964_p13) }
 0x1b5   : > { %v2072_v14 = vadd.f32 %v2071_v13, %v2070_v10  ;;  %v2183_v15 = vpop.f32.mrb[53].mxu1  ;;  %v2073_v16 = vpop.f32.mrb[54].mxu0  ;;  %2227 = vmatpush3.bf16.msra.mxu0 (!%p1964_p13), %v2474_v2  ;;  %2281 = vmatpush3.bf16.msra.mxu1 (!%p1964_p13), %v2474_v2  ;;  %v1498_v10 = vpack.c.bf16 (!%p1964_p13), %v1475_v9, %v1474_v7  ;;  %v2479_v13 = vld [vmem:[%s2944_s2 + $0x30] sm:$0xff] (!%p1964_p13)  }
 0x1b6   : > { %1447 = vst [vmem:[#allocation2 + $0xc8] sm:$0xff] %v1415_v11  ;;  %v2184_v17 = vadd.f32 %v2183_v15, %v2182_v12  ;;  %v2185_v18 = vpop.f32.mrb[54].mxu1  ;;  %v2074_v19 = vpop.f32.mrb[55].mxu0  ;;  %2228 = vmatprep.subr.bf16.mxu0 (!%p1964_p13), %v2475_v3  ;;  %2274 = vmatprep.subr.bf16.mxu1 (!%p1964_p13), %v2475_v3  ;;  %v2477_v11 = vld [vmem:[%s2944_s2 + $0x20] sm:$0xff] (!%p1964_p13)   ;;  %v2478_v12 = vld [vmem:[%s2944_s2 + $0x28] sm:$0xff] (!%p1964_p13)   ;;  %v1460_v15 = vld [vmem:[#allocation2 + $0x10] sm:$0xff] (!%p1964_p13) }
 0x1b7   : > { %v2075_v21 = vadd.f32 %v2074_v19, %v2073_v16  ;;  %v2186_v22 = vpop.f32.mrb[55].mxu1  ;;  %2240 = vmatprep.mubr.bf16.mxu0 (!%p1964_p13), %v1490_v8  ;;  %2256 = vmatprep.mubr.bf16.mxu1 (!%p1964_p13), %v1498_v10  ;;  %v1461_v16 = vld [vmem:[#allocation2 + $0x18] sm:$0xff] (!%p1964_p13)  ;;  %v1462_v19 = vld [vmem:[#allocation2 + $0x20] sm:$0xff] (!%p1964_p13) }
 0x1b8   : > { %v1368_v23 = vadd.f32 %v2184_v17, %v2072_v14  ;;  %v2187_v24 = vadd.f32 %v2186_v22, %v2185_v18  ;;  %v2480_v14 = vld [vmem:[%s2944_s2 + $0x38] sm:$0xff] (!%p1964_p13)   ;;  %v1476_v17 = vld [vmem:[#allocation2 + $0x90] sm:$0xff] (!%p1964_p13)  ;;  %v1479_v22 = vld [vmem:[#allocation2 + $0xa8] sm:$0xff] (!%p1964_p13) }
 0x1b9   : > { %2229 = vmatpush3.bf16.msra.mxu0 (!%p1964_p13), %v2475_v3  ;;  %2282 = vmatpush3.bf16.msra.mxu1 (!%p1964_p13), %v2475_v3  ;;  %v1477_v18 = vld [vmem:[#allocation2 + $0x98] sm:$0xff] (!%p1964_p13) }
 0x1ba   : > { %v1416_v26 = vadd.f32 %v1368_v23, %v422_v20  ;;  %v1371_v27 = vadd.f32 %v2187_v24, %v2075_v21  ;;  %2230 = vmatprep.subr.bf16.mxu0 (!%p1964_p13), %v2476_v4  ;;  %2275 = vmatprep.subr.bf16.mxu1 (!%p1964_p13), %v2476_v4  ;;  %v1463_v20 = vld [vmem:[#allocation2 + $0x28] sm:$0xff] (!%p1964_p13)  ;;  %v1478_v21 = vld [vmem:[#allocation2 + $0xa0] sm:$0xff] (!%p1964_p13)  ;;  %v1491_v23 = vpack.c.bf16 (!%p1964_p13), %v1461_v16, %v1460_v15 }
 0x1bb   : > { %v2076_v28 = vpop.f32.mrb[56].mxu0  ;;  %v1499_v24 = vpack.c.bf16 (!%p1964_p13), %v1477_v18, %v1476_v17 }
 0x1bc   : > { %1448 = vst [vmem:[#allocation2 + $0xd0] sm:$0xff] %v1416_v26  ;;  %v1417_v29 = vadd.f32 %v1371_v27, %v423_v25  ;;  %v2188_v30 = vpop.f32.mrb[56].mxu1  ;;  %v2077_v31 = vpop.f32.mrb[57].mxu0  ;;  %v1492_v25 = vpack.c.bf16 (!%p1964_p13), %v1463_v20, %v1462_v19  ;;  %v1500_v26 = vpack.c.bf16 (!%p1964_p13), %v1479_v22, %v1478_v21  ;;  %v1464_v27 = vld [vmem:[#allocation2 + $0x30] sm:$0xff] (!%p1964_p13) }
 0x1bd   : > { %v2078_v32 = vadd.f32 %v2077_v31, %v2076_v28  ;;  %v2189_v33 = vpop.f32.mrb[57].mxu1  ;;  %v2079_v34 = vpop.f32.mrb[58].mxu0  ;;  %2231 = vmatpush3.bf16.msra.mxu0 (!%p1964_p13), %v2476_v4  ;;  %2283 = vmatpush3.bf16.msra.mxu1 (!%p1964_p13), %v2476_v4  ;;  %v1465_v28 = vld [vmem:[#allocation2 + $0x38] sm:$0xff] (!%p1964_p13)  ;;  %v1466_v31 = vld [vmem:[#allocation2 + $0x40] sm:$0xff] (!%p1964_p13) }
 0x1be   : > { %1449 = vst [vmem:[#allocation2 + $0xd8] sm:$0xff] %v1417_v29  ;;  %v2190_v35 = vadd.f32 %v2189_v33, %v2188_v30  ;;  %v2191_v36 = vpop.f32.mrb[58].mxu1  ;;  %v2080_v37 = vpop.f32.mrb[59].mxu0  ;;  %2232 = vmatprep.subr.bf16.mxu0 (!%p1964_p13), %v2477_v11  ;;  %2276 = vmatprep.subr.bf16.mxu1 (!%p1964_p13), %v2477_v11  ;;  %v1480_v29 = vld [vmem:[#allocation2 + $0xb0] sm:$0xff] (!%p1964_p13)  ;;  %v1481_v30 = vld [vmem:[#allocation2 + $0xb8] sm:$0xff] (!%p1964_p13)  ;;  %v1482_v33 = vld [vmem:[#allocation2 + $0xc0] sm:$0xff] (!%p1964_p13) }
 0x1bf   : > { %v2081_v39 = vadd.f32 %v2080_v37, %v2079_v34  ;;  %v2192_v40 = vpop.f32.mrb[59].mxu1  ;;  %v1483_v34 = vld [vmem:[#allocation2 + $0xc8] sm:$0xff] (!%p1964_p13) }
 0x1c0   : > { %v1376_v41 = vadd.f32 %v2190_v35, %v2078_v32  ;;  %v2193_v42 = vadd.f32 %v2192_v40, %v2191_v36  ;;  %v1467_v32 = vld [vmem:[#allocation2 + $0x48] sm:$0xff] (!%p1964_p13)  ;;  %v1493_v35 = vpack.c.bf16 (!%p1964_p13), %v1465_v28, %v1464_v27  ;;  %v1501_v36 = vpack.c.bf16 (!%p1964_p13), %v1481_v30, %v1480_v29  ;;  %v1469_v40 = vld [vmem:[#allocation2 + $0x58] sm:$0xff] (!%p1964_p13) }
 0x1c1   : > { %2233 = vmatpush3.bf16.msra.mxu0 (!%p1964_p13), %v2477_v11  ;;  %2284 = vmatpush3.bf16.msra.mxu1 (!%p1964_p13), %v2477_v11  ;;  %v1494_v37 = vpack.c.bf16 (!%p1964_p13), %v1467_v32, %v1466_v31 }
 0x1c2   : > { %v1418_v44 = vadd.f32 %v1376_v41, %v424_v38  ;;  %v1379_v45 = vadd.f32 %v2193_v42, %v2081_v39  ;;  %2234 = vmatprep.subr.bf16.mxu0 (!%p1964_p13), %v2478_v12  ;;  %2277 = vmatprep.subr.bf16.mxu1 (!%p1964_p13), %v2478_v12  ;;  %v1502_v38 = vpack.c.bf16 (!%p1964_p13), %v1483_v34, %v1482_v33  ;;  %v1468_v39 = vld [vmem:[#allocation2 + $0x50] sm:$0xff] (!%p1964_p13) }
 0x1c3   : > { %v2082_v46 = vpop.f32.mrb[60].mxu0  ;;  %v1484_v41 = vld [vmem:[#allocation2 + $0xd0] sm:$0xff] (!%p1964_p13) }
 0x1c4   : > { %1450 = vst [vmem:[#allocation2 + $0xe0] sm:$0xff] %v1418_v44  ;;  %v1419_v47 = vadd.f32 %v1379_v45, %v425_v43  ;;  %v2194_v48 = vpop.f32.mrb[60].mxu1  ;;  %v2083_v49 = vpop.f32.mrb[61].mxu0  ;;  %v1470_v43 = vld [vmem:[#allocation2 + $0x60] sm:$0xff] (!%p1964_p13)  ;;  %v1471_v44 = vld [vmem:[#allocation2 + $0x68] sm:$0xff] (!%p1964_p13) }
 0x1c5   : > { %v2084_v50 = vadd.f32 %v2083_v49, %v2082_v46  ;;  %v2195_v51 = vpop.f32.mrb[61].mxu1  ;;  %v2085_v52 = vpop.f32.mrb[62].mxu0  ;;  %2235 = vmatpush3.bf16.msra.mxu0 (!%p1964_p13), %v2478_v12  ;;  %2285 = vmatpush3.bf16.msra.mxu1 (!%p1964_p13), %v2478_v12  ;;  %v1485_v42 = vld [vmem:[#allocation2 + $0xd8] sm:$0xff] (!%p1964_p13)  ;;  %v1496_v49 = vpack.c.bf16 (!%p1964_p13), %v1471_v44, %v1470_v43 }
 0x1c6   : > { %1451 = vst [vmem:[#allocation2 + $0xe8] sm:$0xff] %v1419_v47  ;;  %v2196_v53 = vadd.f32 %v2195_v51, %v2194_v48  ;;  %v2197_v54 = vpop.f32.mrb[62].mxu1  ;;  %v2086_v55 = vpop.f32.mrb[63].mxu0  ;;  %2236 = vmatprep.subr.bf16.mxu0 (!%p1964_p13), %v2479_v13  ;;  %2278 = vmatprep.subr.bf16.mxu1 (!%p1964_p13), %v2479_v13  ;;  %v1495_v47 = vpack.c.bf16 (!%p1964_p13), %v1469_v40, %v1468_v39  ;;  %v1472_v51 = vld [vmem:[#allocation2 + $0x70] sm:$0xff] (!%p1964_p13) }
 0x1c7   : > { %v2087_v57 = vadd.f32 %v2086_v55, %v2085_v52  ;;  %v2198_v58 = vpop.f32.mrb[63].mxu1  ;;  %v1503_v48 = vpack.c.bf16 (!%p1964_p13), %v1485_v42, %v1484_v41  ;;  %v1473_v52 = vld [vmem:[#allocation2 + $0x78] sm:$0xff] (!%p1964_p13) }
 0x1c8   : > { %v1384_v59 = vadd.f32 %v2196_v53, %v2084_v50  ;;  %v2199_v60 = vadd.f32 %v2198_v58, %v2197_v54  ;;  %1457 = sbr.rel (%p1964_p13) target bundleno = 704 (0x2c0), region = 63  ;;  %v1497_v55 = vpack.c.bf16 (!%p1964_p13), %v1473_v52, %v1472_v51 }
 0x1c9   : > { %2237 = vmatpush3.bf16.msra.mxu0 (!%p1964_p13), %v2479_v13  ;;  %2286 = vmatpush3.bf16.msra.mxu1 (!%p1964_p13), %v2479_v13 }
 0x1ca   : > { %v1420_v62 = vadd.f32 %v1384_v59, %v426_v56  ;;  %v1387_v63 = vadd.f32 %v2199_v60, %v2087_v57  ;;  %2238 = vmatprep.subr.bf16.mxu0 (!%p1964_p13), %v2480_v14  ;;  %2279 = vmatprep.subr.bf16.mxu1 (!%p1964_p13), %v2480_v14 }
 0x1cb   : > { %v1486_v45 = vld [vmem:[#allocation2 + $0xe0] sm:$0xff] (!%p1964_p13) }
 0x1cc   : > { %1452 = vst [vmem:[#allocation2 + $0xf0] sm:$0xff] %v1420_v62  ;;  %v1421_v0 = vadd.f32 %v1387_v63, %v427_v61 }
 0x1cd   : > { %2239 = vmatpush3.bf16.msra.mxu0 (!%p1964_p13), %v2480_v14  ;;  %2287 = vmatpush3.bf16.msra.mxu1 (!%p1964_p13), %v2480_v14  ;;  %v1487_v46 = vld [vmem:[#allocation2 + $0xe8] sm:$0xff] (!%p1964_p13) }
 0x1ce   : > { %1453 = vst [vmem:[#allocation2 + $0xf8] sm:$0xff] %v1421_v0  ;;  %v1504_v50 = vpack.c.bf16 (!%p1964_p13), %v1487_v46, %v1486_v45 }
 0x1d0   : > { %2241 = vmatmul.mubr.bf16.vlgmr.msra.gmra.mrb[0].mxu0 %v1491_v23  ;;  %2257 = vmatmul.mubr.bf16.vlgmr.msra.gmra.mrb[0].mxu1 %v1499_v24 }
 0x1d1   : > { %2244 = vmatprep.mubr.bf16.mxu0 %v1492_v25  ;;  %2260 = vmatprep.mubr.bf16.mxu1 %v1500_v26 }
 0x1d3   : > { %v1488_v53 = vld [vmem:[#allocation2 + $0xf0] sm:$0xff] }
 0x1d5   : > { %v1489_v54 = vld [vmem:[#allocation2 + $0xf8] sm:$0xff] }
 0x1d6   : > { %v1505_v56 = vpack.c.bf16 %v1489_v54, %v1488_v53 }
 0x1d8   : > { %2245 = vmatmul.mubr.bf16.gmra.mrb[4].mxu0 %v1493_v35  ;;  %2261 = vmatmul.mubr.bf16.gmra.mrb[4].mxu1 %v1501_v36 }
 0x1d9   : > { %2248 = vmatprep.mubr.bf16.mxu0 %v1494_v37  ;;  %2264 = vmatprep.mubr.bf16.mxu1 %v1502_v38 }
 0x1e0   : > { %2249 = vmatmul.mubr.bf16.gmra.mrb[8].mxu0 %v1495_v47  ;;  %2265 = vmatmul.mubr.bf16.gmra.mrb[8].mxu1 %v1503_v48 }
 0x1e1   : > { %2252 = vmatprep.mubr.bf16.mxu0 %v1496_v49  ;;  %2268 = vmatprep.mubr.bf16.mxu1 %v1504_v50 }
 0x1e8   : > { %2253 = vmatmul.mubr.bf16.gmra.mrb[12].mxu0 %v1497_v55  ;;  %2269 = vmatmul.mubr.bf16.gmra.mrb[12].mxu1 %v1505_v56 }
 0x2a3   : > { %v2242_v57 = vpop.f32.mrb[0].mxu0  ;;  %v2258_v58 = vpop.f32.mrb[0].mxu1 }
 0x2a4   : > { %1733 = vst [vmem:[%s2763_s30 + $0x10] sm:$0xff] %v2242_v57  ;;  %1749 = vst [vmem:[%s2763_s30 + $0x90] sm:$0xff] %v2258_v58  ;;  %v1604_v59 = vpop.f32.mrb[1].mxu0  ;;  %v1668_v60 = vpop.f32.mrb[1].mxu1 }
 0x2a5   : > { %1731 = vst [vmem:[%s2763_s30] sm:$0xff] %v1604_v59  ;;  %1747 = vst [vmem:[%s2763_s30 + $0x80] sm:$0xff] %v1668_v60  ;;  %v2243_v61 = vpop.f32.mrb[2].mxu0  ;;  %v2259_v62 = vpop.f32.mrb[2].mxu1 }
 0x2a6   : > { %1734 = vst [vmem:[%s2763_s30 + $0x18] sm:$0xff] %v2243_v61  ;;  %1750 = vst [vmem:[%s2763_s30 + $0x98] sm:$0xff] %v2259_v62  ;;  %v1607_v63 = vpop.f32.mrb[3].mxu0  ;;  %v1671_v0 = vpop.f32.mrb[3].mxu1 }
 0x2a7   : > { %1732 = vst [vmem:[%s2763_s30 + $0x8] sm:$0xff] %v1607_v63  ;;  %1748 = vst [vmem:[%s2763_s30 + $0x88] sm:$0xff] %v1671_v0 }
 0x2ab   : > { %v2246_v1 = vpop.f32.mrb[4].mxu0  ;;  %v2262_v2 = vpop.f32.mrb[4].mxu1 }
 0x2ac   : > { %1737 = vst [vmem:[%s2763_s30 + $0x30] sm:$0xff] %v2246_v1  ;;  %1753 = vst [vmem:[%s2763_s30 + $0xb0] sm:$0xff] %v2262_v2  ;;  %v1620_v3 = vpop.f32.mrb[5].mxu0  ;;  %v1684_v4 = vpop.f32.mrb[5].mxu1 }
 0x2ad   : > { %1735 = vst [vmem:[%s2763_s30 + $0x20] sm:$0xff] %v1620_v3  ;;  %1751 = vst [vmem:[%s2763_s30 + $0xa0] sm:$0xff] %v1684_v4  ;;  %v2247_v5 = vpop.f32.mrb[6].mxu0  ;;  %v2263_v6 = vpop.f32.mrb[6].mxu1 }
 0x2ae   : > { %1738 = vst [vmem:[%s2763_s30 + $0x38] sm:$0xff] %v2247_v5  ;;  %1754 = vst [vmem:[%s2763_s30 + $0xb8] sm:$0xff] %v2263_v6  ;;  %v1623_v7 = vpop.f32.mrb[7].mxu0  ;;  %v1687_v8 = vpop.f32.mrb[7].mxu1 }
 0x2af   : > { %1736 = vst [vmem:[%s2763_s30 + $0x28] sm:$0xff] %v1623_v7  ;;  %1752 = vst [vmem:[%s2763_s30 + $0xa8] sm:$0xff] %v1687_v8 }
 0x2b3   : > { %v2250_v9 = vpop.f32.mrb[8].mxu0  ;;  %v2266_v10 = vpop.f32.mrb[8].mxu1 }
 0x2b4   : > { %1741 = vst [vmem:[%s2763_s30 + $0x50] sm:$0xff] %v2250_v9  ;;  %1757 = vst [vmem:[%s2763_s30 + $0xd0] sm:$0xff] %v2266_v10  ;;  %v1636_v11 = vpop.f32.mrb[9].mxu0  ;;  %v1700_v12 = vpop.f32.mrb[9].mxu1 }
 0x2b5   : > { %1739 = vst [vmem:[%s2763_s30 + $0x40] sm:$0xff] %v1636_v11  ;;  %1755 = vst [vmem:[%s2763_s30 + $0xc0] sm:$0xff] %v1700_v12  ;;  %v2251_v13 = vpop.f32.mrb[10].mxu0  ;;  %v2267_v14 = vpop.f32.mrb[10].mxu1 }
 0x2b6   : > { %1742 = vst [vmem:[%s2763_s30 + $0x58] sm:$0xff] %v2251_v13  ;;  %1758 = vst [vmem:[%s2763_s30 + $0xd8] sm:$0xff] %v2267_v14  ;;  %v1639_v15 = vpop.f32.mrb[11].mxu0  ;;  %v1703_v16 = vpop.f32.mrb[11].mxu1 }
 0x2b7   : > { %1740 = vst [vmem:[%s2763_s30 + $0x48] sm:$0xff] %v1639_v15  ;;  %1756 = vst [vmem:[%s2763_s30 + $0xc8] sm:$0xff] %v1703_v16 }
 0x2bb   : > { %v2254_v17 = vpop.f32.mrb[12].mxu0  ;;  %v2270_v18 = vpop.f32.mrb[12].mxu1 }
 0x2bc   : > { %1745 = vst [vmem:[%s2763_s30 + $0x70] sm:$0xff] %v2254_v17  ;;  %1761 = vst [vmem:[%s2763_s30 + $0xf0] sm:$0xff] %v2270_v18  ;;  %v1652_v19 = vpop.f32.mrb[13].mxu0  ;;  %v1716_v20 = vpop.f32.mrb[13].mxu1 }
 0x2bd   : > { %1743 = vst [vmem:[%s2763_s30 + $0x60] sm:$0xff] %v1652_v19  ;;  %1759 = vst [vmem:[%s2763_s30 + $0xe0] sm:$0xff] %v1716_v20  ;;  %v2255_v21 = vpop.f32.mrb[14].mxu0  ;;  %v2271_v22 = vpop.f32.mrb[14].mxu1 }
 0x2be   : > { %1746 = vst [vmem:[%s2763_s30 + $0x78] sm:$0xff] %v2255_v21  ;;  %1762 = vst [vmem:[%s2763_s30 + $0xf8] sm:$0xff] %v2271_v22  ;;  %v1655_v23 = vpop.f32.mrb[15].mxu0  ;;  %v1719_v24 = vpop.f32.mrb[15].mxu1 }
 0x2bf   : > { %1744 = vst [vmem:[%s2763_s30 + $0x68] sm:$0xff] %v1655_v23  ;;  %1760 = vst [vmem:[%s2763_s30 + $0xe8] sm:$0xff] %v1719_v24 }
 0x2c0 PF: > { %s13_s18 = sadd.s32 1, %s2535_s18   ;;  %s2946_s12 = smov %s2515_s13 }
 0x2c1   : > { %p10_p0 = scmp.ge.s32.totalorder %s13_s18, 10   ;;  %s2947_s13 = smov %s2609_s25 }
 0x2c2   : > { %s2948_s14 = smov %s2527_s16  ;;  %s2949_s15 = smov %s2531_s17 }
 0x2c3   : > { %s2950_s16 = smov %s2953_s19  ;;  %s2951_s17 = smov %s2957_s20 }
 0x2c4   :  { %12 = sbr.rel (!%p10_p0) target bundleno = 4 (0x4), region = 101 }

</bundles_post_ra>
